<compile_context>
chip_gen: v7x
topology: tpu7x:2x2x1
jax: 0.10.0
libtpu: 0.0.40
codegen_flags: <defaults>
</compile_context>

<pallas_src>
import functools

import jax
import jax.numpy as jnp
from jax.experimental import pallas as pl
from jax.experimental.pallas import tpu as pltpu


def _round_up(n, m):
    return ((n + m - 1) // m) * m


def mlp_kernel(x_ref, w1_ref, b1_ref, w2_ref, b2_ref, w3_ref, b3_ref, y_ref):
    """One batch tile: (TB, 32) -> (TB, 1).

    x/w1/w2 arrive as bf16 (full-rate MXU on v6e/v7x, halved activation DMA);
    accumulation and all element-wise math stay in f32 (v5e has no bf16 VPU/EUP).
    """
    # fc1 + bias + ReLU
    h1 = jnp.dot(x_ref[...], w1_ref[...], preferred_element_type=jnp.float32)
    h1 = jnp.maximum(h1 + b1_ref[...], 0.0)

    # fc2 + bias + ReLU (cast to bf16 only at the MXU input)
    h2 = jnp.dot(h1.astype(jnp.bfloat16), w2_ref[...],
                 preferred_element_type=jnp.float32)
    h2 = jnp.maximum(h2 + b2_ref[...], 0.0)

    # out layer: N=1, so skip the MXU (it would push a full result column and
    # discard 127/128 of it) -> VPU multiply + XLU lane reduction instead.
    logits = jnp.sum(h2 * w3_ref[...], axis=-1, keepdims=True) + b3_ref[...]

    # sigmoid: exp on the EUP, approximate reciprocal also on the (idle) EUP slot.
    y_ref[...] = pl.reciprocal(1.0 + jnp.exp(-logits), approx=True)
    # NOTE: the (TB, 1) store is a tiny masked vst; output traffic is 1/32 of the
    # input traffic, so a lane-dense transpose is not worth the XLU work here.


@functools.partial(jax.jit, static_argnames=("tb",))
def mlp_forward(x, w1, b1, w2, b2, w3, b3, *, tb=1024):
    B, F = x.shape

    # Large batch tile (amortizes the ~0.35us/step floor, lets the x DMA pipeline
    # against compute), but never larger than the (8-padded) batch.
    tb = min(tb, _round_up(B, 8))
    b_pad = _round_up(B, tb)
    if b_pad != B:
        x = jnp.pad(x, ((0, b_pad - B), (0, 0)))

    # bf16 at the matmul inputs; biases / last-layer weights stay f32 for the
    # element-wise path.  w3 is reshaped to a (1, 256) row for the lane reduction.
    x_lo = x.astype(jnp.bfloat16)
    w1_lo = w1.astype(jnp.bfloat16)
    w2_lo = w2.astype(jnp.bfloat16)
    w3_row = w3.reshape(1, -1).astype(jnp.float32)

    # Constant index_map -> weights/biases fetched once and kept VMEM-resident
    # across all grid steps.
    resident = lambda arr: pl.BlockSpec(arr.shape, lambda i: (0,) * arr.ndim)

    y = pl.pallas_call(
        mlp_kernel,
        out_shape=jax.ShapeDtypeStruct((b_pad, 1), jnp.float32),
        grid=(pl.cdiv(b_pad, tb),),
        in_specs=[
            pl.BlockSpec((tb, F), lambda i: (i, 0)),   # x: tiled over batch
            resident(w1_lo), resident(b1),
            resident(w2_lo), resident(b2),
            resident(w3_row), resident(b3),
        ],
        out_specs=pl.BlockSpec((tb, 1), lambda i: (i, 0)),
        # Batch axis is embarrassingly parallel -> shards across v7x's two
        # TensorCores; harmless on single-TC v5e/v6e.
        compiler_params=pltpu.CompilerParams(
            dimension_semantics=("parallel",)),
    )(x_lo, w1_lo, b1, w2_lo, b2, w3_row, b3)

    return y[:B]


def init_linear(key, in_f, out_f):
    # Deterministic init mimicking PyTorch nn.Linear default: U(-1/sqrt(in), 1/sqrt(in)).
    # Stored as (in_f, out_f), i.e. transposed relative to PyTorch's (out_f, in_f).
    kw, kb = jax.random.split(key)
    bound = 1.0 / jnp.sqrt(jnp.float32(in_f))
    w = jax.random.uniform(kw, (in_f, out_f), jnp.float32, -bound, bound)
    b = jax.random.uniform(kb, (1, out_f), jnp.float32, -bound, bound)
    return w, b


if __name__ == "__main__":
    key = jax.random.PRNGKey(0)
    kx, k1, k2, k3 = jax.random.split(key, 4)

    B = 4096  # exercises the batch grid: 4 tiles of 1024 rows
    x = jax.random.normal(kx, (B, 32), jnp.float32)

    w1, b1 = init_linear(k1, 32, 64)
    w2, b2 = init_linear(k2, 64, 256)
    w3, b3 = init_linear(k3, 256, 1)

    y = mlp_forward(x, w1, b1, w2, b2, w3, b3)
    jax.block_until_ready(y)
    assert y.shape == (B, 1)

    # Reference 1: mirrors the kernel's precision (bf16 MXU inputs, f32 accumulation).
    xb, w1b, w2b = (a.astype(jnp.bfloat16) for a in (x, w1, w2))
    h1 = jnp.maximum(jnp.dot(xb, w1b, preferred_element_type=jnp.float32) + b1, 0.0)
    h2 = jnp.maximum(
        jnp.dot(h1.astype(jnp.bfloat16), w2b, preferred_element_type=jnp.float32) + b2,
        0.0)
    y_ref_lo = jax.nn.sigmoid(h2 @ w3 + b3)
    assert jnp.allclose(y, y_ref_lo, atol=5e-3, rtol=5e-3), \
        float(jnp.max(jnp.abs(y - y_ref_lo)))

    # Reference 2: full-f32 PyTorch-equivalent forward (looser tol: bf16 rounding).
    h1f = jnp.maximum(x @ w1 + b1, 0.0)
    h2f = jnp.maximum(h1f @ w2 + b2, 0.0)
    y_ref_f32 = jax.nn.sigmoid(h2f @ w3 + b3)
    assert jnp.allclose(y, y_ref_f32, atol=3e-2), \
        float(jnp.max(jnp.abs(y - y_ref_f32)))

    print("KERNEL_OK")
</pallas_src>

<mosaic_0001>
module attributes {stable_mosaic.version = 11 : i64} {
  func.func @mlp_kernel(%arg0: i32, %arg1: memref<1024x32xbf16, #tpu.memory_space<vmem>>, %arg2: memref<32x64xbf16, #tpu.memory_space<vmem>>, %arg3: memref<1x64xf32, #tpu.memory_space<vmem>>, %arg4: memref<64x256xbf16, #tpu.memory_space<vmem>>, %arg5: memref<1x256xf32, #tpu.memory_space<vmem>>, %arg6: memref<1x256xf32, #tpu.memory_space<vmem>>, %arg7: memref<1x1xf32, #tpu.memory_space<vmem>>, %arg8: memref<1024x1xf32, #tpu.memory_space<vmem>>) attributes {dimension_semantics = [#tpu.dimension_semantics<parallel>], iteration_bounds = array<i64: 4>, scalar_prefetch = 0 : i64, scratch_operands = 0 : i64, tpu.core_type = #tpu.core_type<tc>, window_params = [{transform_indices = @transform_0, window_bounds = array<i64: 1024, 32>}, {pipeline_mode = #tpu.pipeline_mode<synchronous>, transform_indices = @transform_1, window_bounds = array<i64: 32, 64>}, {pipeline_mode = #tpu.pipeline_mode<synchronous>, transform_indices = @transform_2, window_bounds = array<i64: 1, 64>}, {pipeline_mode = #tpu.pipeline_mode<synchronous>, transform_indices = @transform_3, window_bounds = array<i64: 64, 256>}, {pipeline_mode = #tpu.pipeline_mode<synchronous>, transform_indices = @transform_4, window_bounds = array<i64: 1, 256>}, {pipeline_mode = #tpu.pipeline_mode<synchronous>, transform_indices = @transform_5, window_bounds = array<i64: 1, 256>}, {pipeline_mode = #tpu.pipeline_mode<synchronous>, transform_indices = @transform_6, window_bounds = array<i64: 1, 1>}, {transform_indices = @transform_7, window_bounds = array<i64: 1024, 1>}]} {
    %c0 = arith.constant 0 : index
    %c0_0 = arith.constant 0 : index
    %0 = vector.load %arg1[%c0, %c0_0] : memref<1024x32xbf16, #tpu.memory_space<vmem>>, vector<1024x32xbf16>
    %c0_1 = arith.constant 0 : index
    %c0_2 = arith.constant 0 : index
    %1 = vector.load %arg2[%c0_1, %c0_2] : memref<32x64xbf16, #tpu.memory_space<vmem>>, vector<32x64xbf16>
    %cst = arith.constant dense<0.000000e+00> : vector<1024x64xf32>
    %2 = tpu.matmul %0, %1, %cst {dimension_numbers = #tpu.dot_dimension_numbers<[1], [0], [0], [1], [0, 0, 1, 1], [], []>} : vector<1024x32xbf16>, vector<32x64xbf16>, vector<1024x64xf32> -> vector<1024x64xf32>
    %c0_3 = arith.constant 0 : index
    %c0_4 = arith.constant 0 : index
    %3 = vector.load %arg3[%c0_3, %c0_4] : memref<1x64xf32, #tpu.memory_space<vmem>>, vector<1x64xf32>
    %4 = vector.broadcast %3 : vector<1x64xf32> to vector<1024x64xf32>
    %5 = arith.addf %2, %4 : vector<1024x64xf32>
    %cst_5 = arith.constant 0.000000e+00 : f32
    %6 = vector.broadcast %cst_5 : f32 to vector<1024x64xf32>
    %7 = arith.maximumf %5, %6 : vector<1024x64xf32>
    %8 = arith.truncf %7 : vector<1024x64xf32> to vector<1024x64xbf16>
    %c0_6 = arith.constant 0 : index
    %c0_7 = arith.constant 0 : index
    %9 = vector.load %arg4[%c0_6, %c0_7] : memref<64x256xbf16, #tpu.memory_space<vmem>>, vector<64x256xbf16>
    %cst_8 = arith.constant dense<0.000000e+00> : vector<1024x256xf32>
    %10 = tpu.matmul %8, %9, %cst_8 {dimension_numbers = #tpu.dot_dimension_numbers<[1], [0], [0], [1], [0, 0, 1, 1], [], []>} : vector<1024x64xbf16>, vector<64x256xbf16>, vector<1024x256xf32> -> vector<1024x256xf32>
    %c0_9 = arith.constant 0 : index
    %c0_10 = arith.constant 0 : index
    %11 = vector.load %arg5[%c0_9, %c0_10] : memref<1x256xf32, #tpu.memory_space<vmem>>, vector<1x256xf32>
    %12 = vector.broadcast %11 : vector<1x256xf32> to vector<1024x256xf32>
    %13 = arith.addf %10, %12 : vector<1024x256xf32>
    %cst_11 = arith.constant 0.000000e+00 : f32
    %14 = vector.broadcast %cst_11 : f32 to vector<1024x256xf32>
    %15 = arith.maximumf %13, %14 : vector<1024x256xf32>
    %c0_12 = arith.constant 0 : index
    %c0_13 = arith.constant 0 : index
    %16 = vector.load %arg6[%c0_12, %c0_13] : memref<1x256xf32, #tpu.memory_space<vmem>>, vector<1x256xf32>
    %17 = vector.broadcast %16 : vector<1x256xf32> to vector<1024x256xf32>
    %18 = arith.mulf %15, %17 : vector<1024x256xf32>
    %cst_14 = arith.constant dense<0.000000e+00> : vector<1024xf32>
    %19 = vector.multi_reduction <add>, %18, %cst_14 [1] : vector<1024x256xf32> to vector<1024xf32>
    %20 = vector.shape_cast %19 : vector<1024xf32> to vector<1024x1xf32>
    %c0_15 = arith.constant 0 : index
    %c0_16 = arith.constant 0 : index
    %21 = vector.load %arg7[%c0_15, %c0_16] : memref<1x1xf32, #tpu.memory_space<vmem>>, vector<1x1xf32>
    %22 = vector.broadcast %21 : vector<1x1xf32> to vector<1024x1xf32>
    %23 = arith.addf %20, %22 : vector<1024x1xf32>
    %cst_17 = arith.constant 0.000000e+00 : f32
    %24 = vector.broadcast %cst_17 : f32 to vector<1024x1xf32>
    %25 = arith.subf %24, %23 : vector<1024x1xf32>
    %26 = math.exp %25 : vector<1024x1xf32>
    %cst_18 = arith.constant 1.000000e+00 : f32
    %27 = vector.broadcast %cst_18 : f32 to vector<1024x1xf32>
    %28 = arith.addf %27, %26 : vector<1024x1xf32>
    %29 = tpu.reciprocal %28 {approx = true} : vector<1024x1xf32> -> vector<1024x1xf32>
    %c0_19 = arith.constant 0 : index
    %c0_20 = arith.constant 0 : index
    %30 = vector.load %arg8[%c0_19, %c0_20] : memref<1024x1xf32, #tpu.memory_space<vmem>>, vector<1024x1xf32>
    tpu.vector_store %arg8[%c0_19, %c0_20], %29 {strides = array<i32>} : memref<1024x1xf32, #tpu.memory_space<vmem>>, vector<1024x1xf32>,
    return
  }
  func.func @transform_0(%arg0: i32) -> (i32, i32) {
    %c0_i32 = arith.constant 0 : i32
    %c0_i32_0 = arith.constant 0 : i32
    return %arg0, %c0_i32 : i32, i32
  }
  func.func @transform_1(%arg0: i32) -> (i32, i32) {
    %c0_i32 = arith.constant 0 : i32
    %c0_i32_0 = arith.constant 0 : i32
    %c0_i32_1 = arith.constant 0 : i32
    return %c0_i32, %c0_i32_0 : i32, i32
  }
  func.func @transform_2(%arg0: i32) -> (i32, i32) {
    %c0_i32 = arith.constant 0 : i32
    %c0_i32_0 = arith.constant 0 : i32
    %c0_i32_1 = arith.constant 0 : i32
    return %c0_i32, %c0_i32_0 : i32, i32
  }
  func.func @transform_3(%arg0: i32) -> (i32, i32) {
    %c0_i32 = arith.constant 0 : i32
    %c0_i32_0 = arith.constant 0 : i32
    %c0_i32_1 = arith.constant 0 : i32
    return %c0_i32, %c0_i32_0 : i32, i32
  }
  func.func @transform_4(%arg0: i32) -> (i32, i32) {
    %c0_i32 = arith.constant 0 : i32
    %c0_i32_0 = arith.constant 0 : i32
    %c0_i32_1 = arith.constant 0 : i32
    return %c0_i32, %c0_i32_0 : i32, i32
  }
  func.func @transform_5(%arg0: i32) -> (i32, i32) {
    %c0_i32 = arith.constant 0 : i32
    %c0_i32_0 = arith.constant 0 : i32
    %c0_i32_1 = arith.constant 0 : i32
    return %c0_i32, %c0_i32_0 : i32, i32
  }
  func.func @transform_6(%arg0: i32) -> (i32, i32) {
    %c0_i32 = arith.constant 0 : i32
    %c0_i32_0 = arith.constant 0 : i32
    %c0_i32_1 = arith.constant 0 : i32
    return %c0_i32, %c0_i32_0 : i32, i32
  }
  func.func @transform_7(%arg0: i32) -> (i32, i32) {
    %c0_i32 = arith.constant 0 : i32
    %c0_i32_0 = arith.constant 0 : i32
    return %arg0, %c0_i32 : i32, i32
  }
}

</mosaic_0001>

<bundles_post_ra>
// kernel: mlp_forward.1
= control target key start
LH: loop header
LB: loop body
LE: loop exit
PB: predicated region body
PF: predicated region fallthrough
CT: control target
= control target key end

     0   :  { %s5556_s26 = smov 0   ;;  %s7285_s0 = inlined_call_operand.vmem [shape: bf16[4096,32], index: 0, kind: input, shape index: {}]   ;;  %s7286_s1 = inlined_call_operand.vmem [shape: bf16[32,64], index: 1, kind: input, shape index: {}]   ;;  %s7287_s2 = inlined_call_operand.vmem [shape: f32[1,64], index: 2, kind: input, shape index: {}]   ;;  %s7288_s3 = inlined_call_operand.vmem [shape: bf16[64,256], index: 3, kind: input, shape index: {}]   ;;  %s7289_s4 = inlined_call_operand.vmem [shape: f32[1,256], index: 4, kind: input, shape index: {}]   ;;  %s7290_s5 = inlined_call_operand.vmem [shape: f32[1,256], index: 5, kind: input, shape index: {}]   ;;  %s7291_s6 = inlined_call_operand.<no memory space> [shape: f32[1,1], index: 6, kind: input, shape index: {}]   ;;  %s7292_s7 = inlined_call_operand.vmem [shape: f32[4096,1], index: 7, kind: output, shape index: {}]  }
   0x1   :  { %v12_v0 = vstv %s7291_s6 }
   0x2   :  { %13 = vst [vmem:[#allocation2] sm:$0x1] %v12_v0 }
   0x3 LB: > { %s4480_s27 = sadd.s32 4294967295, %s5510_s26   ;;  %p4484_p0 = scmp.ge.s32.totalorder %s5510_s26, 1  ;;  %s5510_s26 = sphi %s5556_s26, %s19_s26  }
   0x4   : > { %p240_p1 = scmp.lt.s32.totalorder %s5510_s26, 5 }
   0x6   : > { %p241_p2 = pnand %p4484_p0, %p240_p1 }
   0x7   : > { %v4910_v1 = vld [vmem:[%s7286_s1] sm:$0xff] (!%p241_p2)   ;;  %s4485_s6 = sshll.u32 (!%p241_p2), %s4480_s27, 7  ;;  %v4911_v2 = vld [vmem:[%s7286_s1 + $0x8] sm:$0xff] (!%p241_p2)   ;;  %vm756_vm0 = vcmask (!%p241_p2), 261120   ;;  %v4967_v26 = vld [vmem:[%s7288_s3 + $0x10] ss:$8 sps:$4 sm:$0xff] (!%p241_p2)  }
   0x8   : > { %244 = sbr.rel (%p241_p2) target bundleno = 1078 (0x436), region = 48  ;;  %p273_p3 = scmp.lt.s32.totalorder (!%p241_p2), %s4485_s6, 511  ;;  %4761 = vmatprep.subr.bf16.mxu0 (!%p241_p2), %v4910_v1  ;;  %v4948_v14 = vld [vmem:[%s7288_s3] ss:$8 sps:$4 sm:$0xff] (!%p241_p2)   ;;  %v4950_v15 = vld [vmem:[%s7288_s3 + $0x4] ss:$8 sps:$4 sm:$0xff] (!%p241_p2)  }
   0x9   : > { %4762 = vmatpush3.bf16.msra.mxu0 (!%p241_p2), %v4910_v1  ;;  %4893 = vmatprep.subr.bf16.mxu1 (!%p241_p2), %v4950_v15  ;;  %v4969_v27 = vld [vmem:[%s7288_s3 + $0x14] ss:$8 sps:$4 sm:$0xff] (!%p241_p2)   ;;  %v4984_v40 = vld [vmem:[%s7288_s3 + $0x24] ss:$8 sps:$4 sm:$0xff] (!%p241_p2)   ;;  %v4982_v41 = vld [vmem:[%s7288_s3 + $0x20] ss:$8 sps:$4 sm:$0xff] (!%p241_p2)  }
   0xa   : > { %4763 = vmatprep.subr.bf16.mxu0 (!%p241_p2), %v4911_v2  ;;  %4897 = vmatpush1.bf16.msra.mxu1 (!%p241_p2), %v4948_v14  ;;  %v4987_v42 = vld [vmem:[%s7288_s3 + $0x34] ss:$8 sps:$4 sm:$0xff] (!%p241_p2)   ;;  %v4985_v43 = vld [vmem:[%s7288_s3 + $0x30] ss:$8 sps:$4 sm:$0xff] (!%p241_p2)   ;;  %v5512_v46 = vmov (!%p241_p2), 0   ;;  %vm1746_vm1 = vcmask (!%p241_p2), 523264  }
   0xb   : > { %4894 = vmatprep.subr.bf16.mxu1 (!%p241_p2), %v4969_v27  ;;  %2131 = vmatprep.mubr.bf16.mxu1 (!%p241_p2), %v5512_v46  ;;  %vm4295_vm2 = vcmask (!%p241_p2), 7168  }
   0xd   : > { %4764 = vmatpush3.bf16.msra.mxu0 (!%p241_p2), %v4911_v2 }
   0xe   : > { %1939 = vmatprep.subr.bf16.mxu0 (!%p241_p2), %v4950_v15  ;;  %4898 = vmatpush1.bf16.msra.mxu1 (!%p241_p2), %v4967_v26 }
   0xf   : > { %s7294_s6 = smov (!%p273_p3, %s4485_s6), 511  ;;  %4895 = vmatprep.subr.bf16.mxu1 %v4984_v40 }
  0x10   : > { %s4486_s9 = sshll.u32 %s7294_s6, 2  ;;  %s4488_s15 = sshll.u32 %s7294_s6, 3 }
  0x11   : > { %s5576_s12 = scalar_lea.vmem %s7285_s0, %s4486_s9  ;;  %s6456_s17 = scalar_lea.vmem %s7292_s7, %s4488_s15 }
  0x12   : > { %v4912_v3 = vld [vmem:[%s5576_s12] sm:$0xff]   ;;  %v4913_v4 = vld [vmem:[%s5576_s12 + $0x8] sm:$0xff]   ;;  %v4914_v5 = vld [vmem:[%s5576_s12 + $0x10] sm:$0xff]   ;;  %4899 = vmatpush1.bf16.msra.mxu1 %v4982_v41 }
  0x13   : > { %4765 = vmatprep.mubr.msk.bf16.mxu0 %vm756_vm0, %v4912_v3  ;;  %v4915_v6 = vld [vmem:[%s5576_s12 + $0x18] sm:$0xff]   ;;  %v4916_v7 = vld [vmem:[%s5576_s12 + $0x20] sm:$0xff]   ;;  %v4917_v8 = vld [vmem:[%s5576_s12 + $0x28] sm:$0xff]   ;;  %4896 = vmatprep.subr.bf16.mxu1 %v4987_v42 }
  0x14   : > { %4766 = vmatmul.mubr.msk.bf16.vlgmr.msra.gmra.mrb[0].mxu0 %vm756_vm0, %v4913_v4  ;;  %v4918_v9 = vld [vmem:[%s5576_s12 + $0x30] sm:$0xff]   ;;  %v4919_v10 = vld [vmem:[%s5576_s12 + $0x38] sm:$0xff]   ;;  %v4920_v11 = vld [vmem:[%s5576_s12 + $0x40] sm:$0xff]  }
  0x15   : > { %4769 = vmatprep.mubr.msk.bf16.mxu0 %vm756_vm0, %v4914_v5  ;;  %v4921_v12 = vld [vmem:[%s5576_s12 + $0x48] sm:$0xff]   ;;  %v4922_v13 = vld [vmem:[%s5576_s12 + $0x50] sm:$0xff]   ;;  %v4923_v16 = vld [vmem:[%s5576_s12 + $0x58] sm:$0xff]   ;;  %1940 = vmatpush1.bf16.msra.mxu0 %v4948_v14 }
  0x16   : > { %v4924_v17 = vld [vmem:[%s5576_s12 + $0x60] sm:$0xff]   ;;  %v4925_v18 = vld [vmem:[%s5576_s12 + $0x68] sm:$0xff]   ;;  %v4926_v19 = vld [vmem:[%s5576_s12 + $0x70] sm:$0xff]   ;;  %1941 = vmatprep.subr.bf16.mxu0 %v4969_v27  ;;  %4900 = vmatpush1.bf16.msra.mxu1 %v4985_v43 }
  0x17   : > { %v4927_v20 = vld [vmem:[%s5576_s12 + $0x78] sm:$0xff]   ;;  %v4928_v21 = vld [vmem:[%s5576_s12 + $0x80] sm:$0xff]   ;;  %v4929_v22 = vld [vmem:[%s5576_s12 + $0x88] sm:$0xff]  }
  0x18   : > { %v4930_v23 = vld [vmem:[%s5576_s12 + $0x90] sm:$0xff]   ;;  %v4931_v24 = vld [vmem:[%s5576_s12 + $0x98] sm:$0xff]   ;;  %v4932_v25 = vld [vmem:[%s5576_s12 + $0xa0] sm:$0xff]  }
  0x19   : > { %1942 = vmatpush1.bf16.msra.mxu0 %v4967_v26  ;;  %v4933_v28 = vld [vmem:[%s5576_s12 + $0xa8] sm:$0xff]   ;;  %v4934_v29 = vld [vmem:[%s5576_s12 + $0xb0] sm:$0xff]   ;;  %v4935_v30 = vld [vmem:[%s5576_s12 + $0xb8] sm:$0xff]  }
  0x1a   : > { %v4936_v31 = vld [vmem:[%s5576_s12 + $0xc0] sm:$0xff]   ;;  %v4937_v32 = vld [vmem:[%s5576_s12 + $0xc8] sm:$0xff]   ;;  %v4938_v33 = vld [vmem:[%s5576_s12 + $0xd0] sm:$0xff]   ;;  %1943 = vmatprep.subr.bf16.mxu0 %v4984_v40 }
  0x1b   : > { %v4939_v34 = vld [vmem:[%s5576_s12 + $0xd8] sm:$0xff]   ;;  %v4940_v35 = vld [vmem:[%s5576_s12 + $0xe0] sm:$0xff]   ;;  %v4941_v36 = vld [vmem:[%s5576_s12 + $0xe8] sm:$0xff]  }
  0x1c   : > { %4770 = vmatmul.mubr.msk.bf16.gmra.mrb[4].mxu0 %vm756_vm0, %v4915_v6  ;;  %v4942_v37 = vld [vmem:[%s5576_s12 + $0xf0] sm:$0xff]   ;;  %v4943_v38 = vld [vmem:[%s5576_s12 + $0xf8] sm:$0xff]   ;;  %v4944_v39 = vld [vmem:[%s5576_s12 + $0x100] sm:$0xff]  }
  0x1d   : > { %4773 = vmatprep.mubr.msk.bf16.mxu0 %vm756_vm0, %v4916_v7  ;;  %1944 = vmatpush1.bf16.msra.mxu0 %v4982_v41  ;;  %v4945_v44 = vld [vmem:[%s5576_s12 + $0x108] sm:$0xff]   ;;  %v4946_v45 = vld [vmem:[%s5576_s12 + $0x110] sm:$0xff]   ;;  %v4947_v47 = vld [vmem:[%s5576_s12 + $0x118] sm:$0xff]  }
  0x1e   : > { %1945 = vmatprep.subr.bf16.mxu0 %v4987_v42  ;;  %v4951_v48 = vld [vmem:[%s5576_s12 + $0x120] sm:$0xff]   ;;  %v4952_v49 = vld [vmem:[%s5576_s12 + $0x128] sm:$0xff]   ;;  %v4953_v50 = vld [vmem:[%s5576_s12 + $0x130] sm:$0xff]  }
  0x1f   : > { %v4954_v51 = vld [vmem:[%s5576_s12 + $0x138] sm:$0xff]   ;;  %v4955_v52 = vld [vmem:[%s5576_s12 + $0x140] sm:$0xff]   ;;  %v4956_v53 = vld [vmem:[%s5576_s12 + $0x148] sm:$0xff]  }
  0x20   : > { %v4957_v54 = vld [vmem:[%s5576_s12 + $0x150] sm:$0xff]   ;;  %v4958_v55 = vld [vmem:[%s5576_s12 + $0x158] sm:$0xff]   ;;  %v4959_v56 = vld [vmem:[%s5576_s12 + $0x160] sm:$0xff]  }
  0x21   : > { %1946 = vmatpush1.bf16.msra.mxu0 %v4985_v43  ;;  %v4960_v57 = vld [vmem:[%s5576_s12 + $0x168] sm:$0xff]   ;;  %v4961_v58 = vld [vmem:[%s5576_s12 + $0x170] sm:$0xff]   ;;  %v4962_v59 = vld [vmem:[%s5576_s12 + $0x178] sm:$0xff]  }
  0x22   : > { %v4963_v60 = vld [vmem:[%s5576_s12 + $0x180] sm:$0xff]   ;;  %v4964_v61 = vld [vmem:[%s5576_s12 + $0x188] sm:$0xff]   ;;  %v4965_v62 = vld [vmem:[%s5576_s12 + $0x190] sm:$0xff]  }
  0x23   : > { %v4966_v63 = vld [vmem:[%s5576_s12 + $0x198] sm:$0xff]   ;;  %v4970_v0 = vld [vmem:[%s5576_s12 + $0x1a0] sm:$0xff]   ;;  %v4971_v1 = vld [vmem:[%s5576_s12 + $0x1a8] sm:$0xff]  }
  0x24   : > { %4774 = vmatmul.mubr.msk.bf16.gmra.mrb[8].mxu0 %vm756_vm0, %v4917_v8  ;;  %v4972_v2 = vld [vmem:[%s5576_s12 + $0x1b0] sm:$0xff]   ;;  %v5715_v3 = vld [vmem:[%s7287_s2] ss:$0 sm:$0xff]  ;;  %v4973_v7 = vld [vmem:[%s5576_s12 + $0x1b8] sm:$0xff]  }
  0x25   : > { %4777 = vmatprep.mubr.msk.bf16.mxu0 %vm756_vm0, %v4918_v9  ;;  %v4976_v26 = vld [vmem:[%s5576_s12 + $0x1d0] sm:$0xff]   ;;  %v4978_v42 = vld [vmem:[%s5576_s12 + $0x1e0] sm:$0xff]  }
  0x2c   : > { %4778 = vmatmul.mubr.msk.bf16.gmra.mrb[12].mxu0 %vm756_vm0, %v4919_v10  ;;  %v4974_v10 = vld [vmem:[%s5576_s12 + $0x1c0] sm:$0xff]  }
  0x2d   : > { %4781 = vmatprep.mubr.msk.bf16.mxu0 %vm756_vm0, %v4920_v11 }
  0x34   : > { %4782 = vmatmul.mubr.msk.bf16.gmra.mrb[16].mxu0 %vm756_vm0, %v4921_v12 }
  0x35   : > { %4785 = vmatprep.mubr.msk.bf16.mxu0 %vm756_vm0, %v4922_v13 }
  0x3c   : > { %4786 = vmatmul.mubr.msk.bf16.gmra.mrb[20].mxu0 %vm756_vm0, %v4923_v16 }
  0x3d   : > { %4789 = vmatprep.mubr.msk.bf16.mxu0 %vm756_vm0, %v4924_v17 }
  0x44   : > { %4790 = vmatmul.mubr.msk.bf16.gmra.mrb[24].mxu0 %vm756_vm0, %v4925_v18 }
  0x45   : > { %4793 = vmatprep.mubr.msk.bf16.mxu0 %vm756_vm0, %v4926_v19 }
  0x4c   : > { %4794 = vmatmul.mubr.msk.bf16.gmra.mrb[28].mxu0 %vm756_vm0, %v4927_v20 }
  0x4d   : > { %4797 = vmatprep.mubr.msk.bf16.mxu0 %vm756_vm0, %v4928_v21 }
  0x54   : > { %4798 = vmatmul.mubr.msk.bf16.gmra.mrb[32].mxu0 %vm756_vm0, %v4929_v22 }
  0x55   : > { %4801 = vmatprep.mubr.msk.bf16.mxu0 %vm756_vm0, %v4930_v23  ;;  %v4975_v23 = vld [vmem:[%s5576_s12 + $0x1c8] sm:$0xff]  }
  0x5c   : > { %4802 = vmatmul.mubr.msk.bf16.gmra.mrb[36].mxu0 %vm756_vm0, %v4931_v24 }
  0x5d   : > { %4805 = vmatprep.mubr.msk.bf16.mxu0 %vm756_vm0, %v4932_v25 }
  0x64   : > { %4806 = vmatmul.mubr.msk.bf16.gmra.mrb[40].mxu0 %vm756_vm0, %v4933_v28 }
  0x65   : > { %4809 = vmatprep.mubr.msk.bf16.mxu0 %vm756_vm0, %v4934_v29 }
  0x6c   : > { %4810 = vmatmul.mubr.msk.bf16.gmra.mrb[44].mxu0 %vm756_vm0, %v4935_v30 }
  0x6d   : > { %4813 = vmatprep.mubr.msk.bf16.mxu0 %vm756_vm0, %v4936_v31 }
  0x74   : > { %4814 = vmatmul.mubr.msk.bf16.gmra.mrb[48].mxu0 %vm756_vm0, %v4937_v32 }
  0x75   : > { %4817 = vmatprep.mubr.msk.bf16.mxu0 %vm756_vm0, %v4938_v33 }
  0x7c   : > { %4818 = vmatmul.mubr.msk.bf16.gmra.mrb[52].mxu0 %vm756_vm0, %v4939_v34 }
  0x7d   : > { %4821 = vmatprep.mubr.msk.bf16.mxu0 %vm756_vm0, %v4940_v35 }
  0x84   : > { %4822 = vmatmul.mubr.msk.bf16.gmra.mrb[56].mxu0 %vm756_vm0, %v4941_v36 }
  0x85   : > { %4825 = vmatprep.mubr.msk.bf16.mxu0 %vm756_vm0, %v4942_v37 }
  0x8c   : > { %4826 = vmatmul.mubr.msk.bf16.gmra.mrb[60].mxu0 %vm756_vm0, %v4943_v38 }
  0x8d   : > { %4829 = vmatprep.mubr.msk.bf16.mxu0 %vm756_vm0, %v4944_v39  ;;  %v4977_v39 = vld [vmem:[%s5576_s12 + $0x1d8] sm:$0xff]  }
  0x94   : > { %4830 = vmatmul.mubr.msk.bf16.gmra.mrb[64].mxu0 %vm756_vm0, %v4945_v44 }
  0x95   : > { %4833 = vmatprep.mubr.msk.bf16.mxu0 %vm756_vm0, %v4946_v45 }
  0x9c   : > { %4834 = vmatmul.mubr.msk.bf16.gmra.mrb[68].mxu0 %vm756_vm0, %v4947_v47 }
  0x9d   : > { %4837 = vmatprep.mubr.msk.bf16.mxu0 %vm756_vm0, %v4951_v48 }
  0xa4   : > { %4838 = vmatmul.mubr.msk.bf16.gmra.mrb[72].mxu0 %vm756_vm0, %v4952_v49 }
  0xa5   : > { %4841 = vmatprep.mubr.msk.bf16.mxu0 %vm756_vm0, %v4953_v50 }
  0xac   : > { %4842 = vmatmul.mubr.msk.bf16.gmra.mrb[76].mxu0 %vm756_vm0, %v4954_v51 }
  0xad   : > { %4845 = vmatprep.mubr.msk.bf16.mxu0 %vm756_vm0, %v4955_v52 }
  0xb4   : > { %4846 = vmatmul.mubr.msk.bf16.gmra.mrb[80].mxu0 %vm756_vm0, %v4956_v53 }
  0xb5   : > { %4849 = vmatprep.mubr.msk.bf16.mxu0 %vm756_vm0, %v4957_v54 }
  0xbc   : > { %4850 = vmatmul.mubr.msk.bf16.gmra.mrb[84].mxu0 %vm756_vm0, %v4958_v55 }
  0xbd   : > { %4853 = vmatprep.mubr.msk.bf16.mxu0 %vm756_vm0, %v4959_v56  ;;  %v4979_v56 = vld [vmem:[%s5576_s12 + $0x1e8] sm:$0xff]  }
  0xc4   : > { %4854 = vmatmul.mubr.msk.bf16.gmra.mrb[88].mxu0 %vm756_vm0, %v4960_v57 }
  0xc5   : > { %4857 = vmatprep.mubr.msk.bf16.mxu0 %vm756_vm0, %v4961_v58 }
  0xcc   : > { %4858 = vmatmul.mubr.msk.bf16.gmra.mrb[92].mxu0 %vm756_vm0, %v4962_v59  ;;  %v4980_v59 = vld [vmem:[%s5576_s12 + $0x1f0] sm:$0xff]  }
  0xcd   : > { %4861 = vmatprep.mubr.msk.bf16.mxu0 %vm756_vm0, %v4963_v60 }
  0xd4   : > { %4862 = vmatmul.mubr.msk.bf16.gmra.mrb[96].mxu0 %vm756_vm0, %v4964_v61 }
  0xd5   : > { %4865 = vmatprep.mubr.msk.bf16.mxu0 %vm756_vm0, %v4965_v62 }
  0xdc   : > { %4866 = vmatmul.mubr.msk.bf16.gmra.mrb[100].mxu0 %vm756_vm0, %v4966_v63 }
  0xdd   : > { %4869 = vmatprep.mubr.msk.bf16.mxu0 %vm756_vm0, %v4970_v0 }
  0xe4   : > { %4870 = vmatmul.mubr.msk.bf16.gmra.mrb[104].mxu0 %vm756_vm0, %v4971_v1 }
  0xe5   : > { %4873 = vmatprep.mubr.msk.bf16.mxu0 %vm756_vm0, %v4972_v2 }
  0xe7   : > { %v4767_v4 = vpop.f32.mrb[0].mxu0 }
  0xe8   : > { %v992_v5 = vadd.f32 %v4767_v4, %v5715_v3  ;;  %v983_v6 = vpop.f32.mrb[1].mxu0 }
  0xe9   : > { %v984_v8 = vadd.f32 %v5715_v3, %v983_v6  ;;  %v4768_v9 = vpop.f32.mrb[2].mxu0 }
  0xea   : > { %v995_v11 = vadd.f32 %v4768_v9, %v5715_v3  ;;  %v986_v12 = vpop.f32.mrb[3].mxu0  ;;  %v1496_v14 = vmax.f32 %v992_v5, 0.0  ;;  %v4981_v9 = vld [vmem:[%s5576_s12 + $0x1f8] sm:$0xff]  }
  0xeb   : > { %v987_v13 = vadd.f32 %v5715_v3, %v986_v12  ;;  %v1494_v16 = vmax.f32 %v984_v8, 0.0 }
  0xec   : > { %v1497_v15 = vmax.f32 %v995_v11, 0.0  ;;  %4874 = vmatmul.mubr.msk.bf16.gmra.mrb[108].mxu0 %vm756_vm0, %v4973_v7 }
  0xed   : > { %v1495_v17 = vmax.f32 %v987_v13, 0.0  ;;  %4877 = vmatprep.mubr.msk.bf16.mxu0 %vm756_vm0, %v4974_v10 }
  0xee   : > { %v5726_v18 = vpack.c.bf16 %v1497_v15, %v1496_v14 }
  0xef   : > { %v5728_v19 = vpack.c.bf16 %v1495_v17, %v1494_v16  ;;  %v4771_v20 = vpop.f32.mrb[4].mxu0 }
  0xf0   : > { %v1008_v21 = vadd.f32 %v4771_v20, %v5715_v3  ;;  %v999_v22 = vpop.f32.mrb[5].mxu0 }
  0xf1   : > { %v1000_v24 = vadd.f32 %v5715_v3, %v999_v22  ;;  %v4772_v25 = vpop.f32.mrb[6].mxu0 }
  0xf2   : > { %v1011_v27 = vadd.f32 %v4772_v25, %v5715_v3  ;;  %v1002_v28 = vpop.f32.mrb[7].mxu0  ;;  %v1500_v30 = vmax.f32 %v1008_v21, 0.0 }
  0xf3   : > { %v1003_v29 = vadd.f32 %v5715_v3, %v1002_v28  ;;  %v1498_v32 = vmax.f32 %v1000_v24, 0.0 }
  0xf4   : > { %v1501_v31 = vmax.f32 %v1011_v27, 0.0  ;;  %4878 = vmatmul.mubr.msk.bf16.gmra.mrb[112].mxu0 %vm756_vm0, %v4975_v23 }
  0xf5   : > { %v1499_v33 = vmax.f32 %v1003_v29, 0.0  ;;  %4881 = vmatprep.mubr.msk.bf16.mxu0 %vm756_vm0, %v4976_v26 }
  0xf6   : > { %v5738_v34 = vpack.c.bf16 %v1501_v31, %v1500_v30 }
  0xf7   : > { %v5740_v35 = vpack.c.bf16 %v1499_v33, %v1498_v32  ;;  %v4775_v36 = vpop.f32.mrb[8].mxu0 }
  0xf8   : > { %v1024_v37 = vadd.f32 %v4775_v36, %v5715_v3  ;;  %v1015_v38 = vpop.f32.mrb[9].mxu0 }
  0xf9   : > { %v1016_v40 = vadd.f32 %v5715_v3, %v1015_v38  ;;  %v4776_v41 = vpop.f32.mrb[10].mxu0 }
  0xfa   : > { %v1027_v43 = vadd.f32 %v4776_v41, %v5715_v3  ;;  %v1018_v44 = vpop.f32.mrb[11].mxu0  ;;  %v1504_v47 = vmax.f32 %v1024_v37, 0.0 }
  0xfb   : > { %v1019_v45 = vadd.f32 %v5715_v3, %v1018_v44  ;;  %v1502_v49 = vmax.f32 %v1016_v40, 0.0 }
  0xfc   : > { %v1505_v48 = vmax.f32 %v1027_v43, 0.0  ;;  %4882 = vmatmul.mubr.msk.bf16.gmra.mrb[116].mxu0 %vm756_vm0, %v4977_v39 }
  0xfd   : > { %v1503_v50 = vmax.f32 %v1019_v45, 0.0  ;;  %4885 = vmatprep.mubr.msk.bf16.mxu0 %vm756_vm0, %v4978_v42 }
  0xfe   : > { %v5750_v51 = vpack.c.bf16 %v1505_v48, %v1504_v47 }
  0xff   : > { %v5752_v52 = vpack.c.bf16 %v1503_v50, %v1502_v49  ;;  %v4779_v53 = vpop.f32.mrb[12].mxu0 }
 0x100   : > { %v1040_v54 = vadd.f32 %v4779_v53, %v5715_v3  ;;  %v1031_v55 = vpop.f32.mrb[13].mxu0 }
 0x101   : > { %v1032_v57 = vadd.f32 %v5715_v3, %v1031_v55  ;;  %v4780_v58 = vpop.f32.mrb[14].mxu0 }
 0x102   : > { %v1043_v60 = vadd.f32 %v4780_v58, %v5715_v3  ;;  %v1034_v61 = vpop.f32.mrb[15].mxu0  ;;  %v1508_v63 = vmax.f32 %v1040_v54, 0.0 }
 0x103   : > { %v1035_v62 = vadd.f32 %v5715_v3, %v1034_v61  ;;  %v1506_v1 = vmax.f32 %v1032_v57, 0.0 }
 0x104   : > { %v1509_v0 = vmax.f32 %v1043_v60, 0.0  ;;  %4886 = vmatmul.mubr.msk.bf16.gmra.mrb[120].mxu0 %vm756_vm0, %v4979_v56 }
 0x105   : > { %v1507_v2 = vmax.f32 %v1035_v62, 0.0  ;;  %4889 = vmatprep.mubr.msk.bf16.mxu0 %vm756_vm0, %v4980_v59 }
 0x106   : > { %v5762_v4 = vpack.c.bf16 %v1509_v0, %v1508_v63 }
 0x107   : > { %v5764_v5 = vpack.c.bf16 %v1507_v2, %v1506_v1  ;;  %v4783_v6 = vpop.f32.mrb[16].mxu0 }
 0x108   : > { %v1056_v7 = vadd.f32 %v4783_v6, %v5715_v3  ;;  %v1047_v8 = vpop.f32.mrb[17].mxu0 }
 0x109   : > { %v1048_v10 = vadd.f32 %v5715_v3, %v1047_v8  ;;  %v4784_v11 = vpop.f32.mrb[18].mxu0 }
 0x10a   : > { %v1059_v12 = vadd.f32 %v4784_v11, %v5715_v3  ;;  %v1050_v13 = vpop.f32.mrb[19].mxu0  ;;  %v1512_v15 = vmax.f32 %v1056_v7, 0.0 }
 0x10b   : > { %v1051_v14 = vadd.f32 %v5715_v3, %v1050_v13  ;;  %v1510_v17 = vmax.f32 %v1048_v10, 0.0 }
 0x10c   : > { %v1513_v16 = vmax.f32 %v1059_v12, 0.0  ;;  %4890 = vmatmul.mubr.msk.bf16.gmra.mrb[124].mxu0 %vm756_vm0, %v4981_v9 }
 0x10d   : > { %v1511_v20 = vmax.f32 %v1051_v14, 0.0  ;;  %1971 = vmatprep.mubr.bf16.mxu0 %v5512_v46 }
 0x10e   : > { %v5773_v21 = vpack.c.bf16 %v1513_v16, %v1512_v15 }
 0x10f   : > { %v5775_v22 = vpack.c.bf16 %v1511_v20, %v1510_v17  ;;  %v4787_v23 = vpop.f32.mrb[20].mxu0 }
 0x110   : > { %v1072_v24 = vadd.f32 %v4787_v23, %v5715_v3  ;;  %v1063_v25 = vpop.f32.mrb[21].mxu0 }
 0x111   : > { %v1064_v26 = vadd.f32 %v5715_v3, %v1063_v25  ;;  %v4788_v27 = vpop.f32.mrb[22].mxu0 }
 0x112   : > { %v1075_v28 = vadd.f32 %v4788_v27, %v5715_v3  ;;  %v1066_v29 = vpop.f32.mrb[23].mxu0  ;;  %v1516_v31 = vmax.f32 %v1072_v24, 0.0 }
 0x113   : > { %v1067_v30 = vadd.f32 %v5715_v3, %v1066_v29  ;;  %v1514_v33 = vmax.f32 %v1064_v26, 0.0 }
 0x114   : > { %v1517_v32 = vmax.f32 %v1075_v28, 0.0  ;;  %4628 = vmatmul.mubr.msk.bf16.vlgmr.msra.gmra.mrb[128].mxu0 %vm1746_vm1, %v5728_v19 }
 0x115   : > { %v1515_v36 = vmax.f32 %v1067_v30, 0.0  ;;  %1981 = vmatprep.mubr.bf16.mxu0 %v5512_v46 }
 0x116   : > { %v5784_v37 = vpack.c.bf16 %v1517_v32, %v1516_v31 }
 0x117   : > { %v5786_v38 = vpack.c.bf16 %v1515_v36, %v1514_v33  ;;  %v4791_v39 = vpop.f32.mrb[24].mxu0 }
 0x118   : > { %v1088_v40 = vadd.f32 %v4791_v39, %v5715_v3  ;;  %v1079_v41 = vpop.f32.mrb[25].mxu0 }
 0x119   : > { %v1080_v42 = vadd.f32 %v5715_v3, %v1079_v41  ;;  %v4792_v43 = vpop.f32.mrb[26].mxu0 }
 0x11a   : > { %v1091_v44 = vadd.f32 %v4792_v43, %v5715_v3  ;;  %v1082_v45 = vpop.f32.mrb[27].mxu0  ;;  %v1520_v47 = vmax.f32 %v1088_v40, 0.0 }
 0x11b   : > { %v1083_v19 = vadd.f32 %v5715_v3, %v1082_v45  ;;  %v1518_v49 = vmax.f32 %v1080_v42, 0.0 }
 0x11c   : > { %v1521_v48 = vmax.f32 %v1091_v44, 0.0  ;;  %4629 = vmatmul.mubr.msk.bf16.gmra.mrb[132].mxu0 %vm1746_vm1, %v5726_v18 }
 0x11d   : > { %v1519_v50 = vmax.f32 %v1083_v19, 0.0  ;;  %1991 = vmatprep.mubr.bf16.mxu0 %v5512_v46 }
 0x11e   : > { %v5795_v53 = vpack.c.bf16 %v1521_v48, %v1520_v47 }
 0x11f   : > { %v5797_v54 = vpack.c.bf16 %v1519_v50, %v1518_v49  ;;  %v4795_v55 = vpop.f32.mrb[28].mxu0 }
 0x120   : > { %v1104_v56 = vadd.f32 %v4795_v55, %v5715_v3  ;;  %v1095_v57 = vpop.f32.mrb[29].mxu0 }
 0x121   : > { %v1096_v58 = vadd.f32 %v5715_v3, %v1095_v57  ;;  %v4796_v59 = vpop.f32.mrb[30].mxu0 }
 0x122   : > { %v1107_v60 = vadd.f32 %v4796_v59, %v5715_v3  ;;  %v1098_v61 = vpop.f32.mrb[31].mxu0  ;;  %v1524_v62 = vmax.f32 %v1104_v56, 0.0 }
 0x123   : > { %v1099_v18 = vadd.f32 %v5715_v3, %v1098_v61  ;;  %v1522_v0 = vmax.f32 %v1096_v58, 0.0 }
 0x124   : > { %v1525_v63 = vmax.f32 %v1107_v60, 0.0  ;;  %4630 = vmatmul.mubr.msk.bf16.gmra.mrb[136].mxu0 %vm1746_vm1, %v5740_v35 }
 0x125   : > { %v1523_v1 = vmax.f32 %v1099_v18, 0.0  ;;  %2001 = vmatprep.mubr.bf16.mxu0 %v5512_v46 }
 0x126   : > { %v5806_v2 = vpack.c.bf16 %v1525_v63, %v1524_v62 }
 0x127   : > { %v5808_v6 = vpack.c.bf16 %v1523_v1, %v1522_v0  ;;  %v4799_v7 = vpop.f32.mrb[32].mxu0 }
 0x128   : > { %v1120_v8 = vadd.f32 %v4799_v7, %v5715_v3  ;;  %v1111_v9 = vpop.f32.mrb[33].mxu0 }
 0x129   : > { %v1112_v10 = vadd.f32 %v5715_v3, %v1111_v9  ;;  %v4800_v11 = vpop.f32.mrb[34].mxu0 }
 0x12a   : > { %v1123_v12 = vadd.f32 %v4800_v11, %v5715_v3  ;;  %v1114_v13 = vpop.f32.mrb[35].mxu0  ;;  %v1528_v14 = vmax.f32 %v1120_v8, 0.0 }
 0x12b   : > { %v1115_v35 = vadd.f32 %v5715_v3, %v1114_v13  ;;  %v1526_v16 = vmax.f32 %v1112_v10, 0.0 }
 0x12c   : > { %v1529_v15 = vmax.f32 %v1123_v12, 0.0  ;;  %4631 = vmatmul.mubr.msk.bf16.gmra.mrb[140].mxu0 %vm1746_vm1, %v5738_v34 }
 0x12d   : > { %v1527_v17 = vmax.f32 %v1115_v35, 0.0  ;;  %2011 = vmatprep.mubr.bf16.mxu0 %v5512_v46 }
 0x12e   : > { %v1639_v20 = vpack.c.bf16 %v1529_v15, %v1528_v14 }
 0x12f   : > { %v1638_v23 = vpack.c.bf16 %v1527_v17, %v1526_v16  ;;  %v4803_v24 = vpop.f32.mrb[36].mxu0 }
 0x130   : > { %v1136_v25 = vadd.f32 %v4803_v24, %v5715_v3  ;;  %v1127_v26 = vpop.f32.mrb[37].mxu0 }
 0x131   : > { %4644 = vmatmul.mubr.msk.bf16.vlgmr.msra.gmra.mrb[0].mxu1 %vm1746_vm1, %v1638_v23  ;;  %v1128_v27 = vadd.f32 %v5715_v3, %v1127_v26  ;;  %v4804_v28 = vpop.f32.mrb[38].mxu0 }
 0x132   : > { %v1532_v29 = vmax.f32 %v1136_v25, 0.0  ;;  %v1139_v30 = vadd.f32 %v4804_v28, %v5715_v3  ;;  %v1130_v31 = vpop.f32.mrb[39].mxu0  ;;  %2141 = vmatprep.mubr.bf16.mxu1 %v5512_v46 }
 0x133   : > { %v1530_v34 = vmax.f32 %v1128_v27, 0.0  ;;  %v1131_v32 = vadd.f32 %v5715_v3, %v1130_v31 }
 0x134   : > { %4632 = vmatmul.mubr.msk.bf16.gmra.mrb[144].mxu0 %vm1746_vm1, %v5752_v52  ;;  %v1533_v33 = vmax.f32 %v1139_v30, 0.0 }
 0x135   : > { %v1531_v36 = vmax.f32 %v1131_v32, 0.0  ;;  %2021 = vmatprep.mubr.bf16.mxu0 %v5512_v46 }
 0x136   : > { %v1641_v39 = vpack.c.bf16 %v1533_v33, %v1532_v29 }
 0x137   : > { %v1640_v40 = vpack.c.bf16 %v1531_v36, %v1530_v34  ;;  %v4807_v41 = vpop.f32.mrb[40].mxu0 }
 0x138   : > { %v1152_v42 = vadd.f32 %v4807_v41, %v5715_v3  ;;  %v1143_v43 = vpop.f32.mrb[41].mxu0 }
 0x139   : > { %4645 = vmatmul.mubr.msk.bf16.gmra.mrb[4].mxu1 %vm1746_vm1, %v1639_v20  ;;  %v1144_v44 = vadd.f32 %v5715_v3, %v1143_v43  ;;  %v4808_v45 = vpop.f32.mrb[42].mxu0 }
 0x13a   : > { %2151 = vmatprep.mubr.bf16.mxu1 %v5512_v46  ;;  %v1536_v19 = vmax.f32 %v1152_v42, 0.0  ;;  %v1155_v52 = vadd.f32 %v4808_v45, %v5715_v3  ;;  %v1146_v47 = vpop.f32.mrb[43].mxu0 }
 0x13b   : > { %v1534_v48 = vmax.f32 %v1144_v44, 0.0  ;;  %v1147_v49 = vadd.f32 %v5715_v3, %v1146_v47 }
 0x13c   : > { %4633 = vmatmul.mubr.msk.bf16.gmra.mrb[148].mxu0 %vm1746_vm1, %v5750_v51  ;;  %v1537_v50 = vmax.f32 %v1155_v52, 0.0 }
 0x13d   : > { %2031 = vmatprep.mubr.bf16.mxu0 %v5512_v46  ;;  %v1535_v55 = vmax.f32 %v1147_v49, 0.0 }
 0x13e   : > { %v1643_v56 = vpack.c.bf16 %v1537_v50, %v1536_v19 }
 0x13f   : > { %v1642_v57 = vpack.c.bf16 %v1535_v55, %v1534_v48  ;;  %v4811_v58 = vpop.f32.mrb[44].mxu0 }
 0x140   : > { %v1168_v59 = vadd.f32 %v4811_v58, %v5715_v3  ;;  %v1159_v60 = vpop.f32.mrb[45].mxu0 }
 0x141   : > { %4646 = vmatmul.mubr.msk.bf16.gmra.mrb[8].mxu1 %vm1746_vm1, %v1640_v40  ;;  %v1160_v61 = vadd.f32 %v5715_v3, %v1159_v60  ;;  %v4812_v18 = vpop.f32.mrb[46].mxu0 }
 0x142   : > { %2161 = vmatprep.mubr.bf16.mxu1 %v5512_v46  ;;  %v1540_v62 = vmax.f32 %v1168_v59, 0.0  ;;  %v1171_v51 = vadd.f32 %v4812_v18, %v5715_v3  ;;  %v1162_v63 = vpop.f32.mrb[47].mxu0 }
 0x143   : > { %v1538_v0 = vmax.f32 %v1160_v61, 0.0  ;;  %v1163_v1 = vadd.f32 %v5715_v3, %v1162_v63 }
 0x144   : > { %4634 = vmatmul.mubr.msk.bf16.gmra.mrb[152].mxu0 %vm1746_vm1, %v5764_v5  ;;  %v1541_v7 = vmax.f32 %v1171_v51, 0.0 }
 0x145   : > { %2041 = vmatprep.mubr.bf16.mxu0 %v5512_v46  ;;  %v1539_v8 = vmax.f32 %v1163_v1, 0.0 }
 0x146   : > { %v5844_v9 = vpack.c.bf16 %v1541_v7, %v1540_v62 }
 0x147   : > { %v1644_v10 = vpack.c.bf16 %v1539_v8, %v1538_v0  ;;  %v4815_v11 = vpop.f32.mrb[48].mxu0 }
 0x148   : > { %v1184_v12 = vadd.f32 %v4815_v11, %v5715_v3  ;;  %v1175_v13 = vpop.f32.mrb[49].mxu0 }
 0x149   : > { %4647 = vmatmul.mubr.msk.bf16.gmra.mrb[12].mxu1 %vm1746_vm1, %v1641_v39  ;;  %v1176_v35 = vadd.f32 %v5715_v3, %v1175_v13  ;;  %v4816_v14 = vpop.f32.mrb[50].mxu0 }
 0x14a   : > { %2171 = vmatprep.mubr.bf16.mxu1 %v5512_v46  ;;  %v1544_v15 = vmax.f32 %v1184_v12, 0.0  ;;  %v1187_v5 = vadd.f32 %v4816_v14, %v5715_v3  ;;  %v1178_v16 = vpop.f32.mrb[51].mxu0 }
 0x14b   : > { %v1542_v17 = vmax.f32 %v1176_v35, 0.0  ;;  %v1179_v20 = vadd.f32 %v5715_v3, %v1178_v16 }
 0x14c   : > { %4635 = vmatmul.mubr.msk.bf16.gmra.mrb[156].mxu0 %vm1746_vm1, %v5762_v4  ;;  %v1545_v23 = vmax.f32 %v1187_v5, 0.0 }
 0x14d   : > { %2051 = vmatprep.mubr.bf16.mxu0 %v5512_v46  ;;  %v1543_v24 = vmax.f32 %v1179_v20, 0.0 }
 0x14e   : > { %v5855_v25 = vpack.c.bf16 %v1545_v23, %v1544_v15 }
 0x14f   : > { %v5857_v26 = vpack.c.bf16 %v1543_v24, %v1542_v17  ;;  %v4819_v27 = vpop.f32.mrb[52].mxu0 }
 0x150   : > { %v1200_v28 = vadd.f32 %v4819_v27, %v5715_v3  ;;  %v1191_v29 = vpop.f32.mrb[53].mxu0 }
 0x151   : > { %4648 = vmatmul.mubr.msk.bf16.gmra.mrb[16].mxu1 %vm1746_vm1, %v1642_v57  ;;  %v1192_v30 = vadd.f32 %v5715_v3, %v1191_v29  ;;  %v4820_v31 = vpop.f32.mrb[54].mxu0 }
 0x152   : > { %2181 = vmatprep.mubr.bf16.mxu1 %v5512_v46  ;;  %v1548_v4 = vmax.f32 %v1200_v28, 0.0  ;;  %v1203_v34 = vadd.f32 %v4820_v31, %v5715_v3  ;;  %v1194_v32 = vpop.f32.mrb[55].mxu0 }
 0x153   : > { %v1546_v33 = vmax.f32 %v1192_v30, 0.0  ;;  %v1195_v36 = vadd.f32 %v5715_v3, %v1194_v32 }
 0x154   : > { %4636 = vmatmul.mubr.msk.bf16.gmra.mrb[160].mxu0 %vm1746_vm1, %v5775_v22  ;;  %v1549_v39 = vmax.f32 %v1203_v34, 0.0 }
 0x155   : > { %2061 = vmatprep.mubr.bf16.mxu0 %v5512_v46  ;;  %v1547_v40 = vmax.f32 %v1195_v36, 0.0 }
 0x156   : > { %v5868_v41 = vpack.c.bf16 %v1549_v39, %v1548_v4 }
 0x157   : > { %v5870_v42 = vpack.c.bf16 %v1547_v40, %v1546_v33  ;;  %v4823_v43 = vpop.f32.mrb[56].mxu0 }
 0x158   : > { %v1216_v44 = vadd.f32 %v4823_v43, %v5715_v3  ;;  %v1207_v45 = vpop.f32.mrb[57].mxu0 }
 0x159   : > { %4649 = vmatmul.mubr.msk.bf16.gmra.mrb[20].mxu1 %vm1746_vm1, %v1643_v56  ;;  %v1208_v19 = vadd.f32 %v5715_v3, %v1207_v45  ;;  %v4824_v52 = vpop.f32.mrb[58].mxu0 }
 0x15a   : > { %2191 = vmatprep.mubr.bf16.mxu1 %v5512_v46  ;;  %v1552_v22 = vmax.f32 %v1216_v44, 0.0  ;;  %v1219_v47 = vadd.f32 %v4824_v52, %v5715_v3  ;;  %v1210_v48 = vpop.f32.mrb[59].mxu0 }
 0x15b   : > { %v1550_v49 = vmax.f32 %v1208_v19, 0.0  ;;  %v1211_v50 = vadd.f32 %v5715_v3, %v1210_v48 }
 0x15c   : > { %4637 = vmatmul.mubr.msk.bf16.gmra.mrb[164].mxu0 %vm1746_vm1, %v5773_v21  ;;  %v1553_v55 = vmax.f32 %v1219_v47, 0.0 }
 0x15d   : > { %2071 = vmatprep.mubr.bf16.mxu0 %v5512_v46  ;;  %v1551_v57 = vmax.f32 %v1211_v50, 0.0 }
 0x15e   : > { %v5881_v56 = vpack.c.bf16 %v1553_v55, %v1552_v22 }
 0x15f   : > { %v5883_v58 = vpack.c.bf16 %v1551_v57, %v1550_v49  ;;  %v4827_v59 = vpop.f32.mrb[60].mxu0 }
 0x160   : > { %v1232_v60 = vadd.f32 %v4827_v59, %v5715_v3  ;;  %v1223_v61 = vpop.f32.mrb[61].mxu0 }
 0x161   : > { %4650 = vmatmul.mubr.msk.bf16.gmra.mrb[24].mxu1 %vm1746_vm1, %v1644_v10  ;;  %v1224_v18 = vadd.f32 %v5715_v3, %v1223_v61  ;;  %v4828_v62 = vpop.f32.mrb[62].mxu0 }
 0x162   : > { %2201 = vmatprep.mubr.bf16.mxu1 %v5512_v46  ;;  %v1556_v21 = vmax.f32 %v1232_v60, 0.0  ;;  %v1235_v51 = vadd.f32 %v4828_v62, %v5715_v3  ;;  %v1226_v63 = vpop.f32.mrb[63].mxu0 }
 0x163   : > { %v1554_v0 = vmax.f32 %v1224_v18, 0.0  ;;  %v1227_v1 = vadd.f32 %v5715_v3, %v1226_v63 }
 0x164   : > { %4638 = vmatmul.mubr.msk.bf16.gmra.mrb[168].mxu0 %vm1746_vm1, %v5786_v38  ;;  %v1557_v7 = vmax.f32 %v1235_v51, 0.0 }
 0x165   : > { %2081 = vmatprep.mubr.bf16.mxu0 %v5512_v46  ;;  %v1555_v8 = vmax.f32 %v1227_v1, 0.0 }
 0x166   : > { %v5894_v10 = vpack.c.bf16 %v1557_v7, %v1556_v21 }
 0x167   : > { %v5896_v11 = vpack.c.bf16 %v1555_v8, %v1554_v0  ;;  %v4831_v12 = vpop.f32.mrb[64].mxu0 }
 0x168   : > { %v1248_v13 = vadd.f32 %v4831_v12, %v5715_v3  ;;  %v1239_v35 = vpop.f32.mrb[65].mxu0 }
 0x169   : > { %4651 = vmatmul.mubr.msk.bf16.gmra.mrb[28].mxu1 %vm1746_vm1, %v5844_v9  ;;  %v1240_v14 = vadd.f32 %v5715_v3, %v1239_v35  ;;  %v4832_v15 = vpop.f32.mrb[66].mxu0 }
 0x16a   : > { %2211 = vmatprep.mubr.bf16.mxu1 %v5512_v46  ;;  %v1560_v38 = vmax.f32 %v1248_v13, 0.0  ;;  %v1251_v5 = vadd.f32 %v4832_v15, %v5715_v3  ;;  %v1242_v16 = vpop.f32.mrb[67].mxu0 }
 0x16b   : > { %v1558_v17 = vmax.f32 %v1240_v14, 0.0  ;;  %v1243_v20 = vadd.f32 %v5715_v3, %v1242_v16 }
 0x16c   : > { %4639 = vmatmul.mubr.msk.bf16.gmra.mrb[172].mxu0 %vm1746_vm1, %v5784_v37  ;;  %v1561_v23 = vmax.f32 %v1251_v5, 0.0 }
 0x16d   : > { %2091 = vmatprep.mubr.bf16.mxu0 %v5512_v46  ;;  %v1559_v24 = vmax.f32 %v1243_v20, 0.0 }
 0x16e   : > { %v5908_v9 = vpack.c.bf16 %v1561_v23, %v1560_v38 }
 0x16f   : > { %v5910_v27 = vpack.c.bf16 %v1559_v24, %v1558_v17  ;;  %v4835_v28 = vpop.f32.mrb[68].mxu0 }
 0x170   : > { %v1264_v29 = vadd.f32 %v4835_v28, %v5715_v3  ;;  %v1255_v30 = vpop.f32.mrb[69].mxu0 }
 0x171   : > { %4652 = vmatmul.mubr.msk.bf16.gmra.mrb[32].mxu1 %vm1746_vm1, %v5857_v26  ;;  %v1256_v31 = vadd.f32 %v5715_v3, %v1255_v30  ;;  %v4836_v4 = vpop.f32.mrb[70].mxu0 }
 0x172   : > { %2221 = vmatprep.mubr.bf16.mxu1 %v5512_v46  ;;  %v1564_v37 = vmax.f32 %v1264_v29, 0.0  ;;  %v1267_v34 = vadd.f32 %v4836_v4, %v5715_v3  ;;  %v1258_v32 = vpop.f32.mrb[71].mxu0 }
 0x173   : > { %v1562_v33 = vmax.f32 %v1256_v31, 0.0  ;;  %v1259_v36 = vadd.f32 %v5715_v3, %v1258_v32 }
 0x174   : > { %4640 = vmatmul.mubr.msk.bf16.gmra.mrb[176].mxu0 %vm1746_vm1, %v5797_v54  ;;  %v1565_v39 = vmax.f32 %v1267_v34, 0.0 }
 0x175   : > { %2101 = vmatprep.mubr.bf16.mxu0 %v5512_v46  ;;  %v1563_v40 = vmax.f32 %v1259_v36, 0.0 }
 0x176   : > { %v5922_v26 = vpack.c.bf16 %v1565_v39, %v1564_v37 }
 0x177   : > { %v5924_v43 = vpack.c.bf16 %v1563_v40, %v1562_v33  ;;  %v4839_v44 = vpop.f32.mrb[72].mxu0 }
 0x178   : > { %v1280_v45 = vadd.f32 %v4839_v44, %v5715_v3  ;;  %v1271_v19 = vpop.f32.mrb[73].mxu0 }
 0x179   : > { %4653 = vmatmul.mubr.msk.bf16.gmra.mrb[36].mxu1 %vm1746_vm1, %v5855_v25  ;;  %v1272_v52 = vadd.f32 %v5715_v3, %v1271_v19  ;;  %v4840_v22 = vpop.f32.mrb[74].mxu0 }
 0x17a   : > { %2231 = vmatprep.mubr.bf16.mxu1 %v5512_v46  ;;  %v1568_v54 = vmax.f32 %v1280_v45, 0.0  ;;  %v1283_v47 = vadd.f32 %v4840_v22, %v5715_v3  ;;  %v1274_v48 = vpop.f32.mrb[75].mxu0 }
 0x17b   : > { %v1566_v49 = vmax.f32 %v1272_v52, 0.0  ;;  %v1275_v50 = vadd.f32 %v5715_v3, %v1274_v48 }
 0x17c   : > { %4641 = vmatmul.mubr.msk.bf16.gmra.mrb[180].mxu0 %vm1746_vm1, %v5795_v53  ;;  %v1569_v55 = vmax.f32 %v1283_v47, 0.0 }
 0x17d   : > { %2111 = vmatprep.mubr.bf16.mxu0 %v5512_v46  ;;  %v1567_v57 = vmax.f32 %v1275_v50, 0.0 }
 0x17e   : > { %v5936_v25 = vpack.c.bf16 %v1569_v55, %v1568_v54 }
 0x17f   : > { %v5938_v59 = vpack.c.bf16 %v1567_v57, %v1566_v49  ;;  %v4843_v60 = vpop.f32.mrb[76].mxu0 }
 0x180   : > { %v1296_v61 = vadd.f32 %v4843_v60, %v5715_v3  ;;  %v1287_v18 = vpop.f32.mrb[77].mxu0 }
 0x181   : > { %4654 = vmatmul.mubr.msk.bf16.gmra.mrb[40].mxu1 %vm1746_vm1, %v5870_v42  ;;  %v1288_v62 = vadd.f32 %v5715_v3, %v1287_v18  ;;  %v4844_v21 = vpop.f32.mrb[78].mxu0 }
 0x182   : > { %2241 = vmatprep.mubr.bf16.mxu1 %v5512_v46  ;;  %v1572_v53 = vmax.f32 %v1296_v61, 0.0  ;;  %v1299_v51 = vadd.f32 %v4844_v21, %v5715_v3  ;;  %v1290_v63 = vpop.f32.mrb[79].mxu0 }
 0x183   : > { %v1570_v0 = vmax.f32 %v1288_v62, 0.0  ;;  %v1291_v1 = vadd.f32 %v5715_v3, %v1290_v63 }
 0x184   : > { %4642 = vmatmul.mubr.msk.bf16.gmra.mrb[184].mxu0 %vm1746_vm1, %v5808_v6  ;;  %v1573_v7 = vmax.f32 %v1299_v51, 0.0 }
 0x185   : > { %2121 = vmatprep.mubr.bf16.mxu0 %v5512_v46  ;;  %v1571_v8 = vmax.f32 %v1291_v1, 0.0 }
 0x186   : > { %v5950_v42 = vpack.c.bf16 %v1573_v7, %v1572_v53 }
 0x187   : > { %v5952_v12 = vpack.c.bf16 %v1571_v8, %v1570_v0  ;;  %v4847_v13 = vpop.f32.mrb[80].mxu0 }
 0x188   : > { %v1312_v35 = vadd.f32 %v4847_v13, %v5715_v3  ;;  %v1303_v14 = vpop.f32.mrb[81].mxu0 }
 0x189   : > { %4655 = vmatmul.mubr.msk.bf16.gmra.mrb[44].mxu1 %vm1746_vm1, %v5868_v41  ;;  %v1304_v15 = vadd.f32 %v5715_v3, %v1303_v14  ;;  %v4848_v38 = vpop.f32.mrb[82].mxu0 }
 0x18a   : > { %2251 = vmatprep.mubr.bf16.mxu1 %v5512_v46  ;;  %v1576_v6 = vmax.f32 %v1312_v35, 0.0  ;;  %v1315_v5 = vadd.f32 %v4848_v38, %v5715_v3  ;;  %v1306_v16 = vpop.f32.mrb[83].mxu0 }
 0x18b   : > { %v1574_v17 = vmax.f32 %v1304_v15, 0.0  ;;  %v1307_v20 = vadd.f32 %v5715_v3, %v1306_v16 }
 0x18c   : > { %4643 = vmatmul.mubr.msk.bf16.gmra.mrb[188].mxu0 %vm1746_vm1, %v5806_v2  ;;  %v1577_v23 = vmax.f32 %v1315_v5, 0.0 }
 0x18d   : > { %v1575_v24 = vmax.f32 %v1307_v20, 0.0 }
 0x18e   : > { %v5963_v28 = vpack.c.bf16 %v1577_v23, %v1576_v6 }
 0x18f   : > { %v5965_v41 = vpack.c.bf16 %v1575_v24, %v1574_v17  ;;  %v4851_v29 = vpop.f32.mrb[84].mxu0 }
 0x190   : > { %v1328_v30 = vadd.f32 %v4851_v29, %v5715_v3  ;;  %v1319_v31 = vpop.f32.mrb[85].mxu0 }
 0x191   : > { %4656 = vmatmul.mubr.msk.bf16.gmra.mrb[48].mxu1 %vm1746_vm1, %v5883_v58  ;;  %v1320_v4 = vadd.f32 %v5715_v3, %v1319_v31  ;;  %v4852_v37 = vpop.f32.mrb[86].mxu0 }
 0x192   : > { %2261 = vmatprep.mubr.bf16.mxu1 %v5512_v46  ;;  %v1580_v34 = vmax.f32 %v1328_v30, 0.0  ;;  %v1331_v2 = vadd.f32 %v4852_v37, %v5715_v3  ;;  %v1322_v32 = vpop.f32.mrb[87].mxu0 }
 0x193   : > { %v1578_v33 = vmax.f32 %v1320_v4, 0.0  ;;  %v1323_v36 = vadd.f32 %v5715_v3, %v1322_v32 }
 0x194   : > { %v1581_v39 = vmax.f32 %v1331_v2, 0.0 }
 0x195   : > { %v1579_v40 = vmax.f32 %v1323_v36, 0.0 }
 0x196   : > { %v5974_v44 = vpack.c.bf16 %v1581_v39, %v1580_v34 }
 0x197   : > { %v5976_v45 = vpack.c.bf16 %v1579_v40, %v1578_v33  ;;  %v4855_v19 = vpop.f32.mrb[88].mxu0 }
 0x198   : > { %v1344_v58 = vadd.f32 %v4855_v19, %v5715_v3  ;;  %v1335_v52 = vpop.f32.mrb[89].mxu0 }
 0x199   : > { %4657 = vmatmul.mubr.msk.bf16.gmra.mrb[52].mxu1 %vm1746_vm1, %v5881_v56  ;;  %v1336_v22 = vadd.f32 %v5715_v3, %v1335_v52  ;;  %v4856_v54 = vpop.f32.mrb[90].mxu0 }
 0x19a   : > { %2271 = vmatprep.mubr.bf16.mxu1 %v5512_v46  ;;  %v1584_v47 = vmax.f32 %v1344_v58, 0.0  ;;  %v1347_v48 = vadd.f32 %v4856_v54, %v5715_v3  ;;  %v1338_v49 = vpop.f32.mrb[91].mxu0 }
 0x19b   : > { %v1582_v50 = vmax.f32 %v1336_v22, 0.0  ;;  %v1339_v55 = vadd.f32 %v5715_v3, %v1338_v49 }
 0x19c   : > { %v1585_v57 = vmax.f32 %v1347_v48, 0.0 }
 0x19d   : > { %v1583_v60 = vmax.f32 %v1339_v55, 0.0 }
 0x19e   : > { %v5985_v61 = vpack.c.bf16 %v1585_v57, %v1584_v47 }
 0x19f   : > { %v5987_v18 = vpack.c.bf16 %v1583_v60, %v1582_v50  ;;  %v4859_v62 = vpop.f32.mrb[92].mxu0 }
 0x1a0   : > { %v1360_v56 = vadd.f32 %v4859_v62, %v5715_v3  ;;  %v1351_v21 = vpop.f32.mrb[93].mxu0 }
 0x1a1   : > { %4658 = vmatmul.mubr.msk.bf16.gmra.mrb[56].mxu1 %vm1746_vm1, %v5896_v11  ;;  %v1352_v53 = vadd.f32 %v5715_v3, %v1351_v21  ;;  %v4860_v51 = vpop.f32.mrb[94].mxu0 }
 0x1a2   : > { %2281 = vmatprep.mubr.bf16.mxu1 %v5512_v46  ;;  %v1588_v63 = vmax.f32 %v1360_v56, 0.0  ;;  %v1363_v0 = vadd.f32 %v4860_v51, %v5715_v3  ;;  %v1354_v1 = vpop.f32.mrb[95].mxu0 }
 0x1a3   : > { %v1586_v7 = vmax.f32 %v1352_v53, 0.0  ;;  %v1355_v8 = vadd.f32 %v5715_v3, %v1354_v1 }
 0x1a4   : > { %v1589_v13 = vmax.f32 %v1363_v0, 0.0 }
 0x1a5   : > { %v1587_v35 = vmax.f32 %v1355_v8, 0.0 }
 0x1a6   : > { %v5996_v14 = vpack.c.bf16 %v1589_v13, %v1588_v63 }
 0x1a7   : > { %v5998_v15 = vpack.c.bf16 %v1587_v35, %v1586_v7  ;;  %v4863_v38 = vpop.f32.mrb[96].mxu0 }
 0x1a8   : > { %v1376_v11 = vadd.f32 %v4863_v38, %v5715_v3  ;;  %v1367_v6 = vpop.f32.mrb[97].mxu0 }
 0x1a9   : > { %4659 = vmatmul.mubr.msk.bf16.gmra.mrb[60].mxu1 %vm1746_vm1, %v5894_v10  ;;  %v1368_v5 = vadd.f32 %v5715_v3, %v1367_v6  ;;  %v4864_v16 = vpop.f32.mrb[98].mxu0 }
 0x1aa   : > { %2291 = vmatprep.mubr.bf16.mxu1 %v5512_v46  ;;  %v1592_v17 = vmax.f32 %v1376_v11, 0.0  ;;  %v1379_v20 = vadd.f32 %v4864_v16, %v5715_v3  ;;  %v1370_v23 = vpop.f32.mrb[99].mxu0 }
 0x1ab   : > { %v1590_v24 = vmax.f32 %v1368_v5, 0.0  ;;  %v1371_v29 = vadd.f32 %v5715_v3, %v1370_v23 }
 0x1ac   : > { %v1593_v30 = vmax.f32 %v1379_v20, 0.0 }
 0x1ad   : > { %v1591_v31 = vmax.f32 %v1371_v29, 0.0 }
 0x1ae   : > { %v6007_v4 = vpack.c.bf16 %v1593_v30, %v1592_v17 }
 0x1af   : > { %v6009_v37 = vpack.c.bf16 %v1591_v31, %v1590_v24  ;;  %v4867_v34 = vpop.f32.mrb[100].mxu0 }
 0x1b0   : > { %v1392_v10 = vadd.f32 %v4867_v34, %v5715_v3  ;;  %v1383_v2 = vpop.f32.mrb[101].mxu0 }
 0x1b1   : > { %4660 = vmatmul.mubr.msk.bf16.gmra.mrb[64].mxu1 %vm1746_vm1, %v5910_v27  ;;  %v1384_v32 = vadd.f32 %v5715_v3, %v1383_v2  ;;  %v4868_v33 = vpop.f32.mrb[102].mxu0 }
 0x1b2   : > { %2301 = vmatprep.mubr.bf16.mxu1 %v5512_v46  ;;  %v1596_v36 = vmax.f32 %v1392_v10, 0.0  ;;  %v1395_v39 = vadd.f32 %v4868_v33, %v5715_v3  ;;  %v1386_v40 = vpop.f32.mrb[103].mxu0 }
 0x1b3   : > { %v1594_v19 = vmax.f32 %v1384_v32, 0.0  ;;  %v1387_v58 = vadd.f32 %v5715_v3, %v1386_v40 }
 0x1b4   : > { %v1597_v52 = vmax.f32 %v1395_v39, 0.0 }
 0x1b5   : > { %v1595_v22 = vmax.f32 %v1387_v58, 0.0 }
 0x1b6   : > { %v6018_v54 = vpack.c.bf16 %v1597_v52, %v1596_v36 }
 0x1b7   : > { %v6020_v47 = vpack.c.bf16 %v1595_v22, %v1594_v19  ;;  %v4871_v48 = vpop.f32.mrb[104].mxu0 }
 0x1b8   : > { %v1408_v27 = vadd.f32 %v4871_v48, %v5715_v3  ;;  %v1399_v49 = vpop.f32.mrb[105].mxu0 }
 0x1b9   : > { %4661 = vmatmul.mubr.msk.bf16.gmra.mrb[68].mxu1 %vm1746_vm1, %v5908_v9  ;;  %v1400_v50 = vadd.f32 %v5715_v3, %v1399_v49  ;;  %v4872_v55 = vpop.f32.mrb[106].mxu0 }
 0x1ba   : > { %2311 = vmatprep.mubr.bf16.mxu1 %v5512_v46  ;;  %v1600_v57 = vmax.f32 %v1408_v27, 0.0  ;;  %v1411_v60 = vadd.f32 %v4872_v55, %v5715_v3  ;;  %v1402_v62 = vpop.f32.mrb[107].mxu0 }
 0x1bb   : > { %v1598_v56 = vmax.f32 %v1400_v50, 0.0  ;;  %v1403_v21 = vadd.f32 %v5715_v3, %v1402_v62 }
 0x1bc   : > { %v1601_v53 = vmax.f32 %v1411_v60, 0.0 }
 0x1bd   : > { %v1599_v51 = vmax.f32 %v1403_v21, 0.0 }
 0x1be   : > { %v6029_v63 = vpack.c.bf16 %v1601_v53, %v1600_v57 }
 0x1bf   : > { %v6031_v0 = vpack.c.bf16 %v1599_v51, %v1598_v56  ;;  %v4875_v1 = vpop.f32.mrb[108].mxu0 }
 0x1c0   : > { %v1424_v9 = vadd.f32 %v4875_v1, %v5715_v3  ;;  %v1415_v7 = vpop.f32.mrb[109].mxu0 }
 0x1c1   : > { %4662 = vmatmul.mubr.msk.bf16.gmra.mrb[72].mxu1 %vm1746_vm1, %v5924_v43  ;;  %v1416_v8 = vadd.f32 %v5715_v3, %v1415_v7  ;;  %v4876_v13 = vpop.f32.mrb[110].mxu0 }
 0x1c2   : > { %2321 = vmatprep.mubr.bf16.mxu1 %v5512_v46  ;;  %v1604_v35 = vmax.f32 %v1424_v9, 0.0  ;;  %v1427_v38 = vadd.f32 %v4876_v13, %v5715_v3  ;;  %v1418_v11 = vpop.f32.mrb[111].mxu0  ;;  %v1696_v9 = vlaneseq }
 0x1c3   : > { %v1602_v6 = vmax.f32 %v1416_v8, 0.0  ;;  %v1419_v5 = vadd.f32 %v5715_v3, %v1418_v11 }
 0x1c4   : > { %v1605_v16 = vmax.f32 %v1427_v38, 0.0 }
 0x1c5   : > { %v1603_v17 = vmax.f32 %v1419_v5, 0.0  ;;  %v1697_v5 = vshrl.u32 %v1696_v9, 7 }
 0x1c6   : > { %v6040_v20 = vpack.c.bf16 %v1605_v16, %v1604_v35 }
 0x1c7   : > { %v6042_v23 = vpack.c.bf16 %v1603_v17, %v1602_v6  ;;  %v4879_v24 = vpop.f32.mrb[112].mxu0 }
 0x1c8   : > { %v1440_v43 = vadd.f32 %v4879_v24, %v5715_v3  ;;  %v1431_v29 = vpop.f32.mrb[113].mxu0 }
 0x1c9   : > { %4663 = vmatmul.mubr.msk.bf16.gmra.mrb[76].mxu1 %vm1746_vm1, %v5922_v26  ;;  %v1432_v30 = vadd.f32 %v5715_v3, %v1431_v29  ;;  %v4880_v31 = vpop.f32.mrb[114].mxu0 }
 0x1ca   : > { %2331 = vmatprep.mubr.bf16.mxu1 %v5512_v46  ;;  %v1608_v34 = vmax.f32 %v1440_v43, 0.0  ;;  %v1443_v10 = vadd.f32 %v4880_v31, %v5715_v3  ;;  %v1434_v2 = vpop.f32.mrb[115].mxu0 }
 0x1cb   : > { %v1606_v32 = vmax.f32 %v1432_v30, 0.0  ;;  %v1435_v33 = vadd.f32 %v5715_v3, %v1434_v2  ;;  %v1702_v2 = vsub.s32 1, %v1697_v5 }
 0x1cc   : > { %v1609_v36 = vmax.f32 %v1443_v10, 0.0  ;;  %v1694_v10 = vld [vmem:[%s7289_s4] sm:$0x3] }
 0x1cd   : > { %v1607_v39 = vmax.f32 %v1435_v33, 0.0 }
 0x1ce   : > { %v6051_v40 = vpack.c.bf16 %v1609_v36, %v1608_v34 }
 0x1cf   : > { %v6053_v19 = vpack.c.bf16 %v1607_v39, %v1606_v32  ;;  %v4883_v58 = vpop.f32.mrb[116].mxu0 }
 0x1d0   : > { %v1456_v26 = vadd.f32 %v4883_v58, %v5715_v3  ;;  %v1447_v52 = vpop.f32.mrb[117].mxu0 }
 0x1d1   : > { %4664 = vmatmul.mubr.msk.bf16.gmra.mrb[80].mxu1 %vm1746_vm1, %v5938_v59  ;;  %v1448_v22 = vadd.f32 %v5715_v3, %v1447_v52  ;;  %v4884_v48 = vpop.f32.mrb[118].mxu0  ;;  %v5500_v59 = vld [vmem:[%s7287_s2] ss:$0 sm:$0xff] }
 0x1d2   : > { %2341 = vmatprep.mubr.bf16.mxu1 %v5512_v46  ;;  %v1612_v27 = vmax.f32 %v1456_v26, 0.0  ;;  %v1459_v49 = vadd.f32 %v4884_v48, %v5715_v3  ;;  %v1450_v50 = vpop.f32.mrb[119].mxu0  ;;  %v6084_v48 = vrot.slane %v1694_v10, %v1702_v2 }
 0x1d3   : > { %v1610_v55 = vmax.f32 %v1448_v22, 0.0  ;;  %v1451_v57 = vadd.f32 %v5715_v3, %v1450_v50 }
 0x1d4   : > { %v1613_v60 = vmax.f32 %v1459_v49, 0.0 }
 0x1d5   : > { %v1611_v62 = vmax.f32 %v1451_v57, 0.0 }
 0x1d6   : > { %v6062_v56 = vpack.c.bf16 %v1613_v60, %v1612_v27 }
 0x1d7   : > { %v6064_v21 = vpack.c.bf16 %v1611_v62, %v1610_v55  ;;  %v4887_v53 = vpop.f32.mrb[120].mxu0 }
 0x1d8   : > { %v1472_v51 = vadd.f32 %v5500_v59, %v4887_v53  ;;  %v1463_v1 = vpop.f32.mrb[121].mxu0 }
 0x1d9   : > { %4665 = vmatmul.mubr.msk.bf16.gmra.mrb[84].mxu1 %vm1746_vm1, %v5936_v25  ;;  %v1464_v7 = vadd.f32 %v5500_v59, %v1463_v1  ;;  %v4888_v8 = vpop.f32.mrb[122].mxu0  ;;  %v1698_v25 = vsub.s32 0, %v1697_v5 }
 0x1da   : > { %v1616_v3 = vmax.f32 %v1472_v51, 0.0  ;;  %2351 = vmatprep.mubr.bf16.mxu1 %v5512_v46  ;;  %v1475_v13 = vadd.f32 %v5500_v59, %v4888_v8  ;;  %v1466_v35 = vpop.f32.mrb[123].mxu0 }
 0x1db   : > { %v1614_v38 = vmax.f32 %v1464_v7, 0.0  ;;  %v1467_v11 = vadd.f32 %v5500_v59, %v1466_v35  ;;  %v6082_v52 = vrot.slane %v1694_v10, %v1698_v25 }
 0x1dc   : > { %v1617_v6 = vmax.f32 %v1475_v13, 0.0 }
 0x1dd   : > { %v1615_v16 = vmax.f32 %v1467_v11, 0.0 }
 0x1de   : > { %v6072_v17 = vpack.c.bf16 %v1617_v6, %v1616_v3 }
 0x1df   : > { %v6074_v24 = vpack.c.bf16 %v1615_v16, %v1614_v38  ;;  %v4891_v43 = vpop.f32.mrb[124].mxu0 }
 0x1e0   : > { %v1488_v29 = vadd.f32 %v5500_v59, %v4891_v43  ;;  %v1479_v30 = vpop.f32.mrb[125].mxu0 }
 0x1e1   : > { %4666 = vmatmul.mubr.msk.bf16.gmra.mrb[88].mxu1 %vm1746_vm1, %v5952_v12  ;;  %v1480_v31 = vadd.f32 %v5500_v59, %v1479_v30  ;;  %v4892_v34 = vpop.f32.mrb[126].mxu0  ;;  %v2868_v12 = vld [vmem:[%s7290_s5] sm:$0x3] }
 0x1e2   : > { %v1620_v32 = vmax.f32 %v1488_v29, 0.0  ;;  %v1491_v33 = vadd.f32 %v5500_v59, %v4892_v34  ;;  %v1482_v36 = vpop.f32.mrb[127].mxu0  ;;  %2361 = vmatprep.mubr.bf16.mxu1 %v5512_v46  ;;  %v6094_v60 = vrot.slane %v2868_v12, %v1698_v25 }
 0x1e3   : > { %v1618_v39 = vmax.f32 %v1480_v31, 0.0  ;;  %v1483_v58 = vadd.f32 %v5500_v59, %v1482_v36  ;;  %v6099_v59 = vrot.slane %v2868_v12, %v1702_v2 }
 0x1e4   : > { %v1621_v26 = vmax.f32 %v1491_v33, 0.0 }
 0x1e5   : > { %v1619_v22 = vmax.f32 %v1483_v58, 0.0 }
 0x1e6   : > { %v6089_v27 = vpack.c.bf16 %v1621_v26, %v1620_v32 }
 0x1e7   : > { %v6091_v49 = vpack.c.bf16 %v1619_v22, %v1618_v39  ;;  %v1973_v50 = vpop.f32.mrb[128].mxu0 }
 0x1e8   : > { %v1974_v55 = vadd.f32 %v1973_v50, %v6082_v52  ;;  %v1975_v57 = vpop.f32.mrb[129].mxu0 }
 0x1e9   : > { %v1976_v62 = vadd.f32 %v1975_v57, %v6084_v48  ;;  %v1977_v53 = vpop.f32.mrb[130].mxu0  ;;  %4667 = vmatmul.mubr.msk.bf16.gmra.mrb[92].mxu1 %vm1746_vm1, %v5950_v42 }
 0x1ea   : > { %v2612_v51 = vmax.f32 %v1974_v55, 0.0  ;;  %v1978_v1 = vadd.f32 %v1977_v53, %v6082_v52  ;;  %v1979_v9 = vpop.f32.mrb[131].mxu0  ;;  %2371 = vmatprep.mubr.bf16.mxu1 %v5512_v46 }
 0x1eb   : > { %v2613_v7 = vmax.f32 %v1976_v62, 0.0  ;;  %v1980_v8 = vadd.f32 %v1979_v9, %v6084_v48 }
 0x1ec   : > { %v2614_v3 = vmax.f32 %v1978_v1, 0.0  ;;  %v2880_v13 = vmul.f32 %v6094_v60, %v2612_v51 }
 0x1ed   : > { %v2615_v35 = vmax.f32 %v1980_v8, 0.0  ;;  %v2881_v38 = vmul.f32 %v6099_v59, %v2613_v7 }
 0x1ee   : > { %v2882_v11 = vmul.f32 %v6094_v60, %v2614_v3 }
 0x1ef   : > { %v2883_v42 = vmul.f32 %v6099_v59, %v2615_v35  ;;  %v1983_v6 = vpop.f32.mrb[132].mxu0  ;;  %v3136_v5 = vadd.f32 %v2881_v38, %v2880_v13 }
 0x1f0   : > { %v1984_v16 = vadd.f32 %v1983_v6, %v6082_v52  ;;  %v1985_v43 = vpop.f32.mrb[133].mxu0 }
 0x1f1   : > { %v1986_v29 = vadd.f32 %v1985_v43, %v6084_v48  ;;  %v1987_v30 = vpop.f32.mrb[134].mxu0  ;;  %4668 = vmatmul.mubr.msk.bf16.gmra.mrb[96].mxu1 %vm1746_vm1, %v5965_v41  ;;  %3137 = vadd.xlane.f32.xlu0 %v3136_v5  ;;  %v3139_v25 = vadd.f32 %v2883_v42, %v2882_v11 }
 0x1f2   : > { %v2616_v31 = vmax.f32 %v1984_v16, 0.0  ;;  %v1988_v34 = vadd.f32 %v1987_v30, %v6082_v52  ;;  %v1989_v10 = vpop.f32.mrb[135].mxu0  ;;  %2381 = vmatprep.mubr.bf16.mxu1 %v5512_v46 }
 0x1f3   : > { %v2617_v2 = vmax.f32 %v1986_v29, 0.0  ;;  %v1990_v32 = vadd.f32 %v1989_v10, %v6084_v48 }
 0x1f4   : > { %v2618_v33 = vmax.f32 %v1988_v34, 0.0  ;;  %v2884_v36 = vmul.f32 %v6094_v60, %v2616_v31 }
 0x1f5   : > { %v2619_v39 = vmax.f32 %v1990_v32, 0.0  ;;  %3140 = vadd.xlane.f32.xlu0 %v3139_v25  ;;  %v2885_v58 = vmul.f32 %v6099_v59, %v2617_v2 }
 0x1f6   : > { %v2886_v41 = vmul.f32 %v6094_v60, %v2618_v33 }
 0x1f7   : > { %v2887_v26 = vmul.f32 %v6099_v59, %v2619_v39  ;;  %v1993_v22 = vpop.f32.mrb[136].mxu0  ;;  %v3142_v12 = vadd.f32 %v2885_v58, %v2884_v36 }
 0x1f8   : > { %v1994_v50 = vadd.f32 %v1993_v22, %v6082_v52  ;;  %v1995_v55 = vpop.f32.mrb[137].mxu0 }
 0x1f9   : > { %v1996_v57 = vadd.f32 %v1995_v55, %v6084_v48  ;;  %v1997_v62 = vpop.f32.mrb[138].mxu0  ;;  %4669 = vmatmul.mubr.msk.bf16.gmra.mrb[100].mxu1 %vm1746_vm1, %v5963_v28  ;;  %3143 = vadd.xlane.f32.xlu1 %v3142_v12  ;;  %v3145_v53 = vadd.f32 %v2887_v26, %v2886_v41 }
 0x1fa   : > { %v2620_v51 = vmax.f32 %v1994_v50, 0.0  ;;  %v1998_v1 = vadd.f32 %v1997_v62, %v6082_v52  ;;  %v1999_v9 = vpop.f32.mrb[139].mxu0  ;;  %2391 = vmatprep.mubr.bf16.mxu1 %v5512_v46 }
 0x1fb   : > { %v2621_v7 = vmax.f32 %v1996_v57, 0.0  ;;  %v2000_v8 = vadd.f32 %v1999_v9, %v6084_v48 }
 0x1fc   : > { %v2888_v3 = vmul.f32 %v6094_v60, %v2620_v51  ;;  %v2622_v13 = vmax.f32 %v1998_v1, 0.0 }
 0x1fd   : > { %v2889_v35 = vmul.f32 %v6099_v59, %v2621_v7  ;;  %v2623_v38 = vmax.f32 %v2000_v8, 0.0  ;;  %3146 = vadd.xlane.f32.xlu1 %v3145_v53 }
 0x1fe   : > { %v2890_v28 = vmul.f32 %v6094_v60, %v2622_v13 }
 0x1ff   : > { %v2891_v11 = vmul.f32 %v6099_v59, %v2623_v38  ;;  %v2003_v42 = vpop.f32.mrb[140].mxu0  ;;  %v3148_v6 = vadd.f32 %v2889_v35, %v2888_v3 }
 0x200   : > { %v2004_v5 = vadd.f32 %v2003_v42, %v6082_v52  ;;  %v2005_v16 = vpop.f32.mrb[141].mxu0 }
 0x201   : > { %v2006_v43 = vadd.f32 %v2005_v16, %v6084_v48  ;;  %v2007_v29 = vpop.f32.mrb[142].mxu0  ;;  %4670 = vmatmul.mubr.msk.bf16.gmra.mrb[104].mxu1 %vm1746_vm1, %v5976_v45  ;;  %3149 = vadd.xlane.f32.xlu0 %v3148_v6  ;;  %v3151_v30 = vadd.f32 %v2891_v11, %v2890_v28 }
 0x202   : > { %v2624_v25 = vmax.f32 %v2004_v5, 0.0  ;;  %v2008_v31 = vadd.f32 %v2007_v29, %v6082_v52  ;;  %v2009_v34 = vpop.f32.mrb[143].mxu0  ;;  %2401 = vmatprep.mubr.bf16.mxu1 %v5512_v46 }
 0x203   : > { %v2625_v10 = vmax.f32 %v2006_v43, 0.0  ;;  %v2010_v2 = vadd.f32 %v2009_v34, %v6084_v48  ;;  %3152 = vadd.xlane.f32.xlu1 %v3151_v30 }
 0x204   : > { %v2892_v32 = vmul.f32 %v6094_v60, %v2624_v25  ;;  %v2626_v33 = vmax.f32 %v2008_v31, 0.0  ;;  %v2133_v36 = vpop.f32.mrb[0].mxu1 }
 0x205   : > { %v2893_v39 = vmul.f32 %v6099_v59, %v2625_v10  ;;  %v2627_v58 = vmax.f32 %v2010_v2, 0.0  ;;  %v2134_v45 = vadd.f32 %v2133_v36, %v6082_v52  ;;  %v2135_v41 = vpop.f32.mrb[1].mxu1 }
 0x206   : > { %v2894_v26 = vmul.f32 %v6094_v60, %v2626_v33  ;;  %v2136_v22 = vadd.f32 %v2135_v41, %v6084_v48  ;;  %v2137_v12 = vpop.f32.mrb[2].mxu1 }
 0x207   : > { %v2895_v50 = vmul.f32 %v6099_v59, %v2627_v58  ;;  %v2676_v55 = vmax.f32 %v2134_v45, 0.0  ;;  %v2138_v57 = vadd.f32 %v2137_v12, %v6082_v52  ;;  %v2013_v62 = vpop.f32.mrb[144].mxu0  ;;  %v2139_v53 = vpop.f32.mrb[3].mxu1  ;;  %v3154_v51 = vadd.f32 %v2893_v39, %v2892_v32 }
 0x208   : > { %v2677_v1 = vmax.f32 %v2136_v22, 0.0  ;;  %v2014_v9 = vadd.f32 %v2013_v62, %v6082_v52  ;;  %v2140_v7 = vadd.f32 %v2139_v53, %v6084_v48  ;;  %v2015_v8 = vpop.f32.mrb[145].mxu0 }
 0x209   : > { %v2944_v3 = vmul.f32 %v6094_v60, %v2676_v55  ;;  %v2678_v13 = vmax.f32 %v2138_v57, 0.0  ;;  %v2016_v35 = vadd.f32 %v2015_v8, %v6084_v48  ;;  %v2017_v38 = vpop.f32.mrb[146].mxu0  ;;  %4671 = vmatmul.mubr.msk.bf16.gmra.mrb[108].mxu1 %vm1746_vm1, %v5974_v44  ;;  %3155 = vadd.xlane.f32.xlu0 %v3154_v51  ;;  %v3157_v28 = vadd.f32 %v2895_v50, %v2894_v26 }
 0x20a   : > { %v2945_v11 = vmul.f32 %v6099_v59, %v2677_v1  ;;  %v2628_v42 = vmax.f32 %v2014_v9, 0.0  ;;  %v2679_v6 = vmax.f32 %v2140_v7, 0.0  ;;  %v2018_v5 = vadd.f32 %v2017_v38, %v6082_v52  ;;  %v2019_v16 = vpop.f32.mrb[147].mxu0  ;;  %2411 = vmatprep.mubr.bf16.mxu1 %v5512_v46 }
 0x20b   : > { %v2946_v43 = vmul.f32 %v6094_v60, %v2678_v13  ;;  %v2629_v29 = vmax.f32 %v2016_v35, 0.0  ;;  %v2020_v30 = vadd.f32 %v2019_v16, %v6084_v48  ;;  %3158 = vadd.xlane.f32.xlu1 %v3157_v28 }
 0x20c   : > { %v2896_v25 = vmul.f32 %v6094_v60, %v2628_v42  ;;  %v2947_v44 = vmul.f32 %v6099_v59, %v2679_v6  ;;  %v2630_v31 = vmax.f32 %v2018_v5, 0.0  ;;  %v2143_v34 = vpop.f32.mrb[4].mxu1  ;;  %v3232_v10 = vadd.f32 %v2945_v11, %v2944_v3 }
 0x20d   : > { %v2897_v2 = vmul.f32 %v6099_v59, %v2629_v29  ;;  %v2631_v32 = vmax.f32 %v2020_v30, 0.0  ;;  %v2144_v33 = vadd.f32 %v2143_v34, %v6082_v52  ;;  %v2145_v36 = vpop.f32.mrb[5].mxu1 }
 0x20e   : > { %v2898_v39 = vmul.f32 %v6094_v60, %v2630_v31  ;;  %v2146_v58 = vadd.f32 %v2145_v36, %v6084_v48  ;;  %v2147_v45 = vpop.f32.mrb[6].mxu1  ;;  %3233 = vadd.xlane.f32.xlu0 %v3232_v10  ;;  %v3235_v41 = vadd.f32 %v2947_v44, %v2946_v43 }
 0x20f   : > { %v2899_v26 = vmul.f32 %v6099_v59, %v2631_v32  ;;  %v2680_v22 = vmax.f32 %v2144_v33, 0.0  ;;  %v2148_v12 = vadd.f32 %v2147_v45, %v6082_v52  ;;  %v2023_v50 = vpop.f32.mrb[148].mxu0  ;;  %v2149_v55 = vpop.f32.mrb[7].mxu1  ;;  %v3160_v57 = vadd.f32 %v2897_v2, %v2896_v25 }
 0x210   : > { %v2681_v62 = vmax.f32 %v2146_v58, 0.0  ;;  %v2024_v53 = vadd.f32 %v2023_v50, %v6082_v52  ;;  %v2150_v51 = vadd.f32 %v2149_v55, %v6084_v48  ;;  %v2025_v1 = vpop.f32.mrb[149].mxu0  ;;  %3236 = vadd.xlane.f32.xlu1 %v3235_v41 }
 0x211   : > { %v2948_v9 = vmul.f32 %v6094_v60, %v2680_v22  ;;  %v2682_v7 = vmax.f32 %v2148_v12, 0.0  ;;  %v2026_v8 = vadd.f32 %v2025_v1, %v6084_v48  ;;  %v2027_v3 = vpop.f32.mrb[150].mxu0  ;;  %4672 = vmatmul.mubr.msk.bf16.gmra.mrb[112].mxu1 %vm1746_vm1, %v5987_v18  ;;  %v3163_v13 = vadd.f32 %v2899_v26, %v2898_v39 }
 0x212   : > { %v2949_v35 = vmul.f32 %v6099_v59, %v2681_v62  ;;  %v2632_v38 = vmax.f32 %v2024_v53, 0.0  ;;  %v2683_v28 = vmax.f32 %v2150_v51, 0.0  ;;  %v2028_v11 = vadd.f32 %v2027_v3, %v6082_v52  ;;  %v2029_v42 = vpop.f32.mrb[151].mxu0  ;;  %3161 = vadd.xlane.f32.xlu0 %v3160_v57  ;;  %2421 = vmatprep.mubr.bf16.mxu1 %v5512_v46 }
 0x213   : > { %v2950_v6 = vmul.f32 %v6094_v60, %v2682_v7  ;;  %v2633_v5 = vmax.f32 %v2026_v8, 0.0  ;;  %v2030_v16 = vadd.f32 %v2029_v42, %v6084_v48 }
 0x214   : > { %v2900_v43 = vmul.f32 %v6094_v60, %v2632_v38  ;;  %v2951_v18 = vmul.f32 %v6099_v59, %v2683_v28  ;;  %v2634_v29 = vmax.f32 %v2028_v11, 0.0  ;;  %v2153_v30 = vpop.f32.mrb[8].mxu1  ;;  %3164 = vadd.xlane.f32.xlu1 %v3163_v13  ;;  %v3238_v25 = vadd.f32 %v2949_v35, %v2948_v9 }
 0x215   : > { %v2901_v44 = vmul.f32 %v6099_v59, %v2633_v5  ;;  %v2635_v31 = vmax.f32 %v2030_v16, 0.0  ;;  %v2154_v34 = vadd.f32 %v2153_v30, %v6082_v52  ;;  %v2155_v10 = vpop.f32.mrb[9].mxu1 }
 0x216   : > { %v2902_v2 = vmul.f32 %v6094_v60, %v2634_v29  ;;  %v2156_v32 = vadd.f32 %v2155_v10, %v6084_v48  ;;  %v2157_v33 = vpop.f32.mrb[10].mxu1  ;;  %3239 = vadd.xlane.f32.xlu0 %v3238_v25  ;;  %v3241_v36 = vadd.f32 %v2951_v18, %v2950_v6 }
 0x217   : > { %v2903_v39 = vmul.f32 %v6099_v59, %v2635_v31  ;;  %v2684_v58 = vmax.f32 %v2154_v34, 0.0  ;;  %v2158_v45 = vadd.f32 %v2157_v33, %v6082_v52  ;;  %v2033_v41 = vpop.f32.mrb[152].mxu0  ;;  %v2159_v26 = vpop.f32.mrb[11].mxu1  ;;  %v3166_v22 = vadd.f32 %v2901_v44, %v2900_v43 }
 0x218   : > { %v2685_v12 = vmax.f32 %v2156_v32, 0.0  ;;  %v2034_v50 = vadd.f32 %v2033_v41, %v6082_v52  ;;  %v2160_v55 = vadd.f32 %v2159_v26, %v6084_v48  ;;  %v2035_v57 = vpop.f32.mrb[153].mxu0  ;;  %3242 = vadd.xlane.f32.xlu1 %v3241_v36 }
 0x219   : > { %v2952_v62 = vmul.f32 %v6094_v60, %v2684_v58  ;;  %v2686_v53 = vmax.f32 %v2158_v45, 0.0  ;;  %v2036_v51 = vadd.f32 %v2035_v57, %v6084_v48  ;;  %v2037_v1 = vpop.f32.mrb[154].mxu0  ;;  %4673 = vmatmul.mubr.msk.bf16.gmra.mrb[116].mxu1 %vm1746_vm1, %v5985_v61  ;;  %v3169_v9 = vadd.f32 %v2903_v39, %v2902_v2 }
 0x21a   : > { %v2953_v7 = vmul.f32 %v6099_v59, %v2685_v12  ;;  %v2636_v8 = vmax.f32 %v2034_v50, 0.0  ;;  %v2687_v3 = vmax.f32 %v2160_v55, 0.0  ;;  %v2038_v13 = vadd.f32 %v2037_v1, %v6082_v52  ;;  %v2039_v35 = vpop.f32.mrb[155].mxu0  ;;  %3167 = vadd.xlane.f32.xlu0 %v3166_v22  ;;  %2431 = vmatprep.mubr.bf16.mxu1 %v5512_v46 }
 0x21b   : > { %v2954_v38 = vmul.f32 %v6094_v60, %v2686_v53  ;;  %v2637_v28 = vmax.f32 %v2036_v51, 0.0  ;;  %v2040_v11 = vadd.f32 %v2039_v35, %v6084_v48 }
 0x21c   : > { %v2904_v42 = vmul.f32 %v6094_v60, %v2636_v8  ;;  %v2955_v61 = vmul.f32 %v6099_v59, %v2687_v3  ;;  %v2638_v6 = vmax.f32 %v2038_v13, 0.0  ;;  %v2163_v5 = vpop.f32.mrb[12].mxu1  ;;  %3170 = vadd.xlane.f32.xlu1 %v3169_v9  ;;  %v3244_v16 = vadd.f32 %v2953_v7, %v2952_v62 }
 0x21d   : > { %v2905_v43 = vmul.f32 %v6099_v59, %v2637_v28  ;;  %v2639_v18 = vmax.f32 %v2040_v11, 0.0  ;;  %v2164_v29 = vadd.f32 %v2163_v5, %v6082_v52  ;;  %v2165_v30 = vpop.f32.mrb[13].mxu1 }
 0x21e   : > { %v2906_v25 = vmul.f32 %v6094_v60, %v2638_v6  ;;  %v2166_v44 = vadd.f32 %v2165_v30, %v6084_v48  ;;  %v2167_v31 = vpop.f32.mrb[14].mxu1  ;;  %3245 = vadd.xlane.f32.xlu0 %v3244_v16  ;;  %v3247_v34 = vadd.f32 %v2955_v61, %v2954_v38 }
 0x21f   : > { %v2907_v10 = vmul.f32 %v6099_v59, %v2639_v18  ;;  %v2688_v2 = vmax.f32 %v2164_v29, 0.0  ;;  %v2168_v32 = vadd.f32 %v2167_v31, %v6082_v52  ;;  %v2043_v33 = vpop.f32.mrb[156].mxu0  ;;  %v2169_v36 = vpop.f32.mrb[15].mxu1  ;;  %v3172_v39 = vadd.f32 %v2905_v43, %v2904_v42 }
 0x220   : > { %v2689_v58 = vmax.f32 %v2166_v44, 0.0  ;;  %v2044_v45 = vadd.f32 %v2043_v33, %v6082_v52  ;;  %v2170_v41 = vadd.f32 %v2169_v36, %v6084_v48  ;;  %v2045_v26 = vpop.f32.mrb[157].mxu0  ;;  %3248 = vadd.xlane.f32.xlu1 %v3247_v34 }
 0x221   : > { %v2956_v22 = vmul.f32 %v6094_v60, %v2688_v2  ;;  %v2690_v12 = vmax.f32 %v2168_v32, 0.0  ;;  %v2046_v50 = vadd.f32 %v2045_v26, %v6084_v48  ;;  %v2047_v55 = vpop.f32.mrb[158].mxu0  ;;  %4674 = vmatmul.mubr.msk.bf16.gmra.mrb[120].mxu1 %vm1746_vm1, %v5998_v15  ;;  %v3175_v57 = vadd.f32 %v2907_v10, %v2906_v25 }
 0x222   : > { %v2957_v62 = vmul.f32 %v6099_v59, %v2689_v58  ;;  %v2640_v53 = vmax.f32 %v2044_v45, 0.0  ;;  %v2691_v51 = vmax.f32 %v2170_v41, 0.0  ;;  %v2048_v1 = vadd.f32 %v2047_v55, %v6082_v52  ;;  %v2049_v9 = vpop.f32.mrb[159].mxu0  ;;  %3173 = vadd.xlane.f32.xlu0 %v3172_v39  ;;  %2441 = vmatprep.mubr.bf16.mxu1 %v5512_v46 }
 0x223   : > { %v2958_v7 = vmul.f32 %v6094_v60, %v2690_v12  ;;  %v2641_v8 = vmax.f32 %v2046_v50, 0.0  ;;  %v2050_v3 = vadd.f32 %v2049_v9, %v6084_v48 }
 0x224   : > { %v2908_v13 = vmul.f32 %v6094_v60, %v2640_v53  ;;  %v2959_v15 = vmul.f32 %v6099_v59, %v2691_v51  ;;  %v2642_v35 = vmax.f32 %v2048_v1, 0.0  ;;  %v2173_v38 = vpop.f32.mrb[16].mxu1  ;;  %3176 = vadd.xlane.f32.xlu1 %v3175_v57  ;;  %v3250_v28 = vadd.f32 %v2957_v62, %v2956_v22 }
 0x225   : > { %v2909_v11 = vmul.f32 %v6099_v59, %v2641_v8  ;;  %v2643_v42 = vmax.f32 %v2050_v3, 0.0  ;;  %v2174_v61 = vadd.f32 %v2173_v38, %v6082_v52  ;;  %v2175_v6 = vpop.f32.mrb[17].mxu1 }
 0x226   : > { %v2910_v5 = vmul.f32 %v6094_v60, %v2642_v35  ;;  %v2176_v16 = vadd.f32 %v2175_v6, %v6084_v48  ;;  %v2177_v43 = vpop.f32.mrb[18].mxu1  ;;  %3251 = vadd.xlane.f32.xlu0 %v3250_v28  ;;  %v3253_v18 = vadd.f32 %v2959_v15, %v2958_v7 }
 0x227   : > { %v2911_v29 = vmul.f32 %v6099_v59, %v2643_v42  ;;  %v2692_v30 = vmax.f32 %v2174_v61, 0.0  ;;  %v2178_v25 = vadd.f32 %v2177_v43, %v6082_v52  ;;  %v2053_v44 = vpop.f32.mrb[160].mxu0  ;;  %v2179_v31 = vpop.f32.mrb[19].mxu1  ;;  %v3178_v34 = vadd.f32 %v2909_v11, %v2908_v13 }
 0x228   : > { %v2693_v10 = vmax.f32 %v2176_v16, 0.0  ;;  %v2054_v2 = vadd.f32 %v2053_v44, %v6082_v52  ;;  %v2180_v32 = vadd.f32 %v2179_v31, %v6084_v48  ;;  %v2055_v33 = vpop.f32.mrb[161].mxu0  ;;  %3254 = vadd.xlane.f32.xlu1 %v3253_v18 }
 0x229   : > { %v2960_v36 = vmul.f32 %v6094_v60, %v2692_v30  ;;  %v2694_v39 = vmax.f32 %v2178_v25, 0.0  ;;  %v2056_v58 = vadd.f32 %v2055_v33, %v6084_v48  ;;  %v2057_v45 = vpop.f32.mrb[162].mxu0  ;;  %4675 = vmatmul.mubr.msk.bf16.gmra.mrb[124].mxu1 %vm1746_vm1, %v5996_v14  ;;  %v3181_v41 = vadd.f32 %v2911_v29, %v2910_v5 }
 0x22a   : > { %v2961_v26 = vmul.f32 %v6099_v59, %v2693_v10  ;;  %v2644_v22 = vmax.f32 %v2054_v2, 0.0  ;;  %v2695_v12 = vmax.f32 %v2180_v32, 0.0  ;;  %v2058_v50 = vadd.f32 %v2057_v45, %v6082_v52  ;;  %v2059_v55 = vpop.f32.mrb[163].mxu0  ;;  %3179 = vadd.xlane.f32.xlu0 %v3178_v34  ;;  %2451 = vmatprep.mubr.bf16.mxu1 %v5512_v46 }
 0x22b   : > { %v2962_v57 = vmul.f32 %v6094_v60, %v2694_v39  ;;  %v2645_v62 = vmax.f32 %v2056_v58, 0.0  ;;  %v2060_v53 = vadd.f32 %v2059_v55, %v6084_v48 }
 0x22c   : > { %v2912_v51 = vmul.f32 %v6094_v60, %v2644_v22  ;;  %v2963_v14 = vmul.f32 %v6099_v59, %v2695_v12  ;;  %v2646_v1 = vmax.f32 %v2058_v50, 0.0  ;;  %v2183_v9 = vpop.f32.mrb[20].mxu1  ;;  %3182 = vadd.xlane.f32.xlu1 %v3181_v41  ;;  %v3256_v7 = vadd.f32 %v2961_v26, %v2960_v36 }
 0x22d   : > { %v2913_v8 = vmul.f32 %v6099_v59, %v2645_v62  ;;  %v2647_v3 = vmax.f32 %v2060_v53, 0.0  ;;  %v2184_v13 = vadd.f32 %v2183_v9, %v6082_v52  ;;  %v2185_v15 = vpop.f32.mrb[21].mxu1 }
 0x22e   : > { %v2914_v35 = vmul.f32 %v6094_v60, %v2646_v1  ;;  %v2186_v38 = vadd.f32 %v2185_v15, %v6084_v48  ;;  %v2187_v28 = vpop.f32.mrb[22].mxu1  ;;  %3257 = vadd.xlane.f32.xlu0 %v3256_v7  ;;  %v3259_v11 = vadd.f32 %v2963_v14, %v2962_v57 }
 0x22f   : > { %v2915_v42 = vmul.f32 %v6099_v59, %v2647_v3  ;;  %v2696_v61 = vmax.f32 %v2184_v13, 0.0  ;;  %v2188_v6 = vadd.f32 %v2187_v28, %v6082_v52  ;;  %v2063_v5 = vpop.f32.mrb[164].mxu0  ;;  %v2189_v16 = vpop.f32.mrb[23].mxu1  ;;  %v3184_v43 = vadd.f32 %v2913_v8, %v2912_v51 }
 0x230   : > { %v2697_v18 = vmax.f32 %v2186_v38, 0.0  ;;  %v2064_v29 = vadd.f32 %v2063_v5, %v6082_v52  ;;  %v2190_v30 = vadd.f32 %v2189_v16, %v6084_v48  ;;  %v2065_v25 = vpop.f32.mrb[165].mxu0  ;;  %3260 = vadd.xlane.f32.xlu1 %v3259_v11 }
 0x231   : > { %v2964_v44 = vmul.f32 %v6094_v60, %v2696_v61  ;;  %v2698_v31 = vmax.f32 %v2188_v6, 0.0  ;;  %v2066_v34 = vadd.f32 %v2065_v25, %v6084_v48  ;;  %v2067_v10 = vpop.f32.mrb[166].mxu0  ;;  %4676 = vmatmul.mubr.msk.bf16.gmra.mrb[128].mxu1 %vm1746_vm1, %v6009_v37  ;;  %v3187_v2 = vadd.f32 %v2915_v42, %v2914_v35 }
 0x232   : > { %v2965_v32 = vmul.f32 %v6099_v59, %v2697_v18  ;;  %v2648_v33 = vmax.f32 %v2064_v29, 0.0  ;;  %v2699_v36 = vmax.f32 %v2190_v30, 0.0  ;;  %v2068_v39 = vadd.f32 %v2067_v10, %v6082_v52  ;;  %v2069_v58 = vpop.f32.mrb[167].mxu0  ;;  %3185 = vadd.xlane.f32.xlu0 %v3184_v43  ;;  %2461 = vmatprep.mubr.bf16.mxu1 %v5512_v46 }
 0x233   : > { %v2966_v45 = vmul.f32 %v6094_v60, %v2698_v31  ;;  %v2649_v41 = vmax.f32 %v2066_v34, 0.0  ;;  %v2070_v26 = vadd.f32 %v2069_v58, %v6084_v48 }
 0x234   : > { %v2916_v22 = vmul.f32 %v6094_v60, %v2648_v33  ;;  %v2967_v37 = vmul.f32 %v6099_v59, %v2699_v36  ;;  %v2650_v12 = vmax.f32 %v2068_v39, 0.0  ;;  %v2193_v50 = vpop.f32.mrb[24].mxu1  ;;  %3188 = vadd.xlane.f32.xlu1 %v3187_v2  ;;  %v3262_v55 = vadd.f32 %v2965_v32, %v2964_v44 }
 0x235   : > { %v2917_v57 = vmul.f32 %v6099_v59, %v2649_v41  ;;  %v2651_v62 = vmax.f32 %v2070_v26, 0.0  ;;  %v2194_v53 = vadd.f32 %v2193_v50, %v6082_v52  ;;  %v2195_v51 = vpop.f32.mrb[25].mxu1 }
 0x236   : > { %v2918_v14 = vmul.f32 %v6094_v60, %v2650_v12  ;;  %v2196_v1 = vadd.f32 %v2195_v51, %v6084_v48  ;;  %v2197_v9 = vpop.f32.mrb[26].mxu1  ;;  %3263 = vadd.xlane.f32.xlu0 %v3262_v55  ;;  %v3265_v7 = vadd.f32 %v2967_v37, %v2966_v45 }
 0x237   : > { %v2919_v8 = vmul.f32 %v6099_v59, %v2651_v62  ;;  %v2700_v3 = vmax.f32 %v2194_v53, 0.0  ;;  %v2198_v13 = vadd.f32 %v2197_v9, %v6082_v52  ;;  %v2073_v15 = vpop.f32.mrb[168].mxu0  ;;  %v2199_v35 = vpop.f32.mrb[27].mxu1  ;;  %v3190_v38 = vadd.f32 %v2917_v57, %v2916_v22 }
 0x238   : > { %v2701_v28 = vmax.f32 %v2196_v1, 0.0  ;;  %v2074_v11 = vadd.f32 %v2073_v15, %v6082_v52  ;;  %v2200_v42 = vadd.f32 %v2199_v35, %v6084_v48  ;;  %v2075_v61 = vpop.f32.mrb[169].mxu0  ;;  %3266 = vadd.xlane.f32.xlu1 %v3265_v7 }
 0x239   : > { %v2968_v6 = vmul.f32 %v6094_v60, %v2700_v3  ;;  %v2702_v5 = vmax.f32 %v2198_v13, 0.0  ;;  %v2076_v16 = vadd.f32 %v2075_v61, %v6084_v48  ;;  %v2077_v43 = vpop.f32.mrb[170].mxu0  ;;  %4677 = vmatmul.mubr.msk.bf16.gmra.mrb[132].mxu1 %vm1746_vm1, %v6007_v4  ;;  %v3193_v18 = vadd.f32 %v2919_v8, %v2918_v14 }
 0x23a   : > { %v2969_v29 = vmul.f32 %v6099_v59, %v2701_v28  ;;  %v2652_v30 = vmax.f32 %v2074_v11, 0.0  ;;  %v2703_v25 = vmax.f32 %v2200_v42, 0.0  ;;  %v2078_v44 = vadd.f32 %v2077_v43, %v6082_v52  ;;  %v2079_v31 = vpop.f32.mrb[171].mxu0  ;;  %3191 = vadd.xlane.f32.xlu0 %v3190_v38  ;;  %2471 = vmatprep.mubr.bf16.mxu1 %v5512_v46 }
 0x23b   : > { %v2970_v34 = vmul.f32 %v6094_v60, %v2702_v5  ;;  %v2653_v10 = vmax.f32 %v2076_v16, 0.0  ;;  %v2080_v2 = vadd.f32 %v2079_v31, %v6084_v48 }
 0x23c   : > { %v2920_v32 = vmul.f32 %v6094_v60, %v2652_v30  ;;  %v2971_v4 = vmul.f32 %v6099_v59, %v2703_v25  ;;  %v2654_v33 = vmax.f32 %v2078_v44, 0.0  ;;  %v2203_v36 = vpop.f32.mrb[28].mxu1  ;;  %3194 = vadd.xlane.f32.xlu1 %v3193_v18  ;;  %v3268_v39 = vadd.f32 %v2969_v29, %v2968_v6 }
 0x23d   : > { %v2921_v58 = vmul.f32 %v6099_v59, %v2653_v10  ;;  %v2655_v45 = vmax.f32 %v2080_v2, 0.0  ;;  %v2204_v41 = vadd.f32 %v2203_v36, %v6082_v52  ;;  %v2205_v26 = vpop.f32.mrb[29].mxu1 }
 0x23e   : > { %v2922_v22 = vmul.f32 %v6094_v60, %v2654_v33  ;;  %v2206_v37 = vadd.f32 %v2205_v26, %v6084_v48  ;;  %v2207_v12 = vpop.f32.mrb[30].mxu1  ;;  %3269 = vadd.xlane.f32.xlu0 %v3268_v39  ;;  %v3271_v50 = vadd.f32 %v2971_v4, %v2970_v34 }
 0x23f   : > { %v2923_v55 = vmul.f32 %v6099_v59, %v2655_v45  ;;  %v2704_v57 = vmax.f32 %v2204_v41, 0.0  ;;  %v2208_v62 = vadd.f32 %v2207_v12, %v6082_v52  ;;  %v2083_v53 = vpop.f32.mrb[172].mxu0  ;;  %v2209_v51 = vpop.f32.mrb[31].mxu1  ;;  %v3196_v14 = vadd.f32 %v2921_v58, %v2920_v32 }
 0x240   : > { %v2705_v1 = vmax.f32 %v2206_v37, 0.0  ;;  %v2084_v9 = vadd.f32 %v2083_v53, %v6082_v52  ;;  %v2210_v7 = vadd.f32 %v2209_v51, %v6084_v48  ;;  %v2085_v8 = vpop.f32.mrb[173].mxu0  ;;  %3272 = vadd.xlane.f32.xlu1 %v3271_v50 }
 0x241   : > { %v2972_v3 = vmul.f32 %v6094_v60, %v2704_v57  ;;  %v2706_v13 = vmax.f32 %v2208_v62, 0.0  ;;  %v2086_v15 = vadd.f32 %v2085_v8, %v6084_v48  ;;  %v2087_v35 = vpop.f32.mrb[174].mxu0  ;;  %4678 = vmatmul.mubr.msk.bf16.gmra.mrb[136].mxu1 %vm1746_vm1, %v6020_v47  ;;  %v3199_v38 = vadd.f32 %v2923_v55, %v2922_v22 }
 0x242   : > { %v2973_v28 = vmul.f32 %v6099_v59, %v2705_v1  ;;  %v2656_v11 = vmax.f32 %v2084_v9, 0.0  ;;  %v2707_v42 = vmax.f32 %v2210_v7, 0.0  ;;  %v2088_v61 = vadd.f32 %v2087_v35, %v6082_v52  ;;  %v2089_v6 = vpop.f32.mrb[175].mxu0  ;;  %3197 = vadd.xlane.f32.xlu0 %v3196_v14  ;;  %2481 = vmatprep.mubr.bf16.mxu1 %v5512_v46 }
 0x243   : > { %v2974_v5 = vmul.f32 %v6094_v60, %v2706_v13  ;;  %v2657_v16 = vmax.f32 %v2086_v15, 0.0  ;;  %v2090_v43 = vadd.f32 %v2089_v6, %v6084_v48 }
 0x244   : > { %v2924_v18 = vmul.f32 %v6094_v60, %v2656_v11  ;;  %v2975_v47 = vmul.f32 %v6099_v59, %v2707_v42  ;;  %v2658_v29 = vmax.f32 %v2088_v61, 0.0  ;;  %v2213_v30 = vpop.f32.mrb[32].mxu1  ;;  %3200 = vadd.xlane.f32.xlu1 %v3199_v38  ;;  %v3274_v25 = vadd.f32 %v2973_v28, %v2972_v3 }
 0x245   : > { %v2925_v44 = vmul.f32 %v6099_v59, %v2657_v16  ;;  %v2659_v31 = vmax.f32 %v2090_v43, 0.0  ;;  %v2214_v34 = vadd.f32 %v2213_v30, %v6082_v52  ;;  %v2215_v10 = vpop.f32.mrb[33].mxu1 }
 0x246   : > { %v2926_v2 = vmul.f32 %v6094_v60, %v2658_v29  ;;  %v2216_v32 = vadd.f32 %v2215_v10, %v6084_v48  ;;  %v2217_v4 = vpop.f32.mrb[34].mxu1  ;;  %3275 = vadd.xlane.f32.xlu0 %v3274_v25  ;;  %v3277_v33 = vadd.f32 %v2975_v47, %v2974_v5 }
 0x247   : > { %v2927_v36 = vmul.f32 %v6099_v59, %v2659_v31  ;;  %v2708_v39 = vmax.f32 %v2214_v34, 0.0  ;;  %v2218_v58 = vadd.f32 %v2217_v4, %v6082_v52  ;;  %v2093_v45 = vpop.f32.mrb[176].mxu0  ;;  %v2219_v41 = vpop.f32.mrb[35].mxu1  ;;  %v3202_v26 = vadd.f32 %v2925_v44, %v2924_v18 }
 0x248   : > { %v2709_v22 = vmax.f32 %v2216_v32, 0.0  ;;  %v2094_v37 = vadd.f32 %v2093_v45, %v6082_v52  ;;  %v2220_v12 = vadd.f32 %v2219_v41, %v6084_v48  ;;  %v2095_v50 = vpop.f32.mrb[177].mxu0  ;;  %3278 = vadd.xlane.f32.xlu1 %v3277_v33 }
 0x249   : > { %v2976_v55 = vmul.f32 %v6094_v60, %v2708_v39  ;;  %v2710_v57 = vmax.f32 %v2218_v58, 0.0  ;;  %v2096_v62 = vadd.f32 %v2095_v50, %v6084_v48  ;;  %v2097_v53 = vpop.f32.mrb[178].mxu0  ;;  %4679 = vmatmul.mubr.msk.bf16.gmra.mrb[140].mxu1 %vm1746_vm1, %v6018_v54  ;;  %v3205_v51 = vadd.f32 %v2927_v36, %v2926_v2 }
 0x24a   : > { %v2977_v14 = vmul.f32 %v6099_v59, %v2709_v22  ;;  %v2660_v1 = vmax.f32 %v2094_v37, 0.0  ;;  %v2711_v9 = vmax.f32 %v2220_v12, 0.0  ;;  %v2098_v7 = vadd.f32 %v2097_v53, %v6082_v52  ;;  %v2099_v8 = vpop.f32.mrb[179].mxu0  ;;  %3203 = vadd.xlane.f32.xlu0 %v3202_v26  ;;  %2491 = vmatprep.mubr.bf16.mxu1 %v5512_v46 }
 0x24b   : > { %v2978_v3 = vmul.f32 %v6094_v60, %v2710_v57  ;;  %v2661_v13 = vmax.f32 %v2096_v62, 0.0  ;;  %v2100_v15 = vadd.f32 %v2099_v8, %v6084_v48 }
 0x24c   : > { %v2928_v35 = vmul.f32 %v6094_v60, %v2660_v1  ;;  %v2979_v54 = vmul.f32 %v6099_v59, %v2711_v9  ;;  %v2662_v38 = vmax.f32 %v2098_v7, 0.0  ;;  %v2223_v28 = vpop.f32.mrb[36].mxu1  ;;  %3206 = vadd.xlane.f32.xlu1 %v3205_v51  ;;  %v3280_v11 = vadd.f32 %v2977_v14, %v2976_v55 }
 0x24d   : > { %v2929_v42 = vmul.f32 %v6099_v59, %v2661_v13  ;;  %v2663_v61 = vmax.f32 %v2100_v15, 0.0  ;;  %v2224_v6 = vadd.f32 %v2223_v28, %v6082_v52  ;;  %v2225_v5 = vpop.f32.mrb[37].mxu1 }
 0x24e   : > { %v2930_v16 = vmul.f32 %v6094_v60, %v2662_v38  ;;  %v2226_v43 = vadd.f32 %v2225_v5, %v6084_v48  ;;  %v2227_v18 = vpop.f32.mrb[38].mxu1  ;;  %3281 = vadd.xlane.f32.xlu0 %v3280_v11  ;;  %v3283_v47 = vadd.f32 %v2979_v54, %v2978_v3 }
 0x24f   : > { %v2931_v29 = vmul.f32 %v6099_v59, %v2663_v61  ;;  %v2712_v30 = vmax.f32 %v2224_v6, 0.0  ;;  %v2228_v25 = vadd.f32 %v2227_v18, %v6082_v52  ;;  %v2103_v44 = vpop.f32.mrb[180].mxu0  ;;  %v2229_v31 = vpop.f32.mrb[39].mxu1  ;;  %v3208_v34 = vadd.f32 %v2929_v42, %v2928_v35 }
 0x250   : > { %v2713_v10 = vmax.f32 %v2226_v43, 0.0  ;;  %v2104_v2 = vadd.f32 %v2103_v44, %v6082_v52  ;;  %v2230_v32 = vadd.f32 %v2229_v31, %v6084_v48  ;;  %v2105_v4 = vpop.f32.mrb[181].mxu0  ;;  %3284 = vadd.xlane.f32.xlu1 %v3283_v47 }
 0x251   : > { %v2980_v33 = vmul.f32 %v6094_v60, %v2712_v30  ;;  %v2714_v36 = vmax.f32 %v2228_v25, 0.0  ;;  %v2106_v39 = vadd.f32 %v2105_v4, %v6084_v48  ;;  %v2107_v58 = vpop.f32.mrb[182].mxu0  ;;  %4680 = vmatmul.mubr.msk.bf16.gmra.mrb[144].mxu1 %vm1746_vm1, %v6031_v0  ;;  %v3211_v45 = vadd.f32 %v2931_v29, %v2930_v16 }
 0x252   : > { %v2981_v41 = vmul.f32 %v6099_v59, %v2713_v10  ;;  %v2664_v26 = vmax.f32 %v2104_v2, 0.0  ;;  %v2715_v22 = vmax.f32 %v2230_v32, 0.0  ;;  %v2108_v37 = vadd.f32 %v2107_v58, %v6082_v52  ;;  %v2109_v12 = vpop.f32.mrb[183].mxu0  ;;  %3209 = vadd.xlane.f32.xlu0 %v3208_v34  ;;  %2501 = vmatprep.mubr.bf16.mxu1 %v5512_v46 }
 0x253   : > { %v2982_v50 = vmul.f32 %v6094_v60, %v2714_v36  ;;  %v2665_v55 = vmax.f32 %v2106_v39, 0.0  ;;  %v2110_v57 = vadd.f32 %v2109_v12, %v6084_v48 }
 0x254   : > { %v2932_v62 = vmul.f32 %v6094_v60, %v2664_v26  ;;  %v2983_v0 = vmul.f32 %v6099_v59, %v2715_v22  ;;  %v2666_v53 = vmax.f32 %v2108_v37, 0.0  ;;  %v2233_v51 = vpop.f32.mrb[40].mxu1  ;;  %3212 = vadd.xlane.f32.xlu1 %v3211_v45  ;;  %v3286_v14 = vadd.f32 %v2981_v41, %v2980_v33 }
 0x255   : > { %v2933_v1 = vmul.f32 %v6099_v59, %v2665_v55  ;;  %v2667_v9 = vmax.f32 %v2110_v57, 0.0  ;;  %v2234_v7 = vadd.f32 %v2233_v51, %v6082_v52  ;;  %v2235_v8 = vpop.f32.mrb[41].mxu1 }
 0x256   : > { %v2934_v3 = vmul.f32 %v6094_v60, %v2666_v53  ;;  %v2236_v13 = vadd.f32 %v2235_v8, %v6084_v48  ;;  %v2237_v15 = vpop.f32.mrb[42].mxu1  ;;  %3287 = vadd.xlane.f32.xlu0 %v3286_v14  ;;  %v3289_v35 = vadd.f32 %v2983_v0, %v2982_v50 }
 0x257   : > { %v2935_v54 = vmul.f32 %v6099_v59, %v2667_v9  ;;  %v2716_v38 = vmax.f32 %v2234_v7, 0.0  ;;  %v2238_v28 = vadd.f32 %v2237_v15, %v6082_v52  ;;  %v2113_v11 = vpop.f32.mrb[184].mxu0  ;;  %v2239_v42 = vpop.f32.mrb[43].mxu1  ;;  %v3214_v61 = vadd.f32 %v2933_v1, %v2932_v62 }
 0x258   : > { %v2717_v6 = vmax.f32 %v2236_v13, 0.0  ;;  %v2114_v5 = vadd.f32 %v2113_v11, %v6082_v52  ;;  %v2240_v16 = vadd.f32 %v2239_v42, %v6084_v48  ;;  %v2115_v43 = vpop.f32.mrb[185].mxu0  ;;  %3290 = vadd.xlane.f32.xlu1 %v3289_v35 }
 0x259   : > { %v2984_v18 = vmul.f32 %v6094_v60, %v2716_v38  ;;  %v2718_v47 = vmax.f32 %v2238_v28, 0.0  ;;  %v2116_v29 = vadd.f32 %v2115_v43, %v6084_v48  ;;  %v2117_v30 = vpop.f32.mrb[186].mxu0  ;;  %4681 = vmatmul.mubr.msk.bf16.gmra.mrb[148].mxu1 %vm1746_vm1, %v6029_v63  ;;  %v3217_v25 = vadd.f32 %v2935_v54, %v2934_v3 }
 0x25a   : > { %v2985_v44 = vmul.f32 %v6099_v59, %v2717_v6  ;;  %v2668_v31 = vmax.f32 %v2114_v5, 0.0  ;;  %v2719_v34 = vmax.f32 %v2240_v16, 0.0  ;;  %v2118_v10 = vadd.f32 %v2117_v30, %v6082_v52  ;;  %v2119_v2 = vpop.f32.mrb[187].mxu0  ;;  %3215 = vadd.xlane.f32.xlu0 %v3214_v61  ;;  %2511 = vmatprep.mubr.bf16.mxu1 %v5512_v46 }
 0x25b   : > { %v2986_v32 = vmul.f32 %v6094_v60, %v2718_v47  ;;  %v2669_v4 = vmax.f32 %v2116_v29, 0.0  ;;  %v2120_v33 = vadd.f32 %v2119_v2, %v6084_v48 }
 0x25c   : > { %v2936_v36 = vmul.f32 %v6094_v60, %v2668_v31  ;;  %v2987_v63 = vmul.f32 %v6099_v59, %v2719_v34  ;;  %v2670_v39 = vmax.f32 %v2118_v10, 0.0  ;;  %v2243_v58 = vpop.f32.mrb[44].mxu1  ;;  %3218 = vadd.xlane.f32.xlu1 %v3217_v25  ;;  %v3292_v45 = vadd.f32 %v2985_v44, %v2984_v18 }
 0x25d   : > { %v2937_v41 = vmul.f32 %v6099_v59, %v2669_v4  ;;  %v2671_v26 = vmax.f32 %v2120_v33, 0.0  ;;  %v2244_v22 = vadd.f32 %v2243_v58, %v6082_v52  ;;  %v2245_v37 = vpop.f32.mrb[45].mxu1 }
 0x25e   : > { %v2938_v12 = vmul.f32 %v6094_v60, %v2670_v39  ;;  %v2246_v50 = vadd.f32 %v2245_v37, %v6084_v48  ;;  %v2247_v55 = vpop.f32.mrb[46].mxu1  ;;  %3293 = vadd.xlane.f32.xlu0 %v3292_v45  ;;  %v3295_v57 = vadd.f32 %v2987_v63, %v2986_v32 }
 0x25f   : > { %v2939_v62 = vmul.f32 %v6099_v59, %v2671_v26  ;;  %v2720_v0 = vmax.f32 %v2244_v22, 0.0  ;;  %v2248_v53 = vadd.f32 %v2247_v55, %v6082_v52  ;;  %v2123_v51 = vpop.f32.mrb[188].mxu0  ;;  %v2249_v14 = vpop.f32.mrb[47].mxu1  ;;  %v3220_v1 = vadd.f32 %v2937_v41, %v2936_v36 }
 0x260   : > { %v2721_v9 = vmax.f32 %v2246_v50, 0.0  ;;  %v2124_v7 = vadd.f32 %v2123_v51, %v6082_v52  ;;  %v2250_v8 = vadd.f32 %v2249_v14, %v6084_v48  ;;  %v2125_v3 = vpop.f32.mrb[189].mxu0  ;;  %3296 = vadd.xlane.f32.xlu1 %v3295_v57 }
 0x261   : > { %v2988_v13 = vmul.f32 %v6094_v60, %v2720_v0  ;;  %v2722_v15 = vmax.f32 %v2248_v53, 0.0  ;;  %v2126_v35 = vadd.f32 %v2125_v3, %v6084_v48  ;;  %v2127_v54 = vpop.f32.mrb[190].mxu0  ;;  %4682 = vmatmul.mubr.msk.bf16.gmra.mrb[152].mxu1 %vm1746_vm1, %v6042_v23  ;;  %v3223_v38 = vadd.f32 %v2939_v62, %v2938_v12 }
 0x262   : > { %v2989_v28 = vmul.f32 %v6099_v59, %v2721_v9  ;;  %v2672_v11 = vmax.f32 %v2124_v7, 0.0  ;;  %v2723_v42 = vmax.f32 %v2250_v8, 0.0  ;;  %v2128_v61 = vadd.f32 %v2127_v54, %v6082_v52  ;;  %v2129_v6 = vpop.f32.mrb[191].mxu0  ;;  %3221 = vadd.xlane.f32.xlu0 %v3220_v1  ;;  %2521 = vmatprep.mubr.bf16.mxu1 %v5512_v46 }
 0x263   : > { %v2990_v5 = vmul.f32 %v6094_v60, %v2722_v15  ;;  %v2673_v16 = vmax.f32 %v2126_v35, 0.0  ;;  %v2130_v43 = vadd.f32 %v2129_v6, %v6084_v48 }
 0x264   : > { %v2940_v18 = vmul.f32 %v6094_v60, %v2672_v11  ;;  %v2991_v23 = vmul.f32 %v6099_v59, %v2723_v42  ;;  %v2674_v47 = vmax.f32 %v2128_v61, 0.0  ;;  %v2253_v29 = vpop.f32.mrb[48].mxu1  ;;  %3224 = vadd.xlane.f32.xlu1 %v3223_v38  ;;  %v3298_v30 = vadd.f32 %v2989_v28, %v2988_v13 }
 0x265   : > { %v2941_v25 = vmul.f32 %v6099_v59, %v2673_v16  ;;  %v2675_v44 = vmax.f32 %v2130_v43, 0.0  ;;  %v2254_v31 = vadd.f32 %v2253_v29, %v6082_v52  ;;  %v2255_v34 = vpop.f32.mrb[49].mxu1 }
 0x266   : > { %v2942_v10 = vmul.f32 %v6094_v60, %v2674_v47  ;;  %v2256_v2 = vadd.f32 %v2255_v34, %v6084_v48  ;;  %v2257_v32 = vpop.f32.mrb[50].mxu1  ;;  %3299 = vadd.xlane.f32.xlu0 %v3298_v30  ;;  %v3301_v4 = vadd.f32 %v2991_v23, %v2990_v5 }
 0x267   : > { %v2943_v33 = vmul.f32 %v6099_v59, %v2675_v44  ;;  %v2724_v36 = vmax.f32 %v2254_v31, 0.0  ;;  %v2258_v63 = vadd.f32 %v2257_v32, %v6082_v52  ;;  %v2259_v39 = vpop.f32.mrb[51].mxu1  ;;  %v3226_v58 = vadd.f32 %v2941_v25, %v2940_v18 }
 0x268   : > { %v2725_v45 = vmax.f32 %v2256_v2, 0.0  ;;  %v2260_v41 = vadd.f32 %v2259_v39, %v6084_v48  ;;  %3302 = vadd.xlane.f32.xlu1 %v3301_v4 }
 0x269   : > { %v2992_v26 = vmul.f32 %v6094_v60, %v2724_v36  ;;  %v2726_v22 = vmax.f32 %v2258_v63, 0.0  ;;  %4683 = vmatmul.mubr.msk.bf16.gmra.mrb[156].mxu1 %vm1746_vm1, %v6040_v20  ;;  %v3229_v37 = vadd.f32 %v2943_v33, %v2942_v10  ;;  %v6402_v33 = vld [vmem:[#allocation2] ss:$0 sm:$0xff] }
 0x26a   : > { %v2993_v12 = vmul.f32 %v6099_v59, %v2725_v45  ;;  %v2727_v50 = vmax.f32 %v2260_v41, 0.0  ;;  %3227 = vadd.xlane.f32.xlu0 %v3226_v58  ;;  %2531 = vmatprep.mubr.bf16.mxu1 %v5512_v46 }
 0x26b   : > { %v2994_v55 = vmul.f32 %v6094_v60, %v2726_v22 }
 0x26c   : > { %v2995_v57 = vmul.f32 %v6099_v59, %v2727_v50  ;;  %v2263_v62 = vpop.f32.mrb[52].mxu1  ;;  %3230 = vadd.xlane.f32.xlu1 %v3229_v37  ;;  %v3304_v0 = vadd.f32 %v2993_v12, %v2992_v26 }
 0x26d   : > { %v2264_v53 = vadd.f32 %v2263_v62, %v6082_v52  ;;  %v2265_v51 = vpop.f32.mrb[53].mxu1 }
 0x26e   : > { %v2266_v14 = vadd.f32 %v2265_v51, %v6084_v48  ;;  %v2267_v20 = vpop.f32.mrb[54].mxu1  ;;  %3305 = vadd.xlane.f32.xlu0 %v3304_v0  ;;  %v3307_v1 = vadd.f32 %v2995_v57, %v2994_v55 }
 0x26f   : > { %v2728_v9 = vmax.f32 %v2264_v53, 0.0  ;;  %v2268_v7 = vadd.f32 %v2267_v20, %v6082_v52  ;;  %v2269_v8 = vpop.f32.mrb[55].mxu1 }
 0x270   : > { %v2729_v3 = vmax.f32 %v2266_v14, 0.0  ;;  %v2270_v13 = vadd.f32 %v2269_v8, %v6084_v48  ;;  %3308 = vadd.xlane.f32.xlu1 %v3307_v1 }
 0x271   : > { %v2996_v15 = vmul.f32 %v6094_v60, %v2728_v9  ;;  %v2730_v35 = vmax.f32 %v2268_v7, 0.0  ;;  %4684 = vmatmul.mubr.msk.bf16.gmra.mrb[160].mxu1 %vm1746_vm1, %v6053_v19 }
 0x272   : > { %v2997_v54 = vmul.f32 %v6099_v59, %v2729_v3  ;;  %v2731_v38 = vmax.f32 %v2270_v13, 0.0  ;;  %2541 = vmatprep.mubr.bf16.mxu1 %v5512_v46 }
 0x273   : > { %v2998_v28 = vmul.f32 %v6094_v60, %v2730_v35 }
 0x274   : > { %v2999_v11 = vmul.f32 %v6099_v59, %v2731_v38  ;;  %v2273_v42 = vpop.f32.mrb[56].mxu1  ;;  %v3310_v61 = vadd.f32 %v2997_v54, %v2996_v15 }
 0x275   : > { %v2274_v6 = vadd.f32 %v2273_v42, %v6082_v52  ;;  %v2275_v5 = vpop.f32.mrb[57].mxu1 }
 0x276   : > { %v2276_v16 = vadd.f32 %v2275_v5, %v6084_v48  ;;  %v2277_v43 = vpop.f32.mrb[58].mxu1  ;;  %3311 = vadd.xlane.f32.xlu0 %v3310_v61  ;;  %v3313_v18 = vadd.f32 %v2999_v11, %v2998_v28 }
 0x277   : > { %v2732_v19 = vmax.f32 %v2274_v6, 0.0  ;;  %v2278_v23 = vadd.f32 %v2277_v43, %v6082_v52  ;;  %v2279_v47 = vpop.f32.mrb[59].mxu1 }
 0x278   : > { %v2733_v29 = vmax.f32 %v2276_v16, 0.0  ;;  %v2280_v30 = vadd.f32 %v2279_v47, %v6084_v48  ;;  %3314 = vadd.xlane.f32.xlu1 %v3313_v18 }
 0x279   : > { %v3000_v25 = vmul.f32 %v6094_v60, %v2732_v19  ;;  %v2734_v44 = vmax.f32 %v2278_v23, 0.0  ;;  %4685 = vmatmul.mubr.msk.bf16.gmra.mrb[164].mxu1 %vm1746_vm1, %v6051_v40 }
 0x27a   : > { %v3001_v31 = vmul.f32 %v6099_v59, %v2733_v29  ;;  %v2735_v34 = vmax.f32 %v2280_v30, 0.0  ;;  %2551 = vmatprep.mubr.bf16.mxu1 %v5512_v46 }
 0x27b   : > { %v3002_v10 = vmul.f32 %v6094_v60, %v2734_v44 }
 0x27c   : > { %v3003_v2 = vmul.f32 %v6099_v59, %v2735_v34  ;;  %v2283_v32 = vpop.f32.mrb[60].mxu1  ;;  %v3316_v4 = vadd.f32 %v3001_v31, %v3000_v25 }
 0x27d   : > { %v2284_v36 = vadd.f32 %v2283_v32, %v6082_v52  ;;  %v2285_v63 = vpop.f32.mrb[61].mxu1 }
 0x27e   : > { %v2286_v39 = vadd.f32 %v2285_v63, %v6084_v48  ;;  %v2287_v58 = vpop.f32.mrb[62].mxu1  ;;  %3317 = vadd.xlane.f32.xlu0 %v3316_v4  ;;  %v3138_v40 = vpop.xlane.xlu0 %3137  ;;  %v3319_v45 = vadd.f32 %v3003_v2, %v3002_v10 }
 0x27f   : > { %v2736_v41 = vmax.f32 %v2284_v36, 0.0  ;;  %v2288_v26 = vadd.f32 %v2287_v58, %v6082_v52  ;;  %v3527_v22 = vadd.f32 %v6402_v33, %v3138_v40  ;;  %v2289_v37 = vpop.f32.mrb[63].mxu1 }
 0x280   : > { %v2737_v12 = vmax.f32 %v2286_v39, 0.0  ;;  %v2290_v50 = vadd.f32 %v2289_v37, %v6084_v48  ;;  %3320 = vadd.xlane.f32.xlu1 %v3319_v45 }
 0x281   : > { %v3004_v55 = vmul.f32 %v6094_v60, %v2736_v41  ;;  %v2738_v57 = vmax.f32 %v2288_v26, 0.0  ;;  %v3655_v62 = vsub.f32 0.0, %v3527_v22  ;;  %4686 = vmatmul.mubr.msk.bf16.gmra.mrb[168].mxu1 %vm1746_vm1, %v6064_v21 }
 0x282   : > { %v3005_v0 = vmul.f32 %v6099_v59, %v2737_v12  ;;  %v2739_v53 = vmax.f32 %v2290_v50, 0.0  ;;  %v3141_v51 = vpop.xlane.xlu0 %3140  ;;  %2561 = vmatprep.mubr.bf16.mxu1 %v5512_v46 }
 0x283   : > { %v3006_v14 = vmul.f32 %v6094_v60, %v2738_v57  ;;  %v3783_v20 = vmul.f32 1.442695, %v3655_v62  ;;  %v3528_v1 = vadd.f32 %v6402_v33, %v3141_v51 }
 0x284   : > { %v3007_v9 = vmul.f32 %v6099_v59, %v2739_v53  ;;  %v2293_v7 = vpop.f32.mrb[64].mxu1  ;;  %v3322_v8 = vadd.f32 %v3005_v0, %v3004_v55 }
 0x285   : > { %4988 = vpow2.f32 %v3783_v20  ;;  %v3656_v3 = vsub.f32 0.0, %v3528_v1  ;;  %v2294_v13 = vadd.f32 %v2293_v7, %v6082_v52  ;;  %v2295_v21 = vpop.f32.mrb[65].mxu1 }
 0x286   : > { %v2296_v15 = vadd.f32 %v2295_v21, %v6084_v48  ;;  %v2297_v35 = vpop.f32.mrb[66].mxu1  ;;  %v3144_v54 = vpop.xlane.xlu1 %3143  ;;  %3323 = vadd.xlane.f32.xlu0 %v3322_v8  ;;  %v3325_v38 = vadd.f32 %v3007_v9, %v3006_v14 }
 0x287   : > { %v3785_v28 = vmul.f32 1.442695, %v3656_v3  ;;  %v2740_v11 = vmax.f32 %v2294_v13, 0.0  ;;  %v2298_v42 = vadd.f32 %v2297_v35, %v6082_v52  ;;  %v3529_v61 = vadd.f32 %v6402_v33, %v3144_v54  ;;  %v2299_v6 = vpop.f32.mrb[67].mxu1 }
 0x288   : > { %v2741_v5 = vmax.f32 %v2296_v15, 0.0  ;;  %v2300_v16 = vadd.f32 %v2299_v6, %v6084_v48  ;;  %3326 = vadd.xlane.f32.xlu1 %v3325_v38 }
 0x289   : > { %4990 = vpow2.f32 %v3785_v28  ;;  %v3008_v43 = vmul.f32 %v6094_v60, %v2740_v11  ;;  %v2742_v18 = vmax.f32 %v2298_v42, 0.0  ;;  %v3657_v19 = vsub.f32 0.0, %v3529_v61  ;;  %4687 = vmatmul.mubr.msk.bf16.gmra.mrb[172].mxu1 %vm1746_vm1, %v6062_v56 }
 0x28a   : > { %v3009_v23 = vmul.f32 %v6099_v59, %v2741_v5  ;;  %v2743_v47 = vmax.f32 %v2300_v16, 0.0  ;;  %v3147_v29 = vpop.xlane.xlu1 %3146  ;;  %2571 = vmatprep.mubr.bf16.mxu1 %v5512_v46 }
 0x28b   : > { %v3010_v30 = vmul.f32 %v6094_v60, %v2742_v18  ;;  %v3787_v25 = vmul.f32 1.442695, %v3657_v19  ;;  %v3530_v44 = vadd.f32 %v6402_v33, %v3147_v29 }
 0x28c   : > { %v3011_v31 = vmul.f32 %v6099_v59, %v2743_v47  ;;  %v2303_v34 = vpop.f32.mrb[68].mxu1  ;;  %v3328_v10 = vadd.f32 %v3009_v23, %v3008_v43 }
 0x28d   : > { %4992 = vpow2.f32 %v3787_v25  ;;  %v3658_v2 = vsub.f32 0.0, %v3530_v44  ;;  %v2304_v32 = vadd.f32 %v2303_v34, %v6082_v52  ;;  %v2305_v56 = vpop.f32.mrb[69].mxu1 }
 0x28e   : > { %v2306_v4 = vadd.f32 %v2305_v56, %v6084_v48  ;;  %v2307_v36 = vpop.f32.mrb[70].mxu1  ;;  %3329 = vadd.xlane.f32.xlu0 %v3328_v10  ;;  %v3150_v63 = vpop.xlane.xlu0 %3149  ;;  %v3331_v39 = vadd.f32 %v3011_v31, %v3010_v30 }
 0x28f   : > { %v4989_v58 = vpop.eup %4988  ;;  %v3789_v40 = vmul.f32 1.442695, %v3658_v2  ;;  %v2744_v45 = vmax.f32 %v2304_v32, 0.0  ;;  %v2308_v41 = vadd.f32 %v2307_v36, %v6082_v52  ;;  %v3531_v26 = vadd.f32 %v6402_v33, %v3150_v63  ;;  %v2309_v22 = vpop.f32.mrb[71].mxu1 }
 0x290   : > { %v4039_v37 = vadd.f32 1.0, %v4989_v58  ;;  %v2745_v12 = vmax.f32 %v2306_v4, 0.0  ;;  %v2310_v50 = vadd.f32 %v2309_v22, %v6084_v48  ;;  %3332 = vadd.xlane.f32.xlu1 %v3331_v39  ;;  %v3153_v55 = vpop.xlane.xlu1 %3152 }
 0x291   : > { %4994 = vpow2.f32 %v3789_v40  ;;  %v3012_v57 = vmul.f32 %v6094_v60, %v2744_v45  ;;  %v2746_v62 = vmax.f32 %v2308_v41, 0.0  ;;  %v3659_v0 = vsub.f32 0.0, %v3531_v26  ;;  %4688 = vmatmul.mubr.msk.bf16.gmra.mrb[176].mxu1 %vm1746_vm1, %v6074_v24 }
 0x292   : > { %4996 = vrcp.f32 %v4039_v37  ;;  %v3013_v53 = vmul.f32 %v6099_v59, %v2745_v12  ;;  %v2747_v51 = vmax.f32 %v2310_v50, 0.0  ;;  %v3532_v14 = vadd.f32 %v6402_v33, %v3153_v55  ;;  %2581 = vmatprep.mubr.bf16.mxu1 %v5512_v46 }
 0x293   : > { %v4991_v20 = vpop.eup %4990  ;;  %v3014_v1 = vmul.f32 %v6094_v60, %v2746_v62  ;;  %v3791_v9 = vmul.f32 1.442695, %v3659_v0 }
 0x294   : > { %v4040_v7 = vadd.f32 1.0, %v4991_v20  ;;  %v3015_v8 = vmul.f32 %v6099_v59, %v2747_v51  ;;  %v3660_v3 = vsub.f32 0.0, %v3532_v14  ;;  %v2313_v13 = vpop.f32.mrb[72].mxu1  ;;  %v3334_v21 = vadd.f32 %v3013_v53, %v3012_v57 }
 0x295   : > { %4998 = vpow2.f32 %v3791_v9  ;;  %v2314_v24 = vadd.f32 %v2313_v13, %v6082_v52  ;;  %v2315_v15 = vpop.f32.mrb[73].mxu1 }
 0x296   : > { %5000 = vrcp.f32 %v4040_v7  ;;  %v3793_v35 = vmul.f32 1.442695, %v3660_v3  ;;  %v2316_v54 = vadd.f32 %v2315_v15, %v6084_v48  ;;  %v2317_v38 = vpop.f32.mrb[74].mxu1  ;;  %3335 = vadd.xlane.f32.xlu0 %v3334_v21  ;;  %v3156_v28 = vpop.xlane.xlu0 %3155  ;;  %v3337_v11 = vadd.f32 %v3015_v8, %v3014_v1 }
 0x297   : > { %v4993_v42 = vpop.eup %4992  ;;  %v2748_v61 = vmax.f32 %v2314_v24, 0.0  ;;  %v2318_v6 = vadd.f32 %v2317_v38, %v6082_v52  ;;  %v3533_v5 = vadd.f32 %v6402_v33, %v3156_v28  ;;  %v2319_v16 = vpop.f32.mrb[75].mxu1 }
 0x298   : > { %v4041_v43 = vadd.f32 1.0, %v4993_v42  ;;  %5002 = vpow2.f32 %v3793_v35  ;;  %v2749_v18 = vmax.f32 %v2316_v54, 0.0  ;;  %v2320_v19 = vadd.f32 %v2319_v16, %v6084_v48  ;;  %3338 = vadd.xlane.f32.xlu1 %v3337_v11  ;;  %v3159_v23 = vpop.xlane.xlu1 %3158 }
 0x299   : > { %v3016_v47 = vmul.f32 %v6094_v60, %v2748_v61  ;;  %v2750_v29 = vmax.f32 %v2318_v6, 0.0  ;;  %v3661_v30 = vsub.f32 0.0, %v3533_v5  ;;  %v3534_v25 = vadd.f32 %v6402_v33, %v3159_v23  ;;  %4689 = vmatmul.mubr.msk.bf16.gmra.mrb[180].mxu1 %vm1746_vm1, %v6072_v17 }
 0x29a   : > { %5004 = vrcp.f32 %v4041_v43  ;;  %v3017_v44 = vmul.f32 %v6099_v59, %v2749_v18  ;;  %v2751_v31 = vmax.f32 %v2320_v19, 0.0  ;;  %2591 = vmatprep.mubr.bf16.mxu1 %v5512_v46 }
 0x29b   : > { %v4995_v34 = vpop.eup %4994  ;;  %v3018_v10 = vmul.f32 %v6094_v60, %v2750_v29  ;;  %v3795_v2 = vmul.f32 1.442695, %v3661_v30  ;;  %v3662_v32 = vsub.f32 0.0, %v3534_v25  ;;  %v3234_v56 = vpop.xlane.xlu0 %3233 }
 0x29c   : > { %v4997_v17 = vpop.eup %4996  ;;  %v4042_v4 = vadd.f32 1.0, %v4995_v34  ;;  %v3019_v36 = vmul.f32 %v6099_v59, %v2751_v31  ;;  %v3559_v63 = vadd.f32 %v6402_v33, %v3234_v56  ;;  %v2323_v39 = vpop.f32.mrb[76].mxu1  ;;  %v3340_v58 = vadd.f32 %v3017_v44, %v3016_v47 }
 0x29d   : > { %4296 = vst.msk [vmem:[%s6456_s17] sm:$0xff] %vm4295_vm2, %v4997_v17  ;;  %5006 = vpow2.f32 %v3795_v2  ;;  %v3797_v40 = vmul.f32 1.442695, %v3662_v32  ;;  %v2324_v45 = vadd.f32 %v2323_v39, %v6082_v52  ;;  %v2325_v41 = vpop.f32.mrb[77].mxu1  ;;  %v3237_v26 = vpop.xlane.xlu1 %3236 }
 0x29e   : > { %5008 = vrcp.f32 %v4042_v4  ;;  %v3687_v22 = vsub.f32 0.0, %v3559_v63  ;;  %v2326_v37 = vadd.f32 %v2325_v41, %v6084_v48  ;;  %v3560_v12 = vadd.f32 %v6402_v33, %v3237_v26  ;;  %v2327_v50 = vpop.f32.mrb[78].mxu1  ;;  %3341 = vadd.xlane.f32.xlu0 %v3340_v58 }
 0x29f   : > { %v4999_v55 = vpop.eup %4998  ;;  %5010 = vpow2.f32 %v3797_v40  ;;  %v2752_v57 = vmax.f32 %v2324_v45, 0.0  ;;  %v2328_v62 = vadd.f32 %v2327_v50, %v6082_v52  ;;  %v2329_v0 = vpop.f32.mrb[79].mxu1  ;;  %v3343_v51 = vadd.f32 %v3019_v36, %v3018_v10 }
 0x2a0   : > { %v3162_v53 = vpop.xlane.xlu0 %3161  ;;  %v5001_v14 = vpop.eup %5000  ;;  %v4043_v20 = vadd.f32 1.0, %v4999_v55  ;;  %v3847_v1 = vmul.f32 1.442695, %v3687_v22  ;;  %v2753_v9 = vmax.f32 %v2326_v37, 0.0  ;;  %v3688_v7 = vsub.f32 0.0, %v3560_v12 }
 0x2a1   : > { %4297 = vst.msk [vmem:[%s6456_s17 + $0x8] sm:$0xff] %vm4295_vm2, %v5001_v14  ;;  %v3020_v8 = vmul.f32 %v6094_v60, %v2752_v57  ;;  %v2754_v3 = vmax.f32 %v2328_v62, 0.0  ;;  %v2330_v13 = vadd.f32 %v2329_v0, %v6084_v48  ;;  %v3535_v21 = vadd.f32 %v6402_v33, %v3162_v53  ;;  %3344 = vadd.xlane.f32.xlu1 %v3343_v51  ;;  %v3165_v24 = vpop.xlane.xlu1 %3164 }
 0x2a2   : > { %4690 = vmatmul.mubr.msk.bf16.gmra.mrb[184].mxu1 %vm1746_vm1, %v6091_v49  ;;  %v5003_v15 = vpop.eup %5002  ;;  %5012 = vrcp.f32 %v4043_v20  ;;  %v3021_v35 = vmul.f32 %v6099_v59, %v2753_v9  ;;  %v3849_v54 = vmul.f32 1.442695, %v3688_v7  ;;  %v3536_v38 = vadd.f32 %v6402_v33, %v3165_v24 }
 0x2a3   : > { %2601 = vmatprep.mubr.bf16.mxu1 %v5512_v46  ;;  %v4044_v28 = vadd.f32 1.0, %v5003_v15  ;;  %5014 = vpow2.f32 %v3847_v1  ;;  %v3022_v11 = vmul.f32 %v6094_v60, %v2754_v3  ;;  %v2755_v42 = vmax.f32 %v2330_v13, 0.0 }
 0x2a4   : > { %v3240_v61 = vpop.xlane.xlu0 %3239  ;;  %v5005_v6 = vpop.eup %5004  ;;  %5016 = vpow2.f32 %v3849_v54  ;;  %v3663_v49 = vsub.f32 0.0, %v3535_v21  ;;  %v3664_v5 = vsub.f32 0.0, %v3536_v38  ;;  %v3346_v47 = vadd.f32 %v3021_v35, %v3020_v8 }
 0x2a5   : > { %v3561_v16 = vadd.f32 %v6402_v33, %v3240_v61  ;;  %v2333_v43 = vpop.f32.mrb[80].mxu1  ;;  %4298 = vst.msk [vmem:[%s6456_s17 + $0x10] sm:$0xff] %vm4295_vm2, %v5005_v6  ;;  %5018 = vrcp.f32 %v4044_v28  ;;  %v3023_v18 = vmul.f32 %v6099_v59, %v2755_v42  ;;  %v3243_v23 = vpop.xlane.xlu1 %3242 }
 0x2a6   : > { %v2334_v46 = vadd.f32 %v2333_v43, %v6082_v52  ;;  %v2335_v19 = vpop.f32.mrb[81].mxu1  ;;  %v3799_v29 = vmul.f32 1.442695, %v3663_v49  ;;  %v3801_v30 = vmul.f32 1.442695, %v3664_v5  ;;  %v3562_v2 = vadd.f32 %v6402_v33, %v3243_v23  ;;  %3347 = vadd.xlane.f32.xlu0 %v3346_v47 }
 0x2a7   : > { %v3689_v25 = vsub.f32 0.0, %v3561_v16  ;;  %v2336_v44 = vadd.f32 %v2335_v19, %v6084_v48  ;;  %v2337_v31 = vpop.f32.mrb[82].mxu1  ;;  %v5007_v34 = vpop.eup %5006  ;;  %v3349_v4 = vadd.f32 %v3023_v18, %v3022_v11 }
 0x2a8   : > { %v2756_v10 = vmax.f32 %v2334_v46, 0.0  ;;  %v2338_v32 = vadd.f32 %v2337_v31, %v6082_v52  ;;  %v2339_v56 = vpop.f32.mrb[83].mxu1  ;;  %v3168_v17 = vpop.xlane.xlu0 %3167  ;;  %v4045_v63 = vadd.f32 1.0, %v5007_v34  ;;  %5020 = vpow2.f32 %v3799_v29 }
 0x2a9   : > { %v5009_v36 = vpop.eup %5008  ;;  %v3851_v39 = vmul.f32 1.442695, %v3689_v25  ;;  %v2757_v58 = vmax.f32 %v2336_v44, 0.0  ;;  %5022 = vpow2.f32 %v3801_v30  ;;  %v3690_v41 = vsub.f32 0.0, %v3562_v2  ;;  %3350 = vadd.xlane.f32.xlu1 %v3349_v4  ;;  %v3171_v22 = vpop.xlane.xlu1 %3170 }
 0x2aa   : > { %v5011_v40 = vpop.eup %5010  ;;  %4299 = vst.msk [vmem:[%s6456_s17 + $0x18] sm:$0xff] %vm4295_vm2, %v5009_v36  ;;  %v3024_v45 = vmul.f32 %v6094_v60, %v2756_v10  ;;  %v2758_v26 = vmax.f32 %v2338_v32, 0.0  ;;  %4691 = vmatmul.mubr.msk.bf16.gmra.mrb[188].mxu1 %vm1746_vm1, %v6089_v27  ;;  %5024 = vrcp.f32 %v4045_v63  ;;  %v2340_v50 = vadd.f32 %v2339_v56, %v6084_v48 }
 0x2ab   : > { %v4046_v37 = vadd.f32 1.0, %v5011_v40  ;;  %v3025_v12 = vmul.f32 %v6099_v59, %v2757_v58  ;;  %5026 = vpow2.f32 %v3851_v39  ;;  %v3853_v55 = vmul.f32 1.442695, %v3690_v41 }
 0x2ac   : > { %v6496_v57 = vmul.f32 %v6094_v60, %v2758_v26  ;;  %v3537_v62 = vadd.f32 %v6402_v33, %v3168_v17  ;;  %v3246_v0 = vpop.xlane.xlu0 %3245  ;;  %v5013_v53 = vpop.eup %5012  ;;  %v2759_v51 = vmax.f32 %v2340_v50, 0.0  ;;  %v3538_v27 = vadd.f32 %v6402_v33, %v3171_v22 }
 0x2ad   : > { %5028 = vrcp.f32 %v4046_v37  ;;  %v3563_v14 = vadd.f32 %v6402_v33, %v3246_v0  ;;  %v2343_v20 = vpop.f32.mrb[84].mxu1  ;;  %v5015_v1 = vpop.eup %5014  ;;  %4300 = vst.msk [vmem:[%s6456_s17 + $0x20] sm:$0xff] %vm4295_vm2, %v5013_v53  ;;  %v3352_v13 = vadd.f32 %v3025_v12, %v3024_v45 }
 0x2ae   : > { %5030 = vpow2.f32 %v3853_v55  ;;  %v3665_v9 = vsub.f32 0.0, %v3537_v62  ;;  %v2344_v7 = vadd.f32 %v2343_v20, %v6082_v52  ;;  %v2345_v8 = vpop.f32.mrb[85].mxu1  ;;  %v3249_v3 = vpop.xlane.xlu1 %3248  ;;  %v4071_v24 = vadd.f32 1.0, %v5015_v1 }
 0x2af   : > { %v5017_v21 = vpop.eup %5016  ;;  %v3027_v15 = vmul.f32 %v6099_v59, %v2759_v51  ;;  %v3666_v35 = vsub.f32 0.0, %v3538_v27  ;;  %v3691_v54 = vsub.f32 0.0, %v3563_v14  ;;  %v2347_v38 = vpop.f32.mrb[86].mxu1  ;;  %v2346_v6 = vadd.f32 %v2345_v8, %v6084_v48  ;;  %3353 = vadd.xlane.f32.xlu0 %v3352_v13 }
 0x2b0   : > { %v5019_v28 = vpop.eup %5018  ;;  %v4072_v11 = vadd.f32 1.0, %v5017_v21  ;;  %v3803_v42 = vmul.f32 1.442695, %v3665_v9  ;;  %v2760_v61 = vmax.f32 %v2344_v7, 0.0  ;;  %v2349_v49 = vpop.f32.mrb[87].mxu1  ;;  %5032 = vrcp.f32 %v4071_v24 }
 0x2b1   : > { %v3174_v5 = vpop.xlane.xlu0 %3173  ;;  %4301 = vst.msk [vmem:[%s6456_s17 + $0x28] sm:$0xff] %vm4295_vm2, %v5019_v28  ;;  %v3805_v16 = vmul.f32 1.442695, %v3666_v35  ;;  %v3855_v43 = vmul.f32 1.442695, %v3691_v54  ;;  %v3564_v18 = vadd.f32 %v6402_v33, %v3249_v3  ;;  %v2761_v19 = vmax.f32 %v2346_v6, 0.0 }
 0x2b2   : > { %5034 = vrcp.f32 %v4072_v11  ;;  %v6510_v46 = vmul.f32 %v6094_v60, %v2760_v61  ;;  %v2348_v23 = vadd.f32 %v2347_v38, %v6082_v52  ;;  %v3177_v47 = vpop.xlane.xlu1 %3176  ;;  %v5021_v29 = vpop.eup %5020  ;;  %v2350_v25 = vadd.f32 %v2349_v49, %v6084_v48 }
 0x2b3   : > { %5036 = vpow2.f32 %v3803_v42  ;;  %v3692_v30 = vsub.f32 0.0, %v3564_v18  ;;  %v3539_v44 = vadd.f32 %v6402_v33, %v3174_v5  ;;  %v5023_v31 = vpop.eup %5022  ;;  %v4047_v34 = vadd.f32 1.0, %v5021_v29 }
 0x2b4   : > { %5038 = vpow2.f32 %v3805_v16  ;;  %v3029_v10 = vmul.f32 %v6099_v59, %v2761_v19  ;;  %v2762_v2 = vmax.f32 %v2348_v23, 0.0  ;;  %v5025_v56 = vpop.eup %5024  ;;  %v4048_v17 = vadd.f32 1.0, %v5023_v31  ;;  %v2353_v63 = vpop.f32.mrb[88].mxu1 }
 0x2b5   : > { %v3252_v32 = vpop.xlane.xlu0 %3251  ;;  %5040 = vpow2.f32 %v3855_v43  ;;  %v3857_v4 = vmul.f32 1.442695, %v3692_v30  ;;  %v2763_v36 = vmax.f32 %v2350_v25, 0.0  ;;  %v5027_v39 = vpop.eup %5026  ;;  %4302 = vst.msk [vmem:[%s6456_s17 + $0x30] sm:$0xff] %vm4295_vm2, %v5025_v56  ;;  %v3667_v40 = vsub.f32 0.0, %v3539_v44 }
 0x2b6   : > { %5042 = vrcp.f32 %v4047_v34  ;;  %v3030_v58 = vmul.f32 %v6094_v60, %v2762_v2  ;;  %v3355_v45 = vadd.f32 %v3027_v15, %v6496_v57  ;;  %v2355_v41 = vpop.f32.mrb[89].mxu1  ;;  %v3255_v26 = vpop.xlane.xlu1 %3254  ;;  %v4073_v37 = vadd.f32 1.0, %v5027_v39 }
 0x2b7   : > { %v5029_v22 = vpop.eup %5028  ;;  %5044 = vrcp.f32 %v4048_v17  ;;  %v3031_v12 = vmul.f32 %v6099_v59, %v2763_v36  ;;  %v3540_v50 = vadd.f32 %v6402_v33, %v3177_v47  ;;  %v2357_v55 = vpop.f32.mrb[90].mxu1  ;;  %v3807_v0 = vmul.f32 1.442695, %v3667_v40 }
 0x2b8   : > { %v5031_v62 = vpop.eup %5030  ;;  %4303 = vst.msk [vmem:[%s6456_s17 + $0x38] sm:$0xff] %vm4295_vm2, %v5029_v22  ;;  %5046 = vpow2.f32 %v3857_v4  ;;  %3356 = vadd.xlane.f32.xlu1 %v3355_v45  ;;  %v3565_v53 = vadd.f32 %v6402_v33, %v3252_v32  ;;  %v2354_v57 = vadd.f32 %v2353_v63, %v6082_v52  ;;  %v2359_v51 = vpop.f32.mrb[91].mxu1  ;;  %v2356_v1 = vadd.f32 %v2355_v41, %v6084_v48 }
 0x2b9   : > { %v3180_v27 = vpop.xlane.xlu0 %3179  ;;  %5048 = vrcp.f32 %v4073_v37  ;;  %v4074_v14 = vadd.f32 1.0, %v5031_v62  ;;  %v3668_v20 = vsub.f32 0.0, %v3540_v50  ;;  %v3566_v8 = vadd.f32 %v6402_v33, %v3255_v26 }
 0x2ba   : > { %5050 = vpow2.f32 %v3807_v0  ;;  %v3693_v9 = vsub.f32 0.0, %v3565_v53  ;;  %v2764_v7 = vmax.f32 %v2354_v57, 0.0  ;;  %v3183_v3 = vpop.xlane.xlu1 %3182  ;;  %v5033_v13 = vpop.eup %5032  ;;  %v2765_v24 = vmax.f32 %v2356_v1, 0.0 }
 0x2bb   : > { %5052 = vrcp.f32 %v4074_v14  ;;  %v3809_v21 = vmul.f32 1.442695, %v3668_v20  ;;  %v2358_v15 = vadd.f32 %v2357_v55, %v6082_v52  ;;  %4328 = vst.msk [vmem:[%s6456_s17 + $0x100] sm:$0xff] %vm4295_vm2, %v5033_v13  ;;  %v3694_v28 = vsub.f32 0.0, %v3566_v8 }
 0x2bc   : > { %v5035_v35 = vpop.eup %5034  ;;  %v3859_v54 = vmul.f32 1.442695, %v3693_v9  ;;  %v6532_v38 = vmul.f32 %v6094_v60, %v2764_v7  ;;  %v3358_v11 = vadd.f32 %v3029_v10, %v6510_v46  ;;  %v6538_v6 = vmul.f32 %v6099_v59, %v2765_v24  ;;  %v2363_v16 = vpop.f32.mrb[92].mxu1 }
 0x2bd   : > { %v3258_v42 = vpop.xlane.xlu0 %3257  ;;  %v5037_v61 = vpop.eup %5036  ;;  %4329 = vst.msk [vmem:[%s6456_s17 + $0x108] sm:$0xff] %vm4295_vm2, %v5035_v35  ;;  %5054 = vpow2.f32 %v3809_v21  ;;  %v2766_v49 = vmax.f32 %v2358_v15, 0.0  ;;  %v2360_v5 = vadd.f32 %v2359_v51, %v6084_v48  ;;  %v3861_v19 = vmul.f32 1.442695, %v3694_v28 }
 0x2be   : > { %v5039_v43 = vpop.eup %5038  ;;  %v4049_v18 = vadd.f32 1.0, %v5037_v61  ;;  %5056 = vpow2.f32 %v3859_v54  ;;  %3359 = vadd.xlane.f32.xlu0 %v3358_v11  ;;  %v3541_v23 = vadd.f32 %v6402_v33, %v3180_v27  ;;  %v2365_v46 = vpop.f32.mrb[93].mxu1  ;;  %v3361_v31 = vadd.f32 %v3031_v12, %v3030_v58 }
 0x2bf   : > { %v3261_v47 = vpop.xlane.xlu1 %3260  ;;  %v5041_v29 = vpop.eup %5040  ;;  %v4050_v30 = vadd.f32 1.0, %v5039_v43  ;;  %v6543_v25 = vmul.f32 %v6094_v60, %v2766_v49  ;;  %v2767_v44 = vmax.f32 %v2360_v5, 0.0  ;;  %v3542_v56 = vadd.f32 %v6402_v33, %v3183_v3 }
 0x2c0   : > { %v2367_v34 = vpop.f32.mrb[94].mxu1  ;;  %v5043_v10 = vpop.eup %5042  ;;  %5058 = vrcp.f32 %v4049_v18  ;;  %v4075_v2 = vadd.f32 1.0, %v5041_v29  ;;  %v3669_v32 = vsub.f32 0.0, %v3541_v23  ;;  %3362 = vadd.xlane.f32.xlu1 %v3361_v31  ;;  %v3567_v39 = vadd.f32 %v6402_v33, %v3258_v42 }
 0x2c1   : > { %v2369_v17 = vpop.f32.mrb[95].mxu1  ;;  %v3186_v4 = vpop.xlane.xlu0 %3185  ;;  %4304 = vst.msk [vmem:[%s6456_s17 + $0x40] sm:$0xff] %vm4295_vm2, %v5043_v10  ;;  %5060 = vrcp.f32 %v4050_v30  ;;  %v3035_v63 = vmul.f32 %v6099_v59, %v2767_v44  ;;  %v2364_v58 = vadd.f32 %v2363_v16, %v6082_v52  ;;  %v3670_v41 = vsub.f32 0.0, %v3542_v56 }
 0x2c2   : > { %v5045_v36 = vpop.eup %5044  ;;  %5062 = vrcp.f32 %v4075_v2  ;;  %v3811_v45 = vmul.f32 1.442695, %v3669_v32  ;;  %v2366_v26 = vadd.f32 %v2365_v46, %v6084_v48  ;;  %v3695_v50 = vsub.f32 0.0, %v3567_v39 }
 0x2c3   : > { %v5047_v40 = vpop.eup %5046  ;;  %4305 = vst.msk [vmem:[%s6456_s17 + $0x48] sm:$0xff] %vm4295_vm2, %v5045_v36  ;;  %v3189_v22 = vpop.xlane.xlu1 %3188  ;;  %5064 = vpow2.f32 %v3861_v19  ;;  %v2768_v55 = vmax.f32 %v2364_v58, 0.0  ;;  %v3813_v0 = vmul.f32 1.442695, %v3670_v41  ;;  %v3568_v57 = vadd.f32 %v6402_v33, %v3261_v47 }
 0x2c4   : > { %v5049_v37 = vpop.eup %5048  ;;  %v4076_v12 = vadd.f32 1.0, %v5047_v40  ;;  %5066 = vpow2.f32 %v3811_v45  ;;  %v2769_v53 = vmax.f32 %v2366_v26, 0.0  ;;  %v3863_v20 = vmul.f32 1.442695, %v3695_v50  ;;  %v2373_v9 = vpop.f32.mrb[96].mxu1 }
 0x2c5   : > { %v5051_v62 = vpop.eup %5050  ;;  %4330 = vst.msk [vmem:[%s6456_s17 + $0x110] sm:$0xff] %vm4295_vm2, %v5049_v37  ;;  %v3264_v51 = vpop.xlane.xlu0 %3263  ;;  %v6558_v1 = vmul.f32 %v6094_v60, %v2768_v55  ;;  %v3696_v8 = vsub.f32 0.0, %v3568_v57  ;;  %v2368_v3 = vadd.f32 %v2367_v34, %v6082_v52  ;;  %v3364_v15 = vadd.f32 %v6538_v6, %v6532_v38 }
 0x2c6   : > { %v5053_v27 = vpop.eup %5052  ;;  %5068 = vrcp.f32 %v4076_v12  ;;  %v4051_v14 = vadd.f32 1.0, %v5051_v62  ;;  %v6563_v7 = vmul.f32 %v6099_v59, %v2769_v53  ;;  %v2375_v13 = vpop.f32.mrb[97].mxu1  ;;  %v2370_v35 = vadd.f32 %v2369_v17, %v6084_v48 }
 0x2c7   : > { %4331 = vst.msk [vmem:[%s6456_s17 + $0x118] sm:$0xff] %vm4295_vm2, %v5053_v27  ;;  %5070 = vpow2.f32 %v3813_v0  ;;  %v3267_v21 = vpop.xlane.xlu1 %3266  ;;  %v5055_v24 = vpop.eup %5054  ;;  %v3543_v54 = vadd.f32 %v6402_v33, %v3186_v4  ;;  %v3865_v61 = vmul.f32 1.442695, %v3696_v8  ;;  %v2770_v49 = vmax.f32 %v2368_v3, 0.0  ;;  %3365 = vadd.xlane.f32.xlu0 %v3364_v15 }
 0x2c8   : > { %5072 = vrcp.f32 %v4051_v14  ;;  %v2377_v28 = vpop.f32.mrb[98].mxu1  ;;  %v5057_v11 = vpop.eup %5056  ;;  %v4052_v42 = vadd.f32 1.0, %v5055_v24  ;;  %v2771_v18 = vmax.f32 %v2370_v35, 0.0  ;;  %v3367_v38 = vadd.f32 %v3035_v63, %v6543_v25 }
 0x2c9   : > { %5074 = vpow2.f32 %v3863_v20  ;;  %v2379_v5 = vpop.f32.mrb[99].mxu1  ;;  %v6570_v16 = vpop.xlane.xlu0 %3191  ;;  %v4077_v43 = vadd.f32 1.0, %v5057_v11  ;;  %v3671_v19 = vsub.f32 0.0, %v3543_v54  ;;  %v3038_v23 = vmul.f32 %v6094_v60, %v2770_v49 }
 0x2ca   : > { %v5059_v6 = vpop.eup %5058  ;;  %5076 = vrcp.f32 %v4052_v42  ;;  %v3544_v46 = vadd.f32 %v6402_v33, %v3189_v22  ;;  %v3569_v47 = vadd.f32 %v6402_v33, %v3264_v51  ;;  %v3039_v44 = vmul.f32 %v6099_v59, %v2771_v18  ;;  %3368 = vadd.xlane.f32.xlu1 %v3367_v38 }
 0x2cb   : > { %v3195_v29 = vpop.xlane.xlu1 %3194  ;;  %v5061_v30 = vpop.eup %5060  ;;  %4306 = vst.msk [vmem:[%s6456_s17 + $0x50] sm:$0xff] %vm4295_vm2, %v5059_v6  ;;  %5078 = vrcp.f32 %v4077_v43  ;;  %v3815_v31 = vmul.f32 1.442695, %v3671_v19  ;;  %v2374_v25 = vadd.f32 %v2373_v9, %v6082_v52  ;;  %v2376_v32 = vadd.f32 %v2375_v13, %v6084_v48 }
 0x2cc   : > { %v5063_v34 = vpop.eup %5062  ;;  %4307 = vst.msk [vmem:[%s6456_s17 + $0x58] sm:$0xff] %vm4295_vm2, %v5061_v30  ;;  %5080 = vpow2.f32 %v3865_v61  ;;  %v3672_v10 = vsub.f32 0.0, %v3544_v46  ;;  %v3697_v2 = vsub.f32 0.0, %v3569_v47  ;;  %v3570_v36 = vadd.f32 %v6402_v33, %v3267_v21  ;;  %v2383_v39 = vpop.f32.mrb[100].mxu1 }
 0x2cd   : > { %v3270_v56 = vpop.xlane.xlu0 %3269  ;;  %v5065_v17 = vpop.eup %5064  ;;  %4332 = vst.msk [vmem:[%s6456_s17 + $0x120] sm:$0xff] %vm4295_vm2, %v5063_v34  ;;  %5082 = vpow2.f32 %v3815_v31  ;;  %v2772_v4 = vmax.f32 %v2374_v25, 0.0  ;;  %v2378_v63 = vadd.f32 %v2377_v28, %v6082_v52  ;;  %v2773_v26 = vmax.f32 %v2376_v32, 0.0 }
 0x2ce   : > { %v5067_v58 = vpop.eup %5066  ;;  %v4078_v40 = vadd.f32 1.0, %v5065_v17  ;;  %v3817_v45 = vmul.f32 1.442695, %v3672_v10  ;;  %v3867_v41 = vmul.f32 1.442695, %v3697_v2  ;;  %v3698_v55 = vsub.f32 0.0, %v3570_v36 }
 0x2cf   : > { %v3273_v22 = vpop.xlane.xlu1 %3272  ;;  %v4053_v12 = vadd.f32 1.0, %v5067_v58  ;;  %v6588_v50 = vmul.f32 %v6094_v60, %v2772_v4  ;;  %v2774_v62 = vmax.f32 %v2378_v63, 0.0  ;;  %v2385_v0 = vpop.f32.mrb[101].mxu1  ;;  %v3041_v57 = vmul.f32 %v6099_v59, %v2773_v26  ;;  %v6626_v26 = vld [vmem:[#allocation2] ss:$0 sm:$0xff] }
 0x2d0   : > { %v5069_v37 = vpop.eup %5068  ;;  %5084 = vrcp.f32 %v4078_v40  ;;  %v3370_v51 = vadd.f32 %v6563_v7, %v6558_v1  ;;  %v2380_v27 = vadd.f32 %v2379_v5, %v6084_v48  ;;  %v2387_v14 = vpop.f32.mrb[102].mxu1  ;;  %v3869_v3 = vmul.f32 1.442695, %v3698_v55 }
 0x2d1   : > { %v5071_v53 = vpop.eup %5070  ;;  %4333 = vst.msk [vmem:[%s6456_s17 + $0x128] sm:$0xff] %vm4295_vm2, %v5069_v37  ;;  %v3198_v20 = vpop.xlane.xlu0 %3197  ;;  %5086 = vrcp.f32 %v4053_v12  ;;  %v6597_v13 = vmul.f32 %v6094_v60, %v2774_v62  ;;  %v3545_v1 = vadd.f32 %v6402_v33, %v6570_v16  ;;  %v3373_v7 = vadd.f32 %v3039_v44, %v3038_v23 }
 0x2d2   : > { %v5073_v9 = vpop.eup %5072  ;;  %v4054_v8 = vadd.f32 1.0, %v5071_v53  ;;  %v2389_v21 = vpop.f32.mrb[103].mxu1  ;;  %5088 = vpow2.f32 %v3817_v45  ;;  %3371 = vadd.xlane.f32.xlu0 %v3370_v51  ;;  %v2775_v15 = vmax.f32 %v2380_v27, 0.0  ;;  %v3546_v28 = vadd.f32 %v6402_v33, %v3195_v29 }
 0x2d3   : > { %v5075_v24 = vpop.eup %5074  ;;  %4308 = vst.msk [vmem:[%s6456_s17 + $0x60] sm:$0xff] %vm4295_vm2, %v5073_v9  ;;  %v3201_v35 = vpop.xlane.xlu1 %3200  ;;  %v3571_v11 = vadd.f32 %v6402_v33, %v3270_v56  ;;  %v3673_v49 = vsub.f32 0.0, %v3545_v1  ;;  %3374 = vadd.xlane.f32.xlu1 %v3373_v7  ;;  %v2384_v5 = vadd.f32 %v2383_v39, %v6082_v52  ;;  %v2386_v38 = vadd.f32 %v2385_v0, %v6084_v48 }
 0x2d4   : > { %5090 = vrcp.f32 %v4054_v8  ;;  %v4079_v54 = vadd.f32 1.0, %v5075_v24  ;;  %v5077_v42 = vpop.eup %5076  ;;  %v3043_v61 = vmul.f32 %v6099_v59, %v2775_v15  ;;  %v3674_v16 = vsub.f32 0.0, %v3546_v28  ;;  %v2393_v6 = vpop.f32.mrb[104].mxu1 }
 0x2d5   : > { %5092 = vpow2.f32 %v3867_v41  ;;  %v3276_v43 = vpop.xlane.xlu0 %3275  ;;  %v5079_v18 = vpop.eup %5078  ;;  %4309 = vst.msk [vmem:[%s6456_s17 + $0x68] sm:$0xff] %vm4295_vm2, %v5077_v42  ;;  %v3699_v19 = vsub.f32 0.0, %v3571_v11  ;;  %v3819_v46 = vmul.f32 1.442695, %v3673_v49  ;;  %v2776_v47 = vmax.f32 %v2384_v5, 0.0 }
 0x2d6   : > { %5094 = vrcp.f32 %v4079_v54  ;;  %v5081_v23 = vpop.eup %5080  ;;  %4334 = vst.msk [vmem:[%s6456_s17 + $0x130] sm:$0xff] %vm4295_vm2, %v5079_v18  ;;  %v3572_v29 = vadd.f32 %v6402_v33, %v3273_v22  ;;  %v2395_v30 = vpop.f32.mrb[105].mxu1  ;;  %v3821_v34 = vmul.f32 1.442695, %v3674_v16  ;;  %v2777_v2 = vmax.f32 %v2386_v38, 0.0 }
 0x2d7   : > { %5096 = vpow2.f32 %v3869_v3  ;;  %v6613_v44 = vpop.xlane.xlu1 %3278  ;;  %v5083_v31 = vpop.eup %5082  ;;  %v4080_v25 = vadd.f32 1.0, %v5081_v23  ;;  %v3871_v10 = vmul.f32 1.442695, %v3699_v19  ;;  %v6616_v56 = vmul.f32 %v6094_v60, %v2776_v47 }
 0x2d8   : > { %v4055_v32 = vadd.f32 1.0, %v5083_v31  ;;  %5098 = vpow2.f32 %v3819_v46  ;;  %v3700_v17 = vsub.f32 0.0, %v3572_v29  ;;  %v2397_v4 = vpop.f32.mrb[106].mxu1  ;;  %v3045_v33 = vmul.f32 %v6099_v59, %v2777_v2 }
 0x2d9   : > { %v6618_v36 = vpop.xlane.xlu0 %3203  ;;  %5100 = vrcp.f32 %v4080_v25  ;;  %v2388_v63 = vadd.f32 %v2387_v14, %v6082_v52  ;;  %v3376_v39 = vadd.f32 %v3041_v57, %v6588_v50  ;;  %v6623_v58 = vpop.f32.mrb[107].mxu1  ;;  %v2390_v41 = vadd.f32 %v2389_v21, %v6084_v48 }
 0x2da   : > { %v5085_v40 = vpop.eup %5084  ;;  %5102 = vrcp.f32 %v4055_v32  ;;  %v3873_v45 = vmul.f32 1.442695, %v3700_v17  ;;  %v3547_v22 = vadd.f32 %v6626_v26, %v3198_v20  ;;  %v3379_v50 = vadd.f32 %v3043_v61, %v6597_v13 }
 0x2db   : > { %v6629_v37 = vpop.xlane.xlu1 %3206  ;;  %v5087_v12 = vpop.eup %5086  ;;  %4335 = vst.msk [vmem:[%s6456_s17 + $0x138] sm:$0xff] %vm4295_vm2, %v5085_v40  ;;  %5104 = vpow2.f32 %v3821_v34  ;;  %v2778_v55 = vmax.f32 %v2388_v63, 0.0  ;;  %3377 = vadd.xlane.f32.xlu0 %v3376_v39  ;;  %v3548_v62 = vadd.f32 %v6626_v26, %v3201_v35  ;;  %v2779_v53 = vmax.f32 %v2390_v41, 0.0 }
 0x2dc   : > { %v5089_v0 = vpop.eup %5088  ;;  %4310 = vst.msk [vmem:[%s6456_s17 + $0x70] sm:$0xff] %vm4295_vm2, %v5087_v12  ;;  %5106 = vpow2.f32 %v3871_v10  ;;  %v3675_v57 = vsub.f32 0.0, %v3547_v22  ;;  %v3573_v51 = vadd.f32 %v6626_v26, %v3276_v43  ;;  %3380 = vadd.xlane.f32.xlu1 %v3379_v50  ;;  %v6641_v3 = vpop.f32.mrb[108].mxu1  ;;  %v2394_v1 = vadd.f32 %v2393_v6, %v6082_v52 }
 0x2dd   : > { %v6638_v27 = vpop.xlane.xlu0 %3281  ;;  %v4056_v20 = vadd.f32 1.0, %v5089_v0  ;;  %5108 = vpow2.f32 %v3873_v45  ;;  %v3046_v9 = vmul.f32 %v6094_v60, %v2778_v55  ;;  %v3676_v8 = vsub.f32 0.0, %v3548_v62  ;;  %v6647_v7 = vpop.f32.mrb[109].mxu1 }
 0x2de   : > { %v5091_v14 = vpop.eup %5090  ;;  %v3047_v21 = vmul.f32 %v6099_v59, %v2779_v53  ;;  %v3823_v24 = vmul.f32 1.442695, %v3675_v57  ;;  %v3701_v15 = vsub.f32 0.0, %v3573_v51  ;;  %v2396_v42 = vadd.f32 %v2395_v30, %v6084_v48  ;;  %v6652_v61 = vpop.f32.mrb[110].mxu1 }
 0x2df   : > { %v5093_v13 = vpop.eup %5092  ;;  %4311 = vst.msk [vmem:[%s6456_s17 + $0x78] sm:$0xff] %vm4295_vm2, %v5091_v14  ;;  %v6649_v35 = vpop.xlane.xlu1 %3284  ;;  %5110 = vrcp.f32 %v4056_v20  ;;  %v3825_v11 = vmul.f32 1.442695, %v3676_v8  ;;  %v2780_v43 = vmax.f32 %v2394_v1, 0.0  ;;  %v3574_v18 = vadd.f32 %v6626_v26, %v6613_v44 }
 0x2e0   : > { %v5095_v54 = vpop.eup %5094  ;;  %v4081_v28 = vadd.f32 1.0, %v5093_v13  ;;  %5112 = vpow2.f32 %v3823_v24  ;;  %v3875_v5 = vmul.f32 1.442695, %v3701_v15  ;;  %v6658_v16 = vpop.f32.mrb[111].mxu1  ;;  %v2781_v6 = vmax.f32 %v2396_v42, 0.0 }
 0x2e1   : > { %v5097_v49 = vpop.eup %5096  ;;  %4336 = vst.msk [vmem:[%s6456_s17 + $0x140] sm:$0xff] %vm4295_vm2, %v5095_v54  ;;  %v6660_v19 = vpop.xlane.xlu0 %3209  ;;  %v2398_v23 = vadd.f32 %v2397_v4, %v6082_v52  ;;  %v6664_v47 = vmul.f32 %v6094_v60, %v2780_v43  ;;  %v3702_v29 = vsub.f32 0.0, %v3574_v18  ;;  %v3382_v30 = vadd.f32 %v3045_v33, %v6616_v56 }
 0x2e2   : > { %5114 = vrcp.f32 %v4081_v28  ;;  %v4082_v38 = vadd.f32 1.0, %v5097_v49  ;;  %v5099_v46 = vpop.eup %5098  ;;  %v3049_v34 = vmul.f32 %v6099_v59, %v2781_v6  ;;  %v2400_v17 = vadd.f32 %v6623_v58, %v6084_v48 }
 0x2e3   : > { %5116 = vpow2.f32 %v3825_v11  ;;  %v6667_v44 = vpop.xlane.xlu1 %3212  ;;  %v5101_v31 = vpop.eup %5100  ;;  %v4057_v25 = vadd.f32 1.0, %v5099_v46  ;;  %v2782_v10 = vmax.f32 %v2398_v23, 0.0  ;;  %v3877_v32 = vmul.f32 1.442695, %v3702_v29  ;;  %3383 = vadd.xlane.f32.xlu0 %v3382_v30 }
 0x2e4   : > { %5118 = vrcp.f32 %v4082_v38  ;;  %v5103_v2 = vpop.eup %5102  ;;  %4337 = vst.msk [vmem:[%s6456_s17 + $0x148] sm:$0xff] %vm4295_vm2, %v5101_v31  ;;  %v3549_v56 = vadd.f32 %v6626_v26, %v6618_v36  ;;  %v3385_v63 = vadd.f32 %v3047_v21, %v3046_v9  ;;  %v3550_v39 = vadd.f32 %v6626_v26, %v6629_v37  ;;  %v6683_v40 = vpop.f32.mrb[112].mxu1 }
 0x2e5   : > { %5120 = vpow2.f32 %v3875_v5  ;;  %v5105_v4 = vpop.eup %5104  ;;  %4312 = vst.msk [vmem:[%s6456_s17 + $0x80] sm:$0xff] %vm4295_vm2, %v5103_v2  ;;  %v6679_v33 = vmul.f32 %v6094_v60, %v2782_v10  ;;  %v2783_v58 = vmax.f32 %v2400_v17, 0.0  ;;  %v6685_v12 = vpop.xlane.xlu0 %3287  ;;  %v3575_v0 = vadd.f32 %v6626_v26, %v6638_v27 }
 0x2e6   : > { %5122 = vrcp.f32 %v4057_v25  ;;  %v5107_v45 = vpop.eup %5106  ;;  %v4058_v41 = vadd.f32 1.0, %v5105_v4  ;;  %v3677_v22 = vsub.f32 0.0, %v3549_v56  ;;  %v6687_v36 = vpop.f32.mrb[113].mxu1  ;;  %3386 = vadd.xlane.f32.xlu1 %v3385_v63  ;;  %v3678_v62 = vsub.f32 0.0, %v3550_v39 }
 0x2e7   : > { %5124 = vpow2.f32 %v3877_v32  ;;  %v5109_v55 = vpop.eup %5108  ;;  %v4083_v50 = vadd.f32 1.0, %v5107_v45  ;;  %v2404_v37 = vadd.f32 %v6641_v3, %v6082_v52  ;;  %v6693_v53 = vpop.f32.mrb[114].mxu1  ;;  %v3051_v51 = vmul.f32 %v6099_v59, %v2783_v58 }
 0x2e8   : > { %5126 = vrcp.f32 %v4058_v41  ;;  %v4084_v57 = vadd.f32 1.0, %v5109_v55  ;;  %v3827_v14 = vmul.f32 1.442695, %v3677_v22  ;;  %v6696_v20 = vpop.xlane.xlu1 %3290  ;;  %v6698_v9 = vpop.f32.mrb[115].mxu1  ;;  %v3829_v13 = vmul.f32 1.442695, %v3678_v62 }
 0x2e9   : > { %v5111_v8 = vpop.eup %5110  ;;  %5128 = vrcp.f32 %v4083_v50  ;;  %v3703_v21 = vsub.f32 0.0, %v3575_v0  ;;  %v2784_v27 = vmax.f32 %v2404_v37, 0.0  ;;  %v2406_v3 = vadd.f32 %v6647_v7, %v6084_v48  ;;  %v6713_v18 = vpop.xlane.xlu0 %3215 }
 0x2ea   : > { %v5113_v24 = vpop.eup %5112  ;;  %4313 = vst.msk [vmem:[%s6456_s17 + $0x88] sm:$0xff] %vm4295_vm2, %v5111_v8  ;;  %5130 = vrcp.f32 %v4084_v57  ;;  %v3576_v15 = vadd.f32 %v6626_v26, %v6649_v35  ;;  %v2408_v1 = vadd.f32 %v6652_v61, %v6082_v52  ;;  %v3388_v38 = vadd.f32 %v3049_v34, %v6664_v47 }
 0x2eb   : > { %v4059_v28 = vadd.f32 1.0, %v5113_v24  ;;  %5132 = vpow2.f32 %v3827_v14  ;;  %v3879_v11 = vmul.f32 1.442695, %v3703_v21  ;;  %v6709_v42 = vmul.f32 %v6094_v60, %v2784_v27 }
 0x2ec   : > { %v5115_v54 = vpop.eup %5114  ;;  %5134 = vpow2.f32 %v3829_v13  ;;  %v2785_v5 = vmax.f32 %v2406_v3, 0.0  ;;  %v3704_v7 = vsub.f32 0.0, %v3576_v15  ;;  %v2786_v43 = vmax.f32 %v2408_v1, 0.0  ;;  %v6718_v23 = vpop.f32.mrb[116].mxu1  ;;  %3389 = vadd.xlane.f32.xlu0 %v3388_v38 }
 0x2ed   : > { %v5117_v49 = vpop.eup %5116  ;;  %4338 = vst.msk [vmem:[%s6456_s17 + $0x150] sm:$0xff] %vm4295_vm2, %v5115_v54  ;;  %5136 = vrcp.f32 %v4059_v28  ;;  %v2410_v6 = vadd.f32 %v6658_v16, %v6084_v48  ;;  %v6726_v25 = vpop.xlane.xlu1 %3218  ;;  %v3551_v2 = vadd.f32 %v6626_v26, %v6660_v19  ;;  %v3391_v56 = vadd.f32 %v3051_v51, %v6679_v33 }
 0x2ee   : > { %v5119_v35 = vpop.eup %5118  ;;  %v4060_v61 = vadd.f32 1.0, %v5117_v49  ;;  %5138 = vpow2.f32 %v3879_v11  ;;  %v3053_v29 = vmul.f32 %v6099_v59, %v2785_v5  ;;  %v3881_v30 = vmul.f32 1.442695, %v3704_v7  ;;  %v6728_v10 = vpop.f32.mrb[117].mxu1 }
 0x2ef   : > { %v5121_v46 = vpop.eup %5120  ;;  %4339 = vst.msk [vmem:[%s6456_s17 + $0x158] sm:$0xff] %vm4295_vm2, %v5119_v35  ;;  %v6724_v31 = vmul.f32 %v6094_v60, %v2786_v43  ;;  %v2787_v34 = vmax.f32 %v2410_v6, 0.0  ;;  %v6732_v32 = vpop.f32.mrb[118].mxu1  ;;  %v3552_v4 = vadd.f32 %v6626_v26, %v6667_v44  ;;  %v3577_v63 = vadd.f32 %v6626_v26, %v6685_v12  ;;  %3392 = vadd.xlane.f32.xlu1 %v3391_v56 }
 0x2f0   : > { %v5123_v47 = vpop.eup %5122  ;;  %5140 = vrcp.f32 %v4060_v61  ;;  %v4085_v16 = vadd.f32 1.0, %v5121_v46  ;;  %v6741_v39 = vpop.f32.mrb[119].mxu1  ;;  %v3679_v41 = vsub.f32 0.0, %v3551_v2  ;;  %v2414_v33 = vadd.f32 %v6683_v40, %v6082_v52 }
 0x2f1   : > { %v5125_v17 = vpop.eup %5124  ;;  %4314 = vst.msk [vmem:[%s6456_s17 + $0x90] sm:$0xff] %vm4295_vm2, %v5123_v47  ;;  %5142 = vpow2.f32 %v3881_v30  ;;  %v3055_v19 = vmul.f32 %v6099_v59, %v2787_v34  ;;  %v3680_v22 = vsub.f32 0.0, %v3552_v4  ;;  %v3705_v55 = vsub.f32 0.0, %v3577_v63  ;;  %v3294_v12 = vpop.xlane.xlu0 %3293 }
 0x2f2   : > { %5144 = vrcp.f32 %v4085_v16  ;;  %v4086_v45 = vadd.f32 1.0, %v5125_v17  ;;  %v5127_v58 = vpop.eup %5126  ;;  %v2416_v44 = vadd.f32 %v6687_v36, %v6084_v48  ;;  %v3831_v62 = vmul.f32 1.442695, %v3679_v41  ;;  %v3297_v8 = vpop.xlane.xlu1 %3296 }
 0x2f3   : > { %v5129_v50 = vpop.eup %5128  ;;  %4315 = vst.msk [vmem:[%s6456_s17 + $0x98] sm:$0xff] %vm4295_vm2, %v5127_v58  ;;  %v3578_v0 = vadd.f32 %v6626_v26, %v6696_v20  ;;  %v2418_v37 = vadd.f32 %v6693_v53, %v6082_v52  ;;  %v3833_v40 = vmul.f32 1.442695, %v3680_v22  ;;  %v3883_v51 = vmul.f32 1.442695, %v3705_v55 }
 0x2f4   : > { %5146 = vrcp.f32 %v4086_v45  ;;  %v5131_v57 = vpop.eup %5130  ;;  %4340 = vst.msk [vmem:[%s6456_s17 + $0x160] sm:$0xff] %vm4295_vm2, %v5129_v50  ;;  %v2788_v14 = vmax.f32 %v2414_v33, 0.0  ;;  %v2789_v36 = vmax.f32 %v2416_v44, 0.0  ;;  %v3394_v24 = vadd.f32 %v3053_v29, %v6709_v42  ;;  %v6759_v20 = vpop.f32.mrb[120].mxu1 }
 0x2f5   : > { %v5133_v13 = vpop.eup %5132  ;;  %4341 = vst.msk [vmem:[%s6456_s17 + $0x168] sm:$0xff] %vm4295_vm2, %v5131_v57  ;;  %5148 = vpow2.f32 %v3831_v62  ;;  %v3706_v21 = vsub.f32 0.0, %v3578_v0  ;;  %v2790_v27 = vmax.f32 %v2418_v37, 0.0  ;;  %v6763_v54 = vpop.f32.mrb[121].mxu1  ;;  %v2420_v43 = vadd.f32 %v6698_v9, %v6084_v48 }
 0x2f6   : > { %v5135_v53 = vpop.eup %5134  ;;  %v4061_v3 = vadd.f32 1.0, %v5133_v13  ;;  %5150 = vpow2.f32 %v3833_v40  ;;  %v3056_v15 = vmul.f32 %v6094_v60, %v2788_v14  ;;  %v3057_v1 = vmul.f32 %v6099_v59, %v2789_v36  ;;  %3395 = vadd.xlane.f32.xlu0 %v3394_v24  ;;  %v6768_v42 = vpop.f32.mrb[122].mxu1 }
 0x2f7   : > { %v5137_v28 = vpop.eup %5136  ;;  %v4062_v11 = vadd.f32 1.0, %v5135_v53  ;;  %5152 = vpow2.f32 %v3883_v51  ;;  %v3885_v49 = vmul.f32 1.442695, %v3706_v21  ;;  %v6766_v5 = vmul.f32 %v6094_v60, %v2790_v27  ;;  %v3222_v38 = vpop.xlane.xlu0 %3221 }
 0x2f8   : > { %v5139_v7 = vpop.eup %5138  ;;  %4316 = vst.msk [vmem:[%s6456_s17 + $0xa0] sm:$0xff] %vm4295_vm2, %v5137_v28  ;;  %5154 = vrcp.f32 %v4061_v3  ;;  %v3553_v35 = vadd.f32 %v6626_v26, %v6713_v18  ;;  %v3397_v61 = vadd.f32 %v3055_v19, %v6724_v31  ;;  %v6777_v6 = vpop.f32.mrb[123].mxu1  ;;  %v3554_v30 = vadd.f32 %v6626_v26, %v6726_v25 }
 0x2f9   : > { %5156 = vrcp.f32 %v4062_v11  ;;  %v4087_v29 = vadd.f32 1.0, %v5139_v7  ;;  %v3579_v47 = vadd.f32 %v6626_v26, %v3294_v12  ;;  %v2791_v9 = vmax.f32 %v2420_v43, 0.0  ;;  %v3225_v34 = vpop.xlane.xlu1 %3224 }
 0x2fa   : > { %v5141_v46 = vpop.eup %5140  ;;  %5158 = vpow2.f32 %v3885_v49  ;;  %v3681_v18 = vsub.f32 0.0, %v3553_v35  ;;  %3398 = vadd.xlane.f32.xlu1 %v3397_v61  ;;  %v2424_v31 = vadd.f32 %v6718_v23, %v6082_v52  ;;  %v3682_v56 = vsub.f32 0.0, %v3554_v30 }
 0x2fb   : > { %v5143_v16 = vpop.eup %5142  ;;  %4317 = vst.msk [vmem:[%s6456_s17 + $0xa8] sm:$0xff] %vm4295_vm2, %v5141_v46  ;;  %5160 = vrcp.f32 %v4087_v29  ;;  %v3707_v4 = vsub.f32 0.0, %v3579_v47  ;;  %v3059_v25 = vmul.f32 %v6099_v59, %v2791_v9  ;;  %v2426_v19 = vadd.f32 %v6728_v10, %v6084_v48  ;;  %v3300_v50 = vpop.xlane.xlu0 %3299 }
 0x2fc   : > { %v5145_v2 = vpop.eup %5144  ;;  %v4088_v17 = vadd.f32 1.0, %v5143_v16  ;;  %v3835_v63 = vmul.f32 1.442695, %v3681_v18  ;;  %v2792_v45 = vmax.f32 %v2424_v31, 0.0  ;;  %v3837_v58 = vmul.f32 1.442695, %v3682_v56 }
 0x2fd   : > { %4342 = vst.msk [vmem:[%s6456_s17 + $0x170] sm:$0xff] %vm4295_vm2, %v5145_v2  ;;  %v3887_v23 = vmul.f32 1.442695, %v3707_v4  ;;  %v3580_v22 = vadd.f32 %v6626_v26, %v3297_v8  ;;  %v6792_v55 = vpop.f32.mrb[124].mxu1  ;;  %v2793_v44 = vmax.f32 %v2426_v19, 0.0  ;;  %v2428_v12 = vadd.f32 %v6732_v32, %v6082_v52  ;;  %v3303_v32 = vpop.xlane.xlu1 %3302 }
 0x2fe   : > { %v5147_v41 = vpop.eup %5146  ;;  %5162 = vrcp.f32 %v4088_v17  ;;  %v3060_v33 = vmul.f32 %v6094_v60, %v2792_v45  ;;  %v6799_v62 = vpop.f32.mrb[125].mxu1  ;;  %v3400_v37 = vadd.f32 %v3057_v1, %v3056_v15  ;;  %v2430_v57 = vadd.f32 %v6741_v39, %v6084_v48 }
 0x2ff   : > { %4343 = vst.msk [vmem:[%s6456_s17 + $0x178] sm:$0xff] %vm4295_vm2, %v5147_v41  ;;  %5164 = vpow2.f32 %v3835_v63  ;;  %v5149_v10 = vpop.eup %5148  ;;  %v3708_v0 = vsub.f32 0.0, %v3580_v22  ;;  %v6803_v40 = vpop.f32.mrb[126].mxu1  ;;  %v3061_v36 = vmul.f32 %v6099_v59, %v2793_v44  ;;  %v2794_v8 = vmax.f32 %v2428_v12, 0.0 }
 0x300   : > { %5166 = vpow2.f32 %v3837_v58  ;;  %v5151_v51 = vpop.eup %5150  ;;  %v4063_v14 = vadd.f32 1.0, %v5149_v10  ;;  %v6806_v13 = vpop.f32.mrb[127].mxu1  ;;  %3401 = vadd.xlane.f32.xlu0 %v3400_v37  ;;  %v2795_v53 = vmax.f32 %v2430_v57, 0.0  ;;  %v3555_v39 = vadd.f32 %v6626_v26, %v3222_v38 }
 0x301   : > { %5168 = vpow2.f32 %v3887_v23  ;;  %v5153_v21 = vpop.eup %5152  ;;  %v4064_v27 = vadd.f32 1.0, %v5151_v51  ;;  %v3889_v24 = vmul.f32 1.442695, %v3708_v0  ;;  %v3062_v1 = vmul.f32 %v6094_v60, %v2794_v8  ;;  %v3228_v46 = vpop.xlane.xlu0 %3227 }
 0x302   : > { %v5155_v3 = vpop.eup %5154  ;;  %5170 = vrcp.f32 %v4063_v14  ;;  %v4089_v15 = vadd.f32 1.0, %v5153_v21  ;;  %v3403_v28 = vadd.f32 %v3059_v25, %v6766_v5  ;;  %v3063_v49 = vmul.f32 %v6099_v59, %v2795_v53 }
 0x303   : > { %v5157_v11 = vpop.eup %5156  ;;  %4318 = vst.msk [vmem:[%s6456_s17 + $0xb0] sm:$0xff] %vm4295_vm2, %v5155_v3  ;;  %5172 = vrcp.f32 %v4064_v27  ;;  %v3683_v7 = vsub.f32 0.0, %v3555_v39  ;;  %v3556_v43 = vadd.f32 %v6626_v26, %v3225_v34  ;;  %v3581_v61 = vadd.f32 %v6626_v26, %v3300_v50 }
 0x304   : > { %v5159_v35 = vpop.eup %5158  ;;  %4319 = vst.msk [vmem:[%s6456_s17 + $0xb8] sm:$0xff] %vm4295_vm2, %v5157_v11  ;;  %5174 = vrcp.f32 %v4089_v15  ;;  %3404 = vadd.xlane.f32.xlu1 %v3403_v28  ;;  %v2434_v5 = vadd.f32 %v6759_v20, %v6082_v52  ;;  %v2436_v38 = vadd.f32 %v6763_v54, %v6084_v48  ;;  %v6822_v9 = vpop.f32.mrb[128].mxu1  ;;  %v3582_v2 = vadd.f32 %v6626_v26, %v3303_v32 }
 0x305   : > { %v5161_v29 = vpop.eup %5160  ;;  %v4090_v30 = vadd.f32 1.0, %v5159_v35  ;;  %5176 = vpow2.f32 %v3889_v24  ;;  %v3839_v47 = vmul.f32 1.442695, %v3683_v7  ;;  %v3684_v16 = vsub.f32 0.0, %v3556_v43  ;;  %v3231_v20 = vpop.xlane.xlu1 %3230 }
 0x306   : > { %4344 = vst.msk [vmem:[%s6456_s17 + $0x180] sm:$0xff] %vm4295_vm2, %v5161_v29  ;;  %v3709_v18 = vsub.f32 0.0, %v3581_v61  ;;  %v2796_v31 = vmax.f32 %v2434_v5, 0.0  ;;  %v2797_v34 = vmax.f32 %v2436_v38, 0.0  ;;  %v6827_v17 = vpop.f32.mrb[129].mxu1  ;;  %v2438_v4 = vadd.f32 %v6768_v42, %v6082_v52  ;;  %v3306_v37 = vpop.xlane.xlu0 %3305 }
 0x307   : > { %5178 = vrcp.f32 %v4090_v30  ;;  %v3841_v56 = vmul.f32 1.442695, %v3684_v16  ;;  %v3406_v25 = vadd.f32 %v3061_v36, %v3060_v33  ;;  %v6831_v63 = vpop.f32.mrb[130].mxu1  ;;  %v3710_v12 = vsub.f32 0.0, %v3582_v2 }
 0x308   : > { %v5163_v54 = vpop.eup %5162  ;;  %5180 = vpow2.f32 %v3839_v47  ;;  %v3891_v19 = vmul.f32 1.442695, %v3709_v18  ;;  %v3064_v41 = vmul.f32 %v6094_v60, %v2796_v31  ;;  %v3065_v58 = vmul.f32 %v6099_v59, %v2797_v34  ;;  %v6837_v23 = vpop.f32.mrb[131].mxu1 }
 0x309   : > { %v5165_v45 = vpop.eup %5164  ;;  %4345 = vst.msk [vmem:[%s6456_s17 + $0x188] sm:$0xff] %vm4295_vm2, %v5163_v54  ;;  %5182 = vpow2.f32 %v3841_v56  ;;  %v2798_v50 = vmax.f32 %v2438_v4, 0.0  ;;  %3407 = vadd.xlane.f32.xlu0 %v3406_v25  ;;  %v2440_v10 = vadd.f32 %v6777_v6, %v6084_v48  ;;  %v3557_v0 = vadd.f32 %v6626_v26, %v3228_v46  ;;  %v3309_v27 = vpop.xlane.xlu1 %3308 }
 0x30a   : > { %v5167_v22 = vpop.eup %5166  ;;  %v4065_v44 = vadd.f32 1.0, %v5165_v45  ;;  %5184 = vpow2.f32 %v3891_v19  ;;  %v3893_v51 = vmul.f32 1.442695, %v3710_v12  ;;  %v3409_v21 = vadd.f32 %v3063_v49, %v3062_v1  ;;  %v3312_v56 = vpop.xlane.xlu0 %3311 }
 0x30b   : > { %v5169_v42 = vpop.eup %5168  ;;  %v4066_v33 = vadd.f32 1.0, %v5167_v22  ;;  %v3066_v14 = vmul.f32 %v6094_v60, %v2798_v50  ;;  %v2799_v8 = vmax.f32 %v2440_v10, 0.0  ;;  %v3685_v32 = vsub.f32 0.0, %v3557_v0 }
 0x30c   : > { %5186 = vrcp.f32 %v4065_v44  ;;  %v4091_v57 = vadd.f32 1.0, %v5169_v42  ;;  %v5171_v36 = vpop.eup %5170  ;;  %v3558_v6 = vadd.f32 %v6626_v26, %v3231_v20  ;;  %v3583_v53 = vadd.f32 %v6626_v26, %v3306_v37  ;;  %v6849_v3 = vpop.f32.mrb[132].mxu1  ;;  %3410 = vadd.xlane.f32.xlu1 %v3409_v21 }
 0x30d   : > { %5188 = vrcp.f32 %v4066_v33  ;;  %v5173_v24 = vpop.eup %5172  ;;  %4320 = vst.msk [vmem:[%s6456_s17 + $0xc0] sm:$0xff] %vm4295_vm2, %v5171_v36  ;;  %v2444_v39 = vadd.f32 %v6792_v55, %v6082_v52  ;;  %v3067_v1 = vmul.f32 %v6099_v59, %v2799_v8  ;;  %v3843_v28 = vmul.f32 1.442695, %v3685_v32  ;;  %v6856_v49 = vpop.f32.mrb[133].mxu1 }
 0x30e   : > { %5190 = vrcp.f32 %v4091_v57  ;;  %v5175_v15 = vpop.eup %5174  ;;  %4321 = vst.msk [vmem:[%s6456_s17 + $0xc8] sm:$0xff] %vm4295_vm2, %v5173_v24  ;;  %v2446_v11 = vadd.f32 %v6799_v62, %v6084_v48  ;;  %v3686_v43 = vsub.f32 0.0, %v3558_v6  ;;  %v3711_v55 = vsub.f32 0.0, %v3583_v53  ;;  %v6861_v5 = vpop.f32.mrb[134].mxu1 }
 0x30f   : > { %5192 = vpow2.f32 %v3893_v51  ;;  %v5177_v7 = vpop.eup %5176  ;;  %4346 = vst.msk [vmem:[%s6456_s17 + $0x190] sm:$0xff] %vm4295_vm2, %v5175_v15  ;;  %v2800_v35 = vmax.f32 %v2444_v39, 0.0  ;;  %v3584_v61 = vadd.f32 %v6626_v26, %v3309_v27  ;;  %v2448_v29 = vadd.f32 %v6803_v40, %v6082_v52  ;;  %v6865_v62 = vpop.f32.mrb[135].mxu1 }
 0x310   : > { %v4092_v38 = vadd.f32 1.0, %v5177_v7  ;;  %5194 = vpow2.f32 %v3843_v28  ;;  %v2801_v46 = vmax.f32 %v2446_v11, 0.0  ;;  %v3845_v47 = vmul.f32 1.442695, %v3686_v43  ;;  %v3315_v19 = vpop.xlane.xlu1 %3314  ;;  %v3318_v28 = vpop.xlane.xlu0 %3317 }
 0x311   : > { %v5179_v30 = vpop.eup %5178  ;;  %v3895_v16 = vmul.f32 1.442695, %v3711_v55  ;;  %v3068_v18 = vmul.f32 %v6094_v60, %v2800_v35  ;;  %v3712_v31 = vsub.f32 0.0, %v3584_v61  ;;  %v2802_v20 = vmax.f32 %v2448_v29, 0.0 }
 0x312   : > { %v5181_v34 = vpop.eup %5180  ;;  %4347 = vst.msk [vmem:[%s6456_s17 + $0x198] sm:$0xff] %vm4295_vm2, %v5179_v30  ;;  %5196 = vrcp.f32 %v4092_v38  ;;  %v3069_v2 = vmul.f32 %v6099_v59, %v2801_v46  ;;  %v3412_v54 = vadd.f32 %v3065_v58, %v3064_v41  ;;  %v2450_v45 = vadd.f32 %v6806_v13, %v6084_v48 }
 0x313   : > { %v5183_v4 = vpop.eup %5182  ;;  %v4067_v25 = vadd.f32 1.0, %v5181_v34  ;;  %5198 = vpow2.f32 %v3845_v47  ;;  %v3897_v40 = vmul.f32 1.442695, %v3712_v31  ;;  %v3070_v12 = vmul.f32 %v6094_v60, %v2802_v20 }
 0x314   : > { %v5185_v22 = vpop.eup %5184  ;;  %v4068_v44 = vadd.f32 1.0, %v5183_v4  ;;  %5200 = vpow2.f32 %v3895_v16  ;;  %3413 = vadd.xlane.f32.xlu0 %v3412_v54  ;;  %v3415_v50 = vadd.f32 %v3067_v1, %v3066_v14  ;;  %v2803_v58 = vmax.f32 %v2450_v45, 0.0  ;;  %v6875_v10 = vpop.f32.mrb[136].mxu1 }
 0x315   : > { %5202 = vrcp.f32 %v4067_v25  ;;  %v4093_v41 = vadd.f32 1.0, %v5185_v22  ;;  %v3585_v33 = vadd.f32 %v6626_v26, %v3312_v56  ;;  %v2454_v13 = vadd.f32 %v6822_v9, %v6082_v52  ;;  %v6884_v51 = vpop.f32.mrb[137].mxu1  ;;  %v3321_v35 = vpop.xlane.xlu1 %3320 }
 0x316   : > { %v5187_v42 = vpop.eup %5186  ;;  %5204 = vrcp.f32 %v4068_v44  ;;  %3416 = vadd.xlane.f32.xlu1 %v3415_v50  ;;  %v2456_v37 = vadd.f32 %v6827_v17, %v6084_v48  ;;  %v3586_v57 = vadd.f32 %v6626_v26, %v3315_v19  ;;  %v3071_v36 = vmul.f32 %v6099_v59, %v2803_v58  ;;  %v6891_v21 = vpop.f32.mrb[138].mxu1 }
 0x317   : > { %v5189_v0 = vpop.eup %5188  ;;  %4322 = vst.msk [vmem:[%s6456_s17 + $0xd0] sm:$0xff] %vm4295_vm2, %v5187_v42  ;;  %5206 = vrcp.f32 %v4093_v41  ;;  %v3713_v8 = vsub.f32 0.0, %v3585_v33  ;;  %v2458_v32 = vadd.f32 %v6831_v63, %v6082_v52  ;;  %v2804_v17 = vmax.f32 %v2454_v13, 0.0  ;;  %v6895_v6 = vpop.f32.mrb[139].mxu1 }
 0x318   : > { %v5191_v14 = vpop.eup %5190  ;;  %4323 = vst.msk [vmem:[%s6456_s17 + $0xd8] sm:$0xff] %vm4295_vm2, %v5189_v0  ;;  %5208 = vpow2.f32 %v3897_v40  ;;  %v2805_v27 = vmax.f32 %v2456_v37, 0.0  ;;  %v3714_v24 = vsub.f32 0.0, %v3586_v57  ;;  %v3418_v1 = vadd.f32 %v3069_v2, %v3068_v18  ;;  %v3324_v42 = vpop.xlane.xlu0 %3323 }
 0x319   : > { %v5193_v9 = vpop.eup %5192  ;;  %4348 = vst.msk [vmem:[%s6456_s17 + $0x1a0] sm:$0xff] %vm4295_vm2, %v5191_v14  ;;  %v3899_v39 = vmul.f32 1.442695, %v3713_v8  ;;  %v2806_v15 = vmax.f32 %v2458_v32, 0.0  ;;  %v3072_v7 = vmul.f32 %v6094_v60, %v2804_v17  ;;  %v2460_v55 = vadd.f32 %v6837_v23, %v6084_v48  ;;  %v3327_v37 = vpop.xlane.xlu1 %3326 }
 0x31a   : > { %v4094_v53 = vadd.f32 1.0, %v5193_v9  ;;  %v5195_v11 = vpop.eup %5194  ;;  %v3073_v63 = vmul.f32 %v6099_v59, %v2805_v27  ;;  %v3901_v43 = vmul.f32 1.442695, %v3714_v24  ;;  %3419 = vadd.xlane.f32.xlu0 %v3418_v1  ;;  %v3421_v46 = vadd.f32 %v3071_v36, %v3070_v12 }
 0x31b   : > { %v4069_v61 = vadd.f32 1.0, %v5195_v11  ;;  %v3074_v38 = vmul.f32 %v6094_v60, %v2806_v15  ;;  %v2807_v30 = vmax.f32 %v2460_v55, 0.0  ;;  %v3587_v47 = vadd.f32 %v6626_v26, %v3318_v28 }
 0x31c   : > { %5210 = vrcp.f32 %v4094_v53  ;;  %v5197_v29 = vpop.eup %5196  ;;  %v2464_v16 = vadd.f32 %v6849_v3, %v6082_v52  ;;  %3422 = vadd.xlane.f32.xlu1 %v3421_v46  ;;  %v2466_v23 = vadd.f32 %v6856_v49, %v6084_v48  ;;  %v3588_v31 = vadd.f32 %v6626_v26, %v3321_v35  ;;  %v6912_v2 = vpop.f32.mrb[140].mxu1 }
 0x31d   : > { %5212 = vpow2.f32 %v3899_v39  ;;  %v5199_v18 = vpop.eup %5198  ;;  %4349 = vst.msk [vmem:[%s6456_s17 + $0x1a8] sm:$0xff] %vm4295_vm2, %v5197_v29  ;;  %v2468_v34 = vadd.f32 %v6861_v5, %v6082_v52  ;;  %v3075_v3 = vmul.f32 %v6099_v59, %v2807_v30  ;;  %v3715_v56 = vsub.f32 0.0, %v3587_v47  ;;  %v6915_v4 = vpop.f32.mrb[141].mxu1 }
 0x31e   : > { %5214 = vrcp.f32 %v4069_v61  ;;  %v5201_v20 = vpop.eup %5200  ;;  %v4070_v54 = vadd.f32 1.0, %v5199_v18  ;;  %v2808_v49 = vmax.f32 %v2464_v16, 0.0  ;;  %v2809_v45 = vmax.f32 %v2466_v23, 0.0  ;;  %v6917_v22 = vpop.f32.mrb[142].mxu1 }
 0x31f   : > { %5216 = vpow2.f32 %v3901_v43  ;;  %v5203_v25 = vpop.eup %5202  ;;  %v4095_v40 = vadd.f32 1.0, %v5201_v20  ;;  %v3716_v19 = vsub.f32 0.0, %v3588_v31  ;;  %v3903_v5 = vmul.f32 1.442695, %v3715_v56  ;;  %v6921_v41 = vpop.f32.mrb[143].mxu1 }
 0x320   : > { %v5205_v44 = vpop.eup %5204  ;;  %4324 = vst.msk [vmem:[%s6456_s17 + $0xe0] sm:$0xff] %vm4295_vm2, %v5203_v25  ;;  %5218 = vrcp.f32 %v4070_v54  ;;  %v2810_v12 = vmax.f32 %v2468_v34, 0.0  ;;  %v3424_v50 = vadd.f32 %v3073_v63, %v3072_v7  ;;  %v3076_v33 = vmul.f32 %v6094_v60, %v2808_v49  ;;  %v3330_v55 = vpop.xlane.xlu0 %3329 }
 0x321   : > { %v5207_v58 = vpop.eup %5206  ;;  %4325 = vst.msk [vmem:[%s6456_s17 + $0xe8] sm:$0xff] %vm4295_vm2, %v5205_v44  ;;  %5220 = vrcp.f32 %v4095_v40  ;;  %v3077_v0 = vmul.f32 %v6099_v59, %v2809_v45  ;;  %v3905_v13 = vmul.f32 1.442695, %v3716_v19  ;;  %v2470_v36 = vadd.f32 %v6865_v62, %v6084_v48  ;;  %v3333_v30 = vpop.xlane.xlu1 %3332 }
 0x322   : > { %v5209_v57 = vpop.eup %5208  ;;  %4350 = vst.msk [vmem:[%s6456_s17 + $0x1b0] sm:$0xff] %vm4295_vm2, %v5207_v58  ;;  %5222 = vpow2.f32 %v3903_v5  ;;  %v3078_v14 = vmul.f32 %v6094_v60, %v2810_v12  ;;  %3425 = vadd.xlane.f32.xlu0 %v3424_v50  ;;  %v3427_v8 = vadd.f32 %v3075_v3, %v3074_v38  ;;  %v3589_v9 = vadd.f32 %v6626_v26, %v3324_v42 }
 0x323   : > { %v4096_v32 = vadd.f32 1.0, %v5209_v57  ;;  %5224 = vpow2.f32 %v3905_v13  ;;  %v2474_v17 = vadd.f32 %v6875_v10, %v6082_v52  ;;  %v2811_v27 = vmax.f32 %v2470_v36, 0.0 }
 0x324   : > { %3428 = vadd.xlane.f32.xlu1 %v3427_v8  ;;  %v2476_v24 = vadd.f32 %v6884_v51, %v6084_v48  ;;  %v3590_v53 = vadd.f32 %v6626_v26, %v3327_v37  ;;  %v2478_v39 = vadd.f32 %v6891_v21, %v6082_v52  ;;  %v3717_v15 = vsub.f32 0.0, %v3589_v9  ;;  %v6940_v11 = vpop.f32.mrb[144].mxu1  ;;  %v3336_v13 = vpop.xlane.xlu0 %3335 }
 0x325   : > { %5226 = vrcp.f32 %v4096_v32  ;;  %v2812_v1 = vmax.f32 %v2474_v17, 0.0  ;;  %v3430_v28 = vadd.f32 %v3077_v0, %v3076_v33  ;;  %v3079_v10 = vmul.f32 %v6099_v59, %v2811_v27  ;;  %v6945_v35 = vpop.f32.mrb[145].mxu1  ;;  %v3339_v8 = vpop.xlane.xlu1 %3338 }
 0x326   : > { %v5211_v62 = vpop.eup %5210  ;;  %v2813_v63 = vmax.f32 %v2476_v24, 0.0  ;;  %v3718_v51 = vsub.f32 0.0, %v3590_v53  ;;  %v2814_v43 = vmax.f32 %v2478_v39, 0.0  ;;  %v3907_v38 = vmul.f32 1.442695, %v3717_v15  ;;  %v2497_v47 = vpop.f32.mrb[146].mxu1 }
 0x327   : > { %v5213_v7 = vpop.eup %5212  ;;  %4351 = vst.msk [vmem:[%s6456_s17 + $0x1b8] sm:$0xff] %vm4295_vm2, %v5211_v62  ;;  %v3080_v46 = vmul.f32 %v6094_v60, %v2812_v1  ;;  %3431 = vadd.xlane.f32.xlu0 %v3430_v28  ;;  %v2480_v29 = vadd.f32 %v6895_v6, %v6084_v48  ;;  %v3433_v34 = vadd.f32 %v3079_v10, %v3078_v14  ;;  %v6954_v20 = vpop.f32.mrb[147].mxu1  ;;  %v6976_v39 = vld [vmem:[#allocation2] ss:$0 sm:$0xff] }
 0x328   : > { %v5215_v21 = vpop.eup %5214  ;;  %v4097_v61 = vadd.f32 1.0, %v5213_v7  ;;  %v3081_v18 = vmul.f32 %v6099_v59, %v2813_v63  ;;  %v3909_v23 = vmul.f32 1.442695, %v3718_v51  ;;  %v3082_v31 = vmul.f32 %v6094_v60, %v2814_v43 }
 0x329   : > { %v5217_v16 = vpop.eup %5216  ;;  %4326 = vst.msk [vmem:[%s6456_s17 + $0xf0] sm:$0xff] %vm4295_vm2, %v5215_v21  ;;  %v2815_v3 = vmax.f32 %v2480_v29, 0.0  ;;  %v3591_v6 = vadd.f32 %v6626_v26, %v3330_v55  ;;  %3434 = vadd.xlane.f32.xlu1 %v3433_v34  ;;  %v2484_v25 = vadd.f32 %v6912_v2, %v6082_v52  ;;  %v2486_v40 = vadd.f32 %v6915_v4, %v6084_v48 }
 0x32a   : > { %5228 = vrcp.f32 %v4097_v61  ;;  %v4098_v54 = vadd.f32 1.0, %v5217_v16  ;;  %v5219_v56 = vpop.eup %5218  ;;  %v3592_v49 = vadd.f32 %v6626_v26, %v3333_v30  ;;  %v2488_v5 = vadd.f32 %v6917_v22, %v6082_v52 }
 0x32b   : > { %5230 = vpow2.f32 %v3907_v38  ;;  %v5221_v45 = vpop.eup %5220  ;;  %4327 = vst.msk [vmem:[%s6456_s17 + $0xf8] sm:$0xff] %vm4295_vm2, %v5219_v56  ;;  %v3083_v19 = vmul.f32 %v6099_v59, %v2815_v3  ;;  %v3719_v44 = vsub.f32 0.0, %v3591_v6  ;;  %v2816_v2 = vmax.f32 %v2484_v25, 0.0 }
 0x32c   : > { %5232 = vrcp.f32 %v4098_v54  ;;  %v5223_v12 = vpop.eup %5222  ;;  %4352 = vst.msk [vmem:[%s6456_s17 + $0x1c0] sm:$0xff] %vm4295_vm2, %v5221_v45  ;;  %v2817_v50 = vmax.f32 %v2486_v40, 0.0  ;;  %v3720_v42 = vsub.f32 0.0, %v3592_v49  ;;  %v2818_v33 = vmax.f32 %v2488_v5, 0.0  ;;  %v2503_v37 = vpop.f32.mrb[148].mxu1 }
 0x32d   : > { %5234 = vpow2.f32 %v3909_v23  ;;  %v5225_v4 = vpop.eup %5224  ;;  %v4099_v58 = vadd.f32 1.0, %v5223_v12  ;;  %v3911_v26 = vmul.f32 1.442695, %v3719_v44  ;;  %v3436_v0 = vadd.f32 %v3081_v18, %v3080_v46  ;;  %v2505_v32 = vpop.f32.mrb[149].mxu1 }
 0x32e   : > { %v4100_v57 = vadd.f32 1.0, %v5225_v4  ;;  %v3084_v14 = vmul.f32 %v6094_v60, %v2816_v2  ;;  %v3085_v22 = vmul.f32 %v6099_v59, %v2817_v50  ;;  %v3913_v36 = vmul.f32 1.442695, %v3720_v42  ;;  %v2507_v53 = vpop.f32.mrb[150].mxu1  ;;  %v3345_v18 = vpop.xlane.xlu1 %3344 }
 0x32f   : > { %v5227_v9 = vpop.eup %5226  ;;  %5236 = vrcp.f32 %v4099_v58  ;;  %v3086_v17 = vmul.f32 %v6094_v60, %v2818_v33  ;;  %3437 = vadd.xlane.f32.xlu0 %v3436_v0  ;;  %v2490_v27 = vadd.f32 %v6921_v41, %v6084_v48  ;;  %v3439_v24 = vadd.f32 %v3083_v19, %v3082_v31  ;;  %v2509_v28 = vpop.f32.mrb[151].mxu1 }
 0x330   : > { %4353 = vst.msk [vmem:[%s6456_s17 + $0x1c8] sm:$0xff] %vm4295_vm2, %v5227_v9  ;;  %5238 = vrcp.f32 %v4100_v57  ;;  %v3593_v62 = vadd.f32 %v6976_v39, %v3336_v13  ;;  %v2494_v15 = vadd.f32 %v6940_v11, %v6082_v52  ;;  %v2496_v1 = vadd.f32 %v6945_v35, %v6084_v48  ;;  %v3342_v35 = vpop.xlane.xlu0 %3341 }
 0x331   : > { %5240 = vpow2.f32 %v3911_v26  ;;  %v2819_v7 = vmax.f32 %v2490_v27, 0.0  ;;  %3440 = vadd.xlane.f32.xlu1 %v3439_v24  ;;  %v3594_v41 = vadd.f32 %v6976_v39, %v3339_v8  ;;  %v2498_v10 = vadd.f32 %v2497_v47, %v6082_v52 }
 0x332   : > { %5242 = vpow2.f32 %v3913_v36  ;;  %v3721_v63 = vsub.f32 0.0, %v3593_v62  ;;  %v2820_v51 = vmax.f32 %v2494_v15, 0.0  ;;  %v2821_v43 = vmax.f32 %v2496_v1, 0.0 }
 0x333   : > { %v3087_v21 = vmul.f32 %v6099_v59, %v2819_v7  ;;  %v3722_v11 = vsub.f32 0.0, %v3594_v41  ;;  %v2822_v61 = vmax.f32 %v2498_v10, 0.0  ;;  %v3442_v38 = vadd.f32 %v3085_v22, %v3084_v14 }
 0x334   : > { %v5229_v55 = vpop.eup %5228  ;;  %v3915_v29 = vmul.f32 1.442695, %v3721_v63  ;;  %v3088_v30 = vmul.f32 %v6094_v60, %v2820_v51  ;;  %v3089_v47 = vmul.f32 %v6099_v59, %v2821_v43  ;;  %v2500_v16 = vadd.f32 %v6954_v20, %v6084_v48  ;;  %v2513_v6 = vpop.f32.mrb[152].mxu1 }
 0x335   : > { %v5231_v46 = vpop.eup %5230  ;;  %4354 = vst.msk [vmem:[%s6456_s17 + $0x1d0] sm:$0xff] %vm4295_vm2, %v5229_v55  ;;  %v3917_v34 = vmul.f32 1.442695, %v3722_v11  ;;  %v3090_v54 = vmul.f32 %v6094_v60, %v2822_v61  ;;  %3443 = vadd.xlane.f32.xlu0 %v3442_v38  ;;  %v3445_v3 = vadd.f32 %v3087_v21, %v3086_v17  ;;  %v3595_v40 = vadd.f32 %v6976_v39, %v3342_v35  ;;  %v2515_v45 = vpop.f32.mrb[153].mxu1 }
 0x336   : > { %v5233_v23 = vpop.eup %5232  ;;  %v4101_v31 = vadd.f32 1.0, %v5231_v46  ;;  %5244 = vpow2.f32 %v3915_v29  ;;  %v2823_v25 = vmax.f32 %v2500_v16, 0.0  ;;  %v2504_v49 = vadd.f32 %v2503_v37, %v6082_v52  ;;  %v2517_v5 = vpop.f32.mrb[154].mxu1 }
 0x337   : > { %v5235_v56 = vpop.eup %5234  ;;  %4355 = vst.msk [vmem:[%s6456_s17 + $0x1d8] sm:$0xff] %vm4295_vm2, %v5233_v23  ;;  %3446 = vadd.xlane.f32.xlu1 %v3445_v3  ;;  %v2506_v19 = vadd.f32 %v2505_v32, %v6084_v48  ;;  %v3596_v44 = vadd.f32 %v6976_v39, %v3345_v18  ;;  %v3723_v2 = vsub.f32 0.0, %v3595_v40  ;;  %v2519_v42 = vpop.f32.mrb[155].mxu1  ;;  %v2508_v33 = vadd.f32 %v2507_v53, %v6082_v52 }
 0x338   : > { %5246 = vrcp.f32 %v4101_v31  ;;  %v4102_v20 = vadd.f32 1.0, %v5235_v56  ;;  %v3091_v12 = vmul.f32 %v6099_v59, %v2823_v25  ;;  %v2824_v50 = vmax.f32 %v2504_v49, 0.0  ;;  %v3348_v0 = vpop.xlane.xlu0 %3347  ;;  %v3351_v15 = vpop.xlane.xlu1 %3350 }
 0x339   : > { %5248 = vpow2.f32 %v3917_v34  ;;  %v5237_v4 = vpop.eup %5236  ;;  %v2825_v58 = vmax.f32 %v2506_v19, 0.0  ;;  %v3724_v26 = vsub.f32 0.0, %v3596_v44  ;;  %v3919_v37 = vmul.f32 1.442695, %v3723_v2 }
 0x33a   : > { %5250 = vrcp.f32 %v4102_v20  ;;  %v5239_v13 = vpop.eup %5238  ;;  %4356 = vst.msk [vmem:[%s6456_s17 + $0x1e0] sm:$0xff] %vm4295_vm2, %v5237_v4  ;;  %v3092_v57 = vmul.f32 %v6094_v60, %v2824_v50  ;;  %v3448_v14 = vadd.f32 %v3089_v47, %v3088_v30  ;;  %v2510_v22 = vadd.f32 %v2509_v28, %v6084_v48 }
 0x33b   : > { %v5241_v36 = vpop.eup %5240  ;;  %4357 = vst.msk [vmem:[%s6456_s17 + $0x1e8] sm:$0xff] %vm4295_vm2, %v5239_v13  ;;  %v3093_v8 = vmul.f32 %v6099_v59, %v2825_v58  ;;  %v3921_v32 = vmul.f32 1.442695, %v3724_v26  ;;  %v2826_v9 = vmax.f32 %v2508_v33, 0.0  ;;  %v3451_v17 = vadd.f32 %v3091_v12, %v3090_v54 }
 0x33c   : > { %v5243_v27 = vpop.eup %5242  ;;  %v4103_v24 = vadd.f32 1.0, %v5241_v36  ;;  %5252 = vpow2.f32 %v3919_v37  ;;  %3449 = vadd.xlane.f32.xlu0 %v3448_v14  ;;  %v2827_v53 = vmax.f32 %v2510_v22, 0.0  ;;  %v3597_v62 = vadd.f32 %v6976_v39, %v3348_v0  ;;  %v2523_v41 = vpop.f32.mrb[156].mxu1 }
 0x33d   : > { %v4104_v1 = vadd.f32 1.0, %v5243_v27  ;;  %5254 = vpow2.f32 %v3921_v32  ;;  %v3094_v28 = vmul.f32 %v6094_v60, %v2826_v9  ;;  %3452 = vadd.xlane.f32.xlu1 %v3451_v17  ;;  %v2514_v7 = vadd.f32 %v2513_v6, %v6082_v52  ;;  %v2525_v43 = vpop.f32.mrb[157].mxu1  ;;  %v3354_v54 = vpop.xlane.xlu0 %3353 }
 0x33e   : > { %5256 = vrcp.f32 %v4103_v24  ;;  %v3095_v10 = vmul.f32 %v6099_v59, %v2827_v53  ;;  %v3725_v63 = vsub.f32 0.0, %v3597_v62  ;;  %v2516_v51 = vadd.f32 %v2515_v45, %v6084_v48  ;;  %v2527_v61 = vpop.f32.mrb[158].mxu1 }
 0x33f   : > { %5258 = vrcp.f32 %v4104_v1  ;;  %v2828_v55 = vmax.f32 %v2514_v7, 0.0  ;;  %v3598_v21 = vadd.f32 %v6976_v39, %v3351_v15  ;;  %v2518_v11 = vadd.f32 %v2517_v5, %v6082_v52  ;;  %v2529_v47 = vpop.f32.mrb[159].mxu1 }
 0x340   : > { %v5245_v38 = vpop.eup %5244  ;;  %v3923_v35 = vmul.f32 1.442695, %v3725_v63  ;;  %v2829_v46 = vmax.f32 %v2516_v51, 0.0  ;;  %v3454_v29 = vadd.f32 %v3093_v8, %v3092_v57  ;;  %v2520_v30 = vadd.f32 %v2519_v42, %v6084_v48 }
 0x341   : > { %v4105_v18 = vadd.f32 1.0, %v5245_v38  ;;  %v3096_v23 = vmul.f32 %v6094_v60, %v2828_v55  ;;  %v3726_v31 = vsub.f32 0.0, %v3598_v21  ;;  %v2830_v34 = vmax.f32 %v2518_v11, 0.0 }
 0x342   : > { %v5247_v16 = vpop.eup %5246  ;;  %5260 = vpow2.f32 %v3923_v35  ;;  %v3097_v6 = vmul.f32 %v6099_v59, %v2829_v46  ;;  %3455 = vadd.xlane.f32.xlu0 %v3454_v29  ;;  %v2831_v56 = vmax.f32 %v2520_v30, 0.0  ;;  %v3457_v25 = vadd.f32 %v3095_v10, %v3094_v28 }
 0x343   : > { %v5249_v3 = vpop.eup %5248  ;;  %4358 = vst.msk [vmem:[%s6456_s17 + $0x1f0] sm:$0xff] %vm4295_vm2, %v5247_v16  ;;  %5262 = vrcp.f32 %v4105_v18  ;;  %v3925_v45 = vmul.f32 1.442695, %v3726_v31  ;;  %v3098_v20 = vmul.f32 %v6094_v60, %v2830_v34  ;;  %v3599_v44 = vadd.f32 %v6976_v39, %v3354_v54 }
 0x344   : > { %v5251_v40 = vpop.eup %5250  ;;  %v4106_v49 = vadd.f32 1.0, %v5249_v3  ;;  %v3099_v19 = vmul.f32 %v6099_v59, %v2831_v56  ;;  %3458 = vadd.xlane.f32.xlu1 %v3457_v25  ;;  %v2524_v5 = vadd.f32 %v2523_v41, %v6082_v52  ;;  %v2526_v12 = vadd.f32 %v2525_v43, %v6084_v48  ;;  %v2533_v58 = vpop.f32.mrb[160].mxu1 }
 0x345   : > { %4359 = vst.msk [vmem:[%s6456_s17 + $0x1f8] sm:$0xff] %vm4295_vm2, %v5251_v40  ;;  %v3357_v2 = vpop.xlane.xlu1 %3356  ;;  %v2528_v50 = vadd.f32 %v2527_v61, %v6082_v52  ;;  %v3460_v42 = vadd.f32 %v3097_v6, %v3096_v23  ;;  %v2530_v4 = vadd.f32 %v2529_v47, %v6084_v48  ;;  %v3727_v33 = vsub.f32 0.0, %v3599_v44  ;;  %v2535_v37 = vpop.f32.mrb[161].mxu1 }
 0x346   : > { %5264 = vrcp.f32 %v4106_v49  ;;  %v5253_v26 = vpop.eup %5252  ;;  %v2832_v0 = vmax.f32 %v2524_v5, 0.0  ;;  %v2833_v13 = vmax.f32 %v2526_v12, 0.0  ;;  %v3600_v22 = vadd.f32 %v6976_v39, %v3357_v2  ;;  %v2537_v32 = vpop.f32.mrb[162].mxu1 }
 0x347   : > { %5266 = vpow2.f32 %v3925_v45  ;;  %v5255_v57 = vpop.eup %5254  ;;  %v4107_v14 = vadd.f32 1.0, %v5253_v26  ;;  %v2834_v36 = vmax.f32 %v2528_v50, 0.0  ;;  %3461 = vadd.xlane.f32.xlu0 %v3460_v42  ;;  %v2835_v8 = vmax.f32 %v2530_v4, 0.0  ;;  %v2539_v62 = vpop.f32.mrb[163].mxu1 }
 0x348   : > { %v5257_v9 = vpop.eup %5256  ;;  %v4108_v17 = vadd.f32 1.0, %v5255_v57  ;;  %v3927_v27 = vmul.f32 1.442695, %v3727_v33  ;;  %v3100_v24 = vmul.f32 %v6094_v60, %v2832_v0  ;;  %v3101_v53 = vmul.f32 %v6099_v59, %v2833_v13 }
 0x349   : > { %v5259_v15 = vpop.eup %5258  ;;  %4360 = vst.msk [vmem:[%s6456_s17 + $0x200] sm:$0xff] %vm4295_vm2, %v5257_v9  ;;  %5268 = vrcp.f32 %v4107_v14  ;;  %v3728_v1 = vsub.f32 0.0, %v3600_v22  ;;  %v3102_v28 = vmul.f32 %v6094_v60, %v2834_v36  ;;  %v3103_v7 = vmul.f32 %v6099_v59, %v2835_v8 }
 0x34a   : > { %4361 = vst.msk [vmem:[%s6456_s17 + $0x208] sm:$0xff] %vm4295_vm2, %v5259_v15  ;;  %5270 = vrcp.f32 %v4108_v17  ;;  %v3463_v41 = vadd.f32 %v3099_v19, %v3098_v20  ;;  %v2534_v10 = vadd.f32 %v2533_v58, %v6082_v52  ;;  %v2536_v63 = vadd.f32 %v2535_v37, %v6084_v48 }
 0x34b   : > { %5272 = vpow2.f32 %v3927_v27  ;;  %v3929_v51 = vmul.f32 1.442695, %v3728_v1  ;;  %v3360_v43 = vpop.xlane.xlu0 %3359  ;;  %v2538_v55 = vadd.f32 %v2537_v32, %v6082_v52  ;;  %v3466_v21 = vadd.f32 %v3101_v53, %v3100_v24 }
 0x34c   : > { %v5261_v11 = vpop.eup %5260  ;;  %3464 = vadd.xlane.f32.xlu1 %v3463_v41  ;;  %v3601_v61 = vadd.f32 %v6976_v39, %v3360_v43  ;;  %v2836_v38 = vmax.f32 %v2534_v10, 0.0  ;;  %v2837_v35 = vmax.f32 %v2536_v63, 0.0  ;;  %v2540_v46 = vadd.f32 %v2539_v62, %v6084_v48  ;;  %v2543_v18 = vpop.f32.mrb[164].mxu1 }
 0x34d   : > { %v5263_v29 = vpop.eup %5262  ;;  %v4109_v30 = vadd.f32 1.0, %v5261_v11  ;;  %5274 = vpow2.f32 %v3929_v51  ;;  %v2838_v47 = vmax.f32 %v2538_v55, 0.0  ;;  %3467 = vadd.xlane.f32.xlu0 %v3466_v21  ;;  %v3469_v16 = vadd.f32 %v3103_v7, %v3102_v28  ;;  %v3363_v54 = vpop.xlane.xlu1 %3362 }
 0x34e   : > { %4362 = vst.msk [vmem:[%s6456_s17 + $0x210] sm:$0xff] %vm4295_vm2, %v5263_v29  ;;  %v3729_v23 = vsub.f32 0.0, %v3601_v61  ;;  %v3104_v31 = vmul.f32 %v6094_v60, %v2836_v38  ;;  %v3105_v34 = vmul.f32 %v6099_v59, %v2837_v35  ;;  %v2839_v3 = vmax.f32 %v2540_v46, 0.0  ;;  %v2545_v6 = vpop.f32.mrb[165].mxu1 }
 0x34f   : > { %5276 = vrcp.f32 %v4109_v30  ;;  %v3602_v25 = vadd.f32 %v6976_v39, %v3363_v54  ;;  %v3106_v40 = vmul.f32 %v6094_v60, %v2838_v47  ;;  %v2544_v49 = vadd.f32 %v2543_v18, %v6082_v52  ;;  %v2547_v45 = vpop.f32.mrb[166].mxu1 }
 0x350   : > { %v5265_v56 = vpop.eup %5264  ;;  %v3931_v19 = vmul.f32 1.442695, %v3729_v23  ;;  %v3107_v44 = vmul.f32 %v6099_v59, %v2839_v3  ;;  %3470 = vadd.xlane.f32.xlu1 %v3469_v16  ;;  %v2546_v5 = vadd.f32 %v2545_v6, %v6084_v48  ;;  %v2548_v12 = vadd.f32 %v2547_v45, %v6082_v52  ;;  %v2549_v2 = vpop.f32.mrb[167].mxu1 }
 0x351   : > { %v5267_v20 = vpop.eup %5266  ;;  %4363 = vst.msk [vmem:[%s6456_s17 + $0x218] sm:$0xff] %vm4295_vm2, %v5265_v56  ;;  %v3730_v42 = vsub.f32 0.0, %v3602_v25  ;;  %v2840_v4 = vmax.f32 %v2544_v49, 0.0  ;;  %v3472_v58 = vadd.f32 %v3105_v34, %v3104_v31  ;;  %v2550_v0 = vadd.f32 %v2549_v2, %v6084_v48 }
 0x352   : > { %v4110_v50 = vadd.f32 1.0, %v5267_v20  ;;  %5278 = vpow2.f32 %v3931_v19  ;;  %v2841_v26 = vmax.f32 %v2546_v5, 0.0  ;;  %v2842_v33 = vmax.f32 %v2548_v12, 0.0 }
 0x353   : > { %v5269_v13 = vpop.eup %5268  ;;  %v3933_v37 = vmul.f32 1.442695, %v3730_v42  ;;  %v3108_v57 = vmul.f32 %v6094_v60, %v2840_v4  ;;  %3473 = vadd.xlane.f32.xlu0 %v3472_v58  ;;  %v3475_v14 = vadd.f32 %v3107_v44, %v3106_v40  ;;  %v2843_v8 = vmax.f32 %v2550_v0, 0.0 }
 0x354   : > { %5280 = vrcp.f32 %v4110_v50  ;;  %v5271_v22 = vpop.eup %5270  ;;  %4364 = vst.msk [vmem:[%s6456_s17 + $0x220] sm:$0xff] %vm4295_vm2, %v5269_v13  ;;  %v3109_v36 = vmul.f32 %v6099_v59, %v2841_v26  ;;  %v3110_v9 = vmul.f32 %v6094_v60, %v2842_v33  ;;  %v2553_v17 = vpop.f32.mrb[168].mxu1 }
 0x355   : > { %v5273_v32 = vpop.eup %5272  ;;  %4365 = vst.msk [vmem:[%s6456_s17 + $0x228] sm:$0xff] %vm4295_vm2, %v5271_v22  ;;  %5282 = vpow2.f32 %v3933_v37  ;;  %3476 = vadd.xlane.f32.xlu1 %v3475_v14  ;;  %v3366_v24 = vpop.xlane.xlu0 %3365  ;;  %v3111_v53 = vmul.f32 %v6099_v59, %v2843_v8  ;;  %v2554_v62 = vadd.f32 %v2553_v17, %v6082_v52 }
 0x356   : > { %v4111_v27 = vadd.f32 1.0, %v5273_v32  ;;  %v2555_v15 = vpop.f32.mrb[169].mxu1  ;;  %v3478_v1 = vadd.f32 %v3109_v36, %v3108_v57  ;;  %v3603_v7 = vadd.f32 %v6976_v39, %v3366_v24 }
 0x357   : > { %v5275_v28 = vpop.eup %5274  ;;  %v2556_v41 = vadd.f32 %v2555_v15, %v6084_v48  ;;  %v2557_v10 = vpop.f32.mrb[170].mxu1  ;;  %v2844_v43 = vmax.f32 %v2554_v62, 0.0  ;;  %v3481_v47 = vadd.f32 %v3111_v53, %v3110_v9 }
 0x358   : > { %5284 = vrcp.f32 %v4111_v27  ;;  %v4112_v63 = vadd.f32 1.0, %v5275_v28  ;;  %v3369_v51 = vpop.xlane.xlu1 %3368  ;;  %v2558_v55 = vadd.f32 %v2557_v10, %v6082_v52  ;;  %3479 = vadd.xlane.f32.xlu0 %v3478_v1  ;;  %v2559_v21 = vpop.f32.mrb[171].mxu1  ;;  %v3731_v61 = vsub.f32 0.0, %v3603_v7 }
 0x359   : > { %v5277_v11 = vpop.eup %5276  ;;  %v3604_v38 = vadd.f32 %v6976_v39, %v3369_v51  ;;  %v2845_v35 = vmax.f32 %v2556_v41, 0.0  ;;  %v2560_v46 = vadd.f32 %v2559_v21, %v6084_v48  ;;  %v3112_v29 = vmul.f32 %v6094_v60, %v2844_v43  ;;  %3482 = vadd.xlane.f32.xlu1 %v3481_v47 }
 0x35a   : > { %4366 = vst.msk [vmem:[%s6456_s17 + $0x230] sm:$0xff] %vm4295_vm2, %v5277_v11  ;;  %5286 = vrcp.f32 %v4112_v63  ;;  %v2846_v30 = vmax.f32 %v2558_v55, 0.0  ;;  %v3935_v16 = vmul.f32 1.442695, %v3731_v61 }
 0x35b   : > { %v3732_v18 = vsub.f32 0.0, %v3604_v38  ;;  %v3113_v23 = vmul.f32 %v6099_v59, %v2845_v35  ;;  %v2847_v31 = vmax.f32 %v2560_v46, 0.0 }
 0x35c   : > { %v5279_v34 = vpop.eup %5278  ;;  %v3114_v54 = vmul.f32 %v6094_v60, %v2846_v30  ;;  %5288 = vpow2.f32 %v3935_v16  ;;  %v2563_v40 = vpop.f32.mrb[172].mxu1 }
 0x35d   : > { %v4113_v6 = vadd.f32 1.0, %v5279_v34  ;;  %v3937_v56 = vmul.f32 1.442695, %v3732_v18  ;;  %v3115_v25 = vmul.f32 %v6099_v59, %v2847_v31  ;;  %v2564_v49 = vadd.f32 %v2563_v40, %v6082_v52  ;;  %v2565_v45 = vpop.f32.mrb[173].mxu1 }
 0x35e   : > { %v5281_v3 = vpop.eup %5280  ;;  %v3484_v20 = vadd.f32 %v3113_v23, %v3112_v29  ;;  %v2566_v5 = vadd.f32 %v2565_v45, %v6084_v48  ;;  %v2567_v12 = vpop.f32.mrb[174].mxu1 }
 0x35f   : > { %4367 = vst.msk [vmem:[%s6456_s17 + $0x238] sm:$0xff] %vm4295_vm2, %v5281_v3  ;;  %v5283_v19 = vpop.eup %5282  ;;  %5290 = vrcp.f32 %v4113_v6  ;;  %v3372_v44 = vpop.xlane.xlu0 %3371  ;;  %v3487_v2 = vadd.f32 %v3115_v25, %v3114_v54  ;;  %v2848_v4 = vmax.f32 %v2564_v49, 0.0  ;;  %v2568_v0 = vadd.f32 %v2567_v12, %v6082_v52 }
 0x360   : > { %v4114_v50 = vadd.f32 1.0, %v5283_v19  ;;  %5292 = vpow2.f32 %v3937_v56  ;;  %v3605_v42 = vadd.f32 %v6976_v39, %v3372_v44  ;;  %3485 = vadd.xlane.f32.xlu0 %v3484_v20  ;;  %v2569_v58 = vpop.f32.mrb[175].mxu1  ;;  %v3375_v26 = vpop.xlane.xlu1 %3374  ;;  %v2849_v33 = vmax.f32 %v2566_v5, 0.0 }
 0x361   : > { %v2570_v13 = vadd.f32 %v2569_v58, %v6084_v48  ;;  %3488 = vadd.xlane.f32.xlu1 %v3487_v2  ;;  %v3606_v14 = vadd.f32 %v6976_v39, %v3375_v26  ;;  %v3116_v22 = vmul.f32 %v6094_v60, %v2848_v4  ;;  %v2850_v8 = vmax.f32 %v2568_v0, 0.0 }
 0x362   : > { %v5285_v37 = vpop.eup %5284  ;;  %5294 = vrcp.f32 %v4114_v50  ;;  %v3733_v57 = vsub.f32 0.0, %v3605_v42  ;;  %v3117_v36 = vmul.f32 %v6099_v59, %v2849_v33 }
 0x363   : > { %4368 = vst.msk [vmem:[%s6456_s17 + $0x240] sm:$0xff] %vm4295_vm2, %v5285_v37  ;;  %v2851_v32 = vmax.f32 %v2570_v13, 0.0  ;;  %v3734_v27 = vsub.f32 0.0, %v3606_v14  ;;  %v3118_v24 = vmul.f32 %v6094_v60, %v2850_v8 }
 0x364   : > { %v5287_v9 = vpop.eup %5286  ;;  %v3939_v17 = vmul.f32 1.442695, %v3733_v57  ;;  %v2573_v62 = vpop.f32.mrb[176].mxu1  ;;  %v3490_v15 = vadd.f32 %v3117_v36, %v3116_v22 }
 0x365   : > { %4369 = vst.msk [vmem:[%s6456_s17 + $0x248] sm:$0xff] %vm4295_vm2, %v5287_v9  ;;  %v3119_v53 = vmul.f32 %v6099_v59, %v2851_v32  ;;  %v3941_v1 = vmul.f32 1.442695, %v3734_v27  ;;  %v2574_v28 = vadd.f32 %v2573_v62, %v6082_v52  ;;  %v2575_v7 = vpop.f32.mrb[177].mxu1 }
 0x366   : > { %5296 = vpow2.f32 %v3939_v17  ;;  %v5289_v41 = vpop.eup %5288  ;;  %v2576_v10 = vadd.f32 %v2575_v7, %v6084_v48  ;;  %v2577_v63 = vpop.f32.mrb[178].mxu1  ;;  %3491 = vadd.xlane.f32.xlu0 %v3490_v15 }
 0x367   : > { %v3493_v51 = vadd.f32 %v3119_v53, %v3118_v24  ;;  %v4115_v43 = vadd.f32 1.0, %v5289_v41  ;;  %5298 = vpow2.f32 %v3941_v1  ;;  %v2852_v21 = vmax.f32 %v2574_v28, 0.0  ;;  %v2579_v61 = vpop.f32.mrb[179].mxu1 }
 0x368   : > { %v3378_v55 = vpop.xlane.xlu0 %3377  ;;  %v2578_v11 = vadd.f32 %v2577_v63, %v6082_v52  ;;  %v2853_v46 = vmax.f32 %v2576_v10, 0.0  ;;  %v2580_v29 = vadd.f32 %v2579_v61, %v6084_v48 }
 0x369   : > { %v5291_v38 = vpop.eup %5290  ;;  %v3607_v35 = vadd.f32 %v6976_v39, %v3378_v55  ;;  %3494 = vadd.xlane.f32.xlu1 %v3493_v51  ;;  %5300 = vrcp.f32 %v4115_v43  ;;  %v3381_v47 = vpop.xlane.xlu1 %3380  ;;  %v3120_v16 = vmul.f32 %v6094_v60, %v2852_v21 }
 0x36a   : > { %v5293_v30 = vpop.eup %5292  ;;  %4370 = vst.msk [vmem:[%s6456_s17 + $0x250] sm:$0xff] %vm4295_vm2, %v5291_v38  ;;  %v2854_v18 = vmax.f32 %v2578_v11, 0.0  ;;  %v3608_v34 = vadd.f32 %v6976_v39, %v3381_v47  ;;  %v3121_v54 = vmul.f32 %v6099_v59, %v2853_v46  ;;  %v2855_v56 = vmax.f32 %v2580_v29, 0.0 }
 0x36b   : > { %v4116_v23 = vadd.f32 1.0, %v5293_v30  ;;  %v3735_v31 = vsub.f32 0.0, %v3607_v35 }
 0x36c   : > { %v5295_v3 = vpop.eup %5294  ;;  %v3122_v6 = vmul.f32 %v6094_v60, %v2854_v18  ;;  %v3736_v40 = vsub.f32 0.0, %v3608_v34  ;;  %v2583_v49 = vpop.f32.mrb[180].mxu1  ;;  %v3496_v45 = vadd.f32 %v3121_v54, %v3120_v16  ;;  %v3123_v20 = vmul.f32 %v6099_v59, %v2855_v56 }
 0x36d   : > { %4371 = vst.msk [vmem:[%s6456_s17 + $0x258] sm:$0xff] %vm4295_vm2, %v5295_v3  ;;  %5302 = vrcp.f32 %v4116_v23  ;;  %v3943_v25 = vmul.f32 1.442695, %v3735_v31  ;;  %v2584_v19 = vadd.f32 %v2583_v49, %v6082_v52  ;;  %v2585_v44 = vpop.f32.mrb[181].mxu1 }
 0x36e   : > { %v3945_v5 = vmul.f32 1.442695, %v3736_v40  ;;  %v2586_v12 = vadd.f32 %v2585_v44, %v6084_v48  ;;  %v2587_v2 = vpop.f32.mrb[182].mxu1  ;;  %3497 = vadd.xlane.f32.xlu0 %v3496_v45  ;;  %v3499_v26 = vadd.f32 %v3123_v20, %v3122_v6 }
 0x36f   : > { %5304 = vpow2.f32 %v3943_v25  ;;  %v2856_v42 = vmax.f32 %v2584_v19, 0.0  ;;  %v2588_v4 = vadd.f32 %v2587_v2, %v6082_v52  ;;  %v2589_v58 = vpop.f32.mrb[183].mxu1 }
 0x370   : > { %v5297_v50 = vpop.eup %5296  ;;  %5306 = vpow2.f32 %v3945_v5  ;;  %v3384_v0 = vpop.xlane.xlu0 %3383  ;;  %v2857_v13 = vmax.f32 %v2586_v12, 0.0  ;;  %v2590_v37 = vadd.f32 %v2589_v58, %v6084_v48  ;;  %3500 = vadd.xlane.f32.xlu1 %v3499_v26 }
 0x371   : > { %v4117_v33 = vadd.f32 1.0, %v5297_v50  ;;  %v5299_v57 = vpop.eup %5298  ;;  %v3609_v14 = vadd.f32 %v6976_v39, %v3384_v0  ;;  %v3124_v22 = vmul.f32 %v6094_v60, %v2856_v42  ;;  %v2858_v36 = vmax.f32 %v2588_v4, 0.0 }
 0x372   : > { %v4118_v8 = vadd.f32 1.0, %v5299_v57  ;;  %v3125_v32 = vmul.f32 %v6099_v59, %v2857_v13  ;;  %v2859_v9 = vmax.f32 %v2590_v37, 0.0 }
 0x373   : > { %5308 = vrcp.f32 %v4117_v33  ;;  %v5301_v17 = vpop.eup %5300  ;;  %v3737_v27 = vsub.f32 0.0, %v3609_v14  ;;  %v3387_v24 = vpop.xlane.xlu1 %3386  ;;  %v3126_v53 = vmul.f32 %v6094_v60, %v2858_v36 }
 0x374   : > { %4372 = vst.msk [vmem:[%s6456_s17 + $0x260] sm:$0xff] %vm4295_vm2, %v5301_v17  ;;  %5310 = vrcp.f32 %v4118_v8  ;;  %v3610_v62 = vadd.f32 %v6976_v39, %v3387_v24  ;;  %v3127_v15 = vmul.f32 %v6099_v59, %v2859_v9  ;;  %v3502_v28 = vadd.f32 %v3125_v32, %v3124_v22 }
 0x375   : > { %v2593_v1 = vpop.f32.mrb[184].mxu1  ;;  %v3947_v7 = vmul.f32 1.442695, %v3737_v27 }
 0x376   : > { %v2594_v41 = vadd.f32 %v2593_v1, %v6082_v52  ;;  %v2595_v10 = vpop.f32.mrb[185].mxu1  ;;  %v3738_v51 = vsub.f32 0.0, %v3610_v62  ;;  %3503 = vadd.xlane.f32.xlu0 %v3502_v28  ;;  %v3505_v21 = vadd.f32 %v3127_v15, %v3126_v53 }
 0x377   : > { %v5303_v63 = vpop.eup %5302  ;;  %v2596_v43 = vadd.f32 %v2595_v10, %v6084_v48  ;;  %v2597_v55 = vpop.f32.mrb[186].mxu1  ;;  %5312 = vpow2.f32 %v3947_v7 }
 0x378   : > { %4373 = vst.msk [vmem:[%s6456_s17 + $0x268] sm:$0xff] %vm4295_vm2, %v5303_v63  ;;  %v2860_v11 = vmax.f32 %v2594_v41, 0.0  ;;  %v2598_v61 = vadd.f32 %v2597_v55, %v6082_v52  ;;  %v2599_v38 = vpop.f32.mrb[187].mxu1  ;;  %v3949_v46 = vmul.f32 1.442695, %v3738_v51  ;;  %3506 = vadd.xlane.f32.xlu1 %v3505_v21 }
 0x379   : > { %v5305_v35 = vpop.eup %5304  ;;  %v2861_v29 = vmax.f32 %v2596_v43, 0.0  ;;  %v2600_v30 = vadd.f32 %v2599_v38, %v6084_v48  ;;  %v3390_v3 = vpop.xlane.xlu0 %3389 }
 0x37a   : > { %v4119_v47 = vadd.f32 1.0, %v5305_v35  ;;  %v3128_v16 = vmul.f32 %v6094_v60, %v2860_v11  ;;  %v2862_v18 = vmax.f32 %v2598_v61, 0.0  ;;  %v5307_v23 = vpop.eup %5306  ;;  %5314 = vpow2.f32 %v3949_v46 }
 0x37b   : > { %v3129_v31 = vmul.f32 %v6099_v59, %v2861_v29  ;;  %v2863_v34 = vmax.f32 %v2600_v30, 0.0  ;;  %v4120_v54 = vadd.f32 1.0, %v5307_v23  ;;  %v3611_v25 = vadd.f32 %v6976_v39, %v3390_v3 }
 0x37c   : > { %5316 = vrcp.f32 %v4119_v47  ;;  %v3130_v6 = vmul.f32 %v6094_v60, %v2862_v18  ;;  %v3393_v12 = vpop.xlane.xlu1 %3392 }
 0x37d   : > { %v5309_v56 = vpop.eup %5308  ;;  %v3131_v40 = vmul.f32 %v6099_v59, %v2863_v34  ;;  %v2603_v49 = vpop.f32.mrb[188].mxu1  ;;  %v3508_v45 = vadd.f32 %v3129_v31, %v3128_v16  ;;  %5318 = vrcp.f32 %v4120_v54  ;;  %v3739_v5 = vsub.f32 0.0, %v3611_v25 }
 0x37e   : > { %4374 = vst.msk [vmem:[%s6456_s17 + $0x270] sm:$0xff] %vm4295_vm2, %v5309_v56  ;;  %v2604_v20 = vadd.f32 %v2603_v49, %v6082_v52  ;;  %v2605_v19 = vpop.f32.mrb[189].mxu1  ;;  %v5311_v44 = vpop.eup %5310  ;;  %v3612_v4 = vadd.f32 %v6976_v39, %v3393_v12 }
 0x37f   : > { %v2606_v2 = vadd.f32 %v2605_v19, %v6084_v48  ;;  %v2607_v50 = vpop.f32.mrb[190].mxu1  ;;  %3509 = vadd.xlane.f32.xlu0 %v3508_v45  ;;  %v3511_v42 = vadd.f32 %v3131_v40, %v3130_v6  ;;  %4375 = vst.msk [vmem:[%s6456_s17 + $0x278] sm:$0xff] %vm4295_vm2, %v5311_v44  ;;  %v3951_v0 = vmul.f32 1.442695, %v3739_v5 }
 0x380   : > { %v2864_v58 = vmax.f32 %v2604_v20, 0.0  ;;  %v2608_v26 = vadd.f32 %v2607_v50, %v6082_v52  ;;  %v2609_v33 = vpop.f32.mrb[191].mxu1  ;;  %v3740_v14 = vsub.f32 0.0, %v3612_v4 }
 0x381   : > { %v2865_v13 = vmax.f32 %v2606_v2, 0.0  ;;  %v2610_v37 = vadd.f32 %v2609_v33, %v6084_v48  ;;  %3512 = vadd.xlane.f32.xlu1 %v3511_v42  ;;  %v5313_v57 = vpop.eup %5312  ;;  %5320 = vpow2.f32 %v3951_v0 }
 0x382   : > { %v3132_v22 = vmul.f32 %v6094_v60, %v2864_v58  ;;  %v2866_v36 = vmax.f32 %v2608_v26, 0.0  ;;  %v4121_v8 = vadd.f32 1.0, %v5313_v57  ;;  %v3953_v17 = vmul.f32 1.442695, %v3740_v14 }
 0x383   : > { %v3133_v32 = vmul.f32 %v6099_v59, %v2865_v13  ;;  %v2867_v9 = vmax.f32 %v2610_v37, 0.0  ;;  %v3396_v27 = vpop.xlane.xlu0 %3395  ;;  %v7163_v13 = vld [vmem:[#allocation2] ss:$0 sm:$0xff] }
 0x384   : > { %v3134_v52 = vmul.f32 %v6094_v60, %v2866_v36  ;;  %v5315_v24 = vpop.eup %5314  ;;  %5322 = vrcp.f32 %v4121_v8  ;;  %v3613_v48 = vadd.f32 %v6976_v39, %v3396_v27 }
 0x385   : > { %v3135_v53 = vmul.f32 %v6099_v59, %v2867_v9  ;;  %v3514_v62 = vadd.f32 %v3133_v32, %v3132_v22  ;;  %v4122_v1 = vadd.f32 1.0, %v5315_v24  ;;  %5324 = vpow2.f32 %v3953_v17 }
 0x386   : > { %v5317_v15 = vpop.eup %5316  ;;  %v3741_v28 = vsub.f32 0.0, %v3613_v48 }
 0x387   : > { %4376 = vst.msk [vmem:[%s6456_s17 + $0x280] sm:$0xff] %vm4295_vm2, %v5317_v15  ;;  %v3399_v7 = vpop.xlane.xlu1 %3398  ;;  %3515 = vadd.xlane.f32.xlu0 %v3514_v62  ;;  %v3517_v41 = vadd.f32 %v3135_v53, %v3134_v52  ;;  %v5319_v10 = vpop.eup %5318  ;;  %5326 = vrcp.f32 %v4122_v1 }
 0x388   : > { %v3614_v60 = vadd.f32 %v6976_v39, %v3399_v7  ;;  %4377 = vst.msk [vmem:[%s6456_s17 + $0x288] sm:$0xff] %vm4295_vm2, %v5319_v10  ;;  %v3955_v63 = vmul.f32 1.442695, %v3741_v28 }
 0x389   : > { %3518 = vadd.xlane.f32.xlu1 %v3517_v41 }
 0x38a   : > { %v3742_v59 = vsub.f32 0.0, %v3614_v60  ;;  %5328 = vpow2.f32 %v3955_v63 }
 0x38b   : > { %v5321_v43 = vpop.eup %5320 }
 0x38c   : > { %v3957_v51 = vmul.f32 1.442695, %v3742_v59  ;;  %v4123_v55 = vadd.f32 1.0, %v5321_v43 }
 0x38d   : > { %v3402_v21 = vpop.xlane.xlu0 %3401 }
 0x38e   : > { %5330 = vpow2.f32 %v3957_v51  ;;  %v5323_v11 = vpop.eup %5322  ;;  %v3615_v61 = vadd.f32 %v6976_v39, %v3402_v21 }
 0x38f   : > { %v5325_v38 = vpop.eup %5324  ;;  %4378 = vst.msk [vmem:[%s6456_s17 + $0x290] sm:$0xff] %vm4295_vm2, %v5323_v11  ;;  %5332 = vrcp.f32 %v4123_v55 }
 0x390   : > { %v4124_v35 = vadd.f32 1.0, %v5325_v38  ;;  %v3743_v46 = vsub.f32 0.0, %v3615_v61 }
 0x391   : > { %v3405_v29 = vpop.xlane.xlu1 %3404  ;;  %v5327_v30 = vpop.eup %5326 }
 0x392   : > { %v3616_v47 = vadd.f32 %v6976_v39, %v3405_v29  ;;  %4379 = vst.msk [vmem:[%s6456_s17 + $0x298] sm:$0xff] %vm4295_vm2, %v5327_v30  ;;  %5334 = vrcp.f32 %v4124_v35  ;;  %v3959_v16 = vmul.f32 1.442695, %v3743_v46 }
 0x394   : > { %v3744_v18 = vsub.f32 0.0, %v3616_v47  ;;  %v5329_v23 = vpop.eup %5328  ;;  %5336 = vpow2.f32 %v3959_v16 }
 0x395   : > { %v4125_v31 = vadd.f32 1.0, %v5329_v23 }
 0x396   : > { %v3961_v34 = vmul.f32 1.442695, %v3744_v18  ;;  %v3408_v54 = vpop.xlane.xlu0 %3407 }
 0x397   : > { %v3617_v3 = vadd.f32 %v6976_v39, %v3408_v54  ;;  %5338 = vrcp.f32 %v4125_v31 }
 0x398   : > { %v5331_v6 = vpop.eup %5330  ;;  %5340 = vpow2.f32 %v3961_v34 }
 0x399   : > { %v4126_v56 = vadd.f32 1.0, %v5331_v6  ;;  %v3745_v25 = vsub.f32 0.0, %v3617_v3  ;;  %v5333_v40 = vpop.eup %5332  ;;  %v3411_v45 = vpop.xlane.xlu1 %3410 }
 0x39a   : > { %4380 = vst.msk [vmem:[%s6456_s17 + $0x2a0] sm:$0xff] %vm4295_vm2, %v5333_v40  ;;  %v3618_v20 = vadd.f32 %v6976_v39, %v3411_v45 }
 0x39b   : > { %5342 = vrcp.f32 %v4126_v56  ;;  %v3963_v49 = vmul.f32 1.442695, %v3745_v25 }
 0x39c   : > { %v5335_v19 = vpop.eup %5334  ;;  %v3746_v44 = vsub.f32 0.0, %v3618_v20 }
 0x39d   : > { %5344 = vpow2.f32 %v3963_v49  ;;  %4381 = vst.msk [vmem:[%s6456_s17 + $0x2a8] sm:$0xff] %vm4295_vm2, %v5335_v19 }
 0x39e   : > { %v5337_v5 = vpop.eup %5336  ;;  %v3965_v2 = vmul.f32 1.442695, %v3746_v44 }
 0x39f   : > { %v4127_v12 = vadd.f32 1.0, %v5337_v5 }
 0x3a1   : > { %v3414_v50 = vpop.xlane.xlu0 %3413  ;;  %v5339_v42 = vpop.eup %5338  ;;  %5346 = vrcp.f32 %v4127_v12 }
 0x3a2   : > { %v3619_v4 = vadd.f32 %v6976_v39, %v3414_v50  ;;  %v5341_v58 = vpop.eup %5340  ;;  %4382 = vst.msk [vmem:[%s6456_s17 + $0x2b0] sm:$0xff] %vm4295_vm2, %v5339_v42  ;;  %5348 = vpow2.f32 %v3965_v2 }
 0x3a3   : > { %v3417_v26 = vpop.xlane.xlu1 %3416  ;;  %v4128_v33 = vadd.f32 1.0, %v5341_v58 }
 0x3a4   : > { %v3747_v0 = vsub.f32 0.0, %v3619_v4  ;;  %v3620_v37 = vadd.f32 %v7163_v13, %v3417_v26 }
 0x3a5   : > { %v5343_v57 = vpop.eup %5342  ;;  %5350 = vrcp.f32 %v4128_v33 }
 0x3a6   : > { %4383 = vst.msk [vmem:[%s6456_s17 + $0x2b8] sm:$0xff] %vm4295_vm2, %v5343_v57  ;;  %v3967_v14 = vmul.f32 1.442695, %v3747_v0  ;;  %v3748_v22 = vsub.f32 0.0, %v3620_v37 }
 0x3a7   : > { %v5345_v36 = vpop.eup %5344  ;;  %v3420_v32 = vpop.xlane.xlu0 %3419 }
 0x3a8   : > { %v4129_v39 = vadd.f32 1.0, %v5345_v36  ;;  %5352 = vpow2.f32 %v3967_v14  ;;  %v3969_v8 = vmul.f32 1.442695, %v3748_v22  ;;  %v3621_v9 = vadd.f32 %v7163_v13, %v3420_v32 }
 0x3a9   : > { %v3423_v17 = vpop.xlane.xlu1 %3422 }
 0x3aa   : > { %5354 = vrcp.f32 %v4129_v39  ;;  %v3749_v27 = vsub.f32 0.0, %v3621_v9  ;;  %v3622_v52 = vadd.f32 %v7163_v13, %v3423_v17 }
 0x3ab   : > { %5356 = vpow2.f32 %v3969_v8  ;;  %v5347_v24 = vpop.eup %5346 }
 0x3ac   : > { %v5349_v48 = vpop.eup %5348  ;;  %4384 = vst.msk [vmem:[%s6456_s17 + $0x2c0] sm:$0xff] %vm4295_vm2, %v5347_v24  ;;  %v3971_v53 = vmul.f32 1.442695, %v3749_v27  ;;  %v3750_v62 = vsub.f32 0.0, %v3622_v52 }
 0x3ad   : > { %v4130_v15 = vadd.f32 1.0, %v5349_v48 }
 0x3ae   : > { %5358 = vpow2.f32 %v3971_v53  ;;  %v3973_v1 = vmul.f32 1.442695, %v3750_v62 }
 0x3af   : > { %v3426_v28 = vpop.xlane.xlu0 %3425  ;;  %v5351_v7 = vpop.eup %5350  ;;  %5360 = vrcp.f32 %v4130_v15 }
 0x3b0   : > { %v3623_v41 = vadd.f32 %v7163_v13, %v3426_v28  ;;  %4385 = vst.msk [vmem:[%s6456_s17 + $0x2c8] sm:$0xff] %vm4295_vm2, %v5351_v7  ;;  %5362 = vpow2.f32 %v3973_v1 }
 0x3b1   : > { %v3429_v10 = vpop.xlane.xlu1 %3428 }
 0x3b2   : > { %v5353_v60 = vpop.eup %5352  ;;  %v3751_v63 = vsub.f32 0.0, %v3623_v41  ;;  %v3624_v59 = vadd.f32 %v7163_v13, %v3429_v10 }
 0x3b3   : > { %v4131_v51 = vadd.f32 1.0, %v5353_v60 }
 0x3b4   : > { %v5355_v43 = vpop.eup %5354  ;;  %v3975_v55 = vmul.f32 1.442695, %v3751_v63  ;;  %v3752_v21 = vsub.f32 0.0, %v3624_v59  ;;  %v3432_v11 = vpop.xlane.xlu0 %3431 }
 0x3b5   : > { %v5357_v61 = vpop.eup %5356  ;;  %4386 = vst.msk [vmem:[%s6456_s17 + $0x2d0] sm:$0xff] %vm4295_vm2, %v5355_v43  ;;  %5364 = vrcp.f32 %v4131_v51  ;;  %v3625_v38 = vadd.f32 %v7163_v13, %v3432_v11 }
 0x3b6   : > { %v4132_v35 = vadd.f32 1.0, %v5357_v61  ;;  %5366 = vpow2.f32 %v3975_v55  ;;  %v3977_v46 = vmul.f32 1.442695, %v3752_v21  ;;  %v3435_v30 = vpop.xlane.xlu1 %3434 }
 0x3b7   : > { %v3753_v29 = vsub.f32 0.0, %v3625_v38  ;;  %v3626_v47 = vadd.f32 %v7163_v13, %v3435_v30 }
 0x3b8   : > { %5368 = vrcp.f32 %v4132_v35  ;;  %v5359_v16 = vpop.eup %5358 }
 0x3b9   : > { %5370 = vpow2.f32 %v3977_v46  ;;  %v3979_v18 = vmul.f32 1.442695, %v3753_v29  ;;  %v5361_v23 = vpop.eup %5360  ;;  %v4133_v31 = vadd.f32 1.0, %v5359_v16  ;;  %v3754_v34 = vsub.f32 0.0, %v3626_v47 }
 0x3ba   : > { %v5363_v54 = vpop.eup %5362  ;;  %4387 = vst.msk [vmem:[%s6456_s17 + $0x2d8] sm:$0xff] %vm4295_vm2, %v5361_v23 }
 0x3bb   : > { %5372 = vpow2.f32 %v3979_v18  ;;  %v4134_v3 = vadd.f32 1.0, %v5363_v54  ;;  %v3981_v6 = vmul.f32 1.442695, %v3754_v34 }
 0x3bc   : > { %5374 = vrcp.f32 %v4133_v31  ;;  %v3438_v56 = vpop.xlane.xlu0 %3437 }
 0x3bd   : > { %v3627_v25 = vadd.f32 %v7163_v13, %v3438_v56  ;;  %5376 = vrcp.f32 %v4134_v3 }
 0x3be   : > { %v3441_v40 = vpop.xlane.xlu1 %3440  ;;  %5378 = vpow2.f32 %v3981_v6 }
 0x3bf   : > { %v5365_v49 = vpop.eup %5364  ;;  %v3755_v45 = vsub.f32 0.0, %v3627_v25  ;;  %v3628_v20 = vadd.f32 %v7163_v13, %v3441_v40 }
 0x3c0   : > { %v5367_v19 = vpop.eup %5366  ;;  %4388 = vst.msk [vmem:[%s6456_s17 + $0x2e0] sm:$0xff] %vm4295_vm2, %v5365_v49 }
 0x3c1   : > { %v4135_v44 = vadd.f32 1.0, %v5367_v19  ;;  %v3983_v5 = vmul.f32 1.442695, %v3755_v45  ;;  %v3756_v12 = vsub.f32 0.0, %v3628_v20 }
 0x3c2   : > { %v5369_v2 = vpop.eup %5368  ;;  %v3444_v50 = vpop.xlane.xlu0 %3443 }
 0x3c3   : > { %v5371_v42 = vpop.eup %5370  ;;  %4389 = vst.msk [vmem:[%s6456_s17 + $0x2e8] sm:$0xff] %vm4295_vm2, %v5369_v2  ;;  %5380 = vrcp.f32 %v4135_v44  ;;  %v3985_v4 = vmul.f32 1.442695, %v3756_v12  ;;  %v3629_v58 = vadd.f32 %v7163_v13, %v3444_v50 }
 0x3c4   : > { %v4136_v26 = vadd.f32 1.0, %v5371_v42  ;;  %5382 = vpow2.f32 %v3983_v5  ;;  %v3447_v33 = vpop.xlane.xlu1 %3446 }
 0x3c5   : > { %v5373_v0 = vpop.eup %5372  ;;  %5384 = vpow2.f32 %v3985_v4  ;;  %v3757_v37 = vsub.f32 0.0, %v3629_v58  ;;  %v3630_v57 = vadd.f32 %v7163_v13, %v3447_v33 }
 0x3c6   : > { %v5375_v14 = vpop.eup %5374  ;;  %5386 = vrcp.f32 %v4136_v26  ;;  %v4137_v22 = vadd.f32 1.0, %v5373_v0 }
 0x3c7   : > { %4390 = vst.msk [vmem:[%s6456_s17 + $0x2f0] sm:$0xff] %vm4295_vm2, %v5375_v14  ;;  %v3987_v36 = vmul.f32 1.442695, %v3757_v37  ;;  %v3758_v39 = vsub.f32 0.0, %v3630_v57  ;;  %v5377_v8 = vpop.eup %5376 }
 0x3c8   : > { %5388 = vrcp.f32 %v4137_v22  ;;  %v5379_v32 = vpop.eup %5378  ;;  %4391 = vst.msk [vmem:[%s6456_s17 + $0x2f8] sm:$0xff] %vm4295_vm2, %v5377_v8 }
 0x3c9   : > { %5390 = vpow2.f32 %v3987_v36  ;;  %v3989_v9 = vmul.f32 1.442695, %v3758_v39  ;;  %v3450_v17 = vpop.xlane.xlu0 %3449  ;;  %v4138_v27 = vadd.f32 1.0, %v5379_v32 }
 0x3ca   : > { %v3631_v52 = vadd.f32 %v7163_v13, %v3450_v17  ;;  %v3453_v24 = vpop.xlane.xlu1 %3452 }
 0x3cb   : > { %5392 = vpow2.f32 %v3989_v9  ;;  %v3632_v48 = vadd.f32 %v7163_v13, %v3453_v24 }
 0x3cc   : > { %5394 = vrcp.f32 %v4138_v27  ;;  %v3759_v53 = vsub.f32 0.0, %v3631_v52 }
 0x3cd   : > { %v5381_v62 = vpop.eup %5380  ;;  %v3760_v15 = vsub.f32 0.0, %v3632_v48 }
 0x3ce   : > { %v5383_v1 = vpop.eup %5382  ;;  %4392 = vst.msk [vmem:[%s6456_s17 + $0x300] sm:$0xff] %vm4295_vm2, %v5381_v62  ;;  %v3991_v28 = vmul.f32 1.442695, %v3759_v53 }
 0x3cf   : > { %v5385_v7 = vpop.eup %5384  ;;  %v4139_v41 = vadd.f32 1.0, %v5383_v1  ;;  %v3993_v10 = vmul.f32 1.442695, %v3760_v15  ;;  %v3456_v60 = vpop.xlane.xlu0 %3455 }
 0x3d0   : > { %v5387_v63 = vpop.eup %5386  ;;  %v4140_v59 = vadd.f32 1.0, %v5385_v7  ;;  %5396 = vpow2.f32 %v3991_v28  ;;  %v3633_v51 = vadd.f32 %v7163_v13, %v3456_v60 }
 0x3d1   : > { %4393 = vst.msk [vmem:[%s6456_s17 + $0x308] sm:$0xff] %vm4295_vm2, %v5387_v63  ;;  %5398 = vrcp.f32 %v4139_v41  ;;  %v3459_v43 = vpop.xlane.xlu1 %3458 }
 0x3d2   : > { %v5389_v55 = vpop.eup %5388  ;;  %5400 = vrcp.f32 %v4140_v59  ;;  %v3761_v21 = vsub.f32 0.0, %v3633_v51  ;;  %v3634_v11 = vadd.f32 %v7163_v13, %v3459_v43 }
 0x3d3   : > { %v5391_v61 = vpop.eup %5390  ;;  %4394 = vst.msk [vmem:[%s6456_s17 + $0x310] sm:$0xff] %vm4295_vm2, %v5389_v55  ;;  %5402 = vpow2.f32 %v3993_v10 }
 0x3d4   : > { %v4141_v38 = vadd.f32 1.0, %v5391_v61  ;;  %v3995_v35 = vmul.f32 1.442695, %v3761_v21  ;;  %v3762_v46 = vsub.f32 0.0, %v3634_v11  ;;  %v3462_v29 = vpop.xlane.xlu0 %3461 }
 0x3d5   : > { %v5393_v30 = vpop.eup %5392  ;;  %v3635_v47 = vadd.f32 %v7163_v13, %v3462_v29 }
 0x3d6   : > { %v5395_v16 = vpop.eup %5394  ;;  %5404 = vrcp.f32 %v4141_v38  ;;  %v4142_v18 = vadd.f32 1.0, %v5393_v30  ;;  %v3997_v23 = vmul.f32 1.442695, %v3762_v46 }
 0x3d7   : > { %4395 = vst.msk [vmem:[%s6456_s17 + $0x318] sm:$0xff] %vm4295_vm2, %v5395_v16  ;;  %5406 = vpow2.f32 %v3995_v35  ;;  %v3763_v31 = vsub.f32 0.0, %v3635_v47 }
 0x3d8   : > { %5408 = vrcp.f32 %v4142_v18 }
 0x3d9   : > { %5410 = vpow2.f32 %v3997_v23  ;;  %v3999_v34 = vmul.f32 1.442695, %v3763_v31  ;;  %v3465_v54 = vpop.xlane.xlu1 %3464 }
 0x3da   : > { %v5397_v3 = vpop.eup %5396  ;;  %v3636_v6 = vadd.f32 %v7163_v13, %v3465_v54  ;;  %v3468_v56 = vpop.xlane.xlu0 %3467 }
 0x3db   : > { %v5399_v25 = vpop.eup %5398  ;;  %v4143_v40 = vadd.f32 1.0, %v5397_v3  ;;  %5412 = vpow2.f32 %v3999_v34  ;;  %v3637_v49 = vadd.f32 %v7163_v13, %v3468_v56 }
 0x3dc   : > { %v5401_v45 = vpop.eup %5400  ;;  %4396 = vst.msk [vmem:[%s6456_s17 + $0x320] sm:$0xff] %vm4295_vm2, %v5399_v25  ;;  %v3764_v20 = vsub.f32 0.0, %v3636_v6 }
 0x3dd   : > { %v5403_v19 = vpop.eup %5402  ;;  %4397 = vst.msk [vmem:[%s6456_s17 + $0x328] sm:$0xff] %vm4295_vm2, %v5401_v45  ;;  %5414 = vrcp.f32 %v4143_v40  ;;  %v3765_v44 = vsub.f32 0.0, %v3637_v49  ;;  %v3471_v5 = vpop.xlane.xlu1 %3470 }
 0x3de   : > { %v4144_v12 = vadd.f32 1.0, %v5403_v19  ;;  %v4001_v2 = vmul.f32 1.442695, %v3764_v20  ;;  %v3638_v50 = vadd.f32 %v7163_v13, %v3471_v5 }
 0x3df   : > { %v4003_v42 = vmul.f32 1.442695, %v3765_v44 }
 0x3e0   : > { %v5405_v4 = vpop.eup %5404  ;;  %5416 = vrcp.f32 %v4144_v12  ;;  %v3766_v58 = vsub.f32 0.0, %v3638_v50  ;;  %v3474_v26 = vpop.xlane.xlu0 %3473 }
 0x3e1   : > { %v5407_v33 = vpop.eup %5406  ;;  %4398 = vst.msk [vmem:[%s6456_s17 + $0x330] sm:$0xff] %vm4295_vm2, %v5405_v4  ;;  %5418 = vpow2.f32 %v4001_v2  ;;  %v3639_v0 = vadd.f32 %v7163_v13, %v3474_v26 }
 0x3e2   : > { %v5409_v37 = vpop.eup %5408  ;;  %v4145_v57 = vadd.f32 1.0, %v5407_v33  ;;  %5420 = vpow2.f32 %v4003_v42  ;;  %v4005_v14 = vmul.f32 1.442695, %v3766_v58  ;;  %v3477_v22 = vpop.xlane.xlu1 %3476 }
 0x3e3   : > { %v5411_v36 = vpop.eup %5410  ;;  %4399 = vst.msk [vmem:[%s6456_s17 + $0x338] sm:$0xff] %vm4295_vm2, %v5409_v37  ;;  %v3767_v39 = vsub.f32 0.0, %v3639_v0  ;;  %v3640_v8 = vadd.f32 %v7163_v13, %v3477_v22 }
 0x3e4   : > { %5422 = vrcp.f32 %v4145_v57  ;;  %v4146_v32 = vadd.f32 1.0, %v5411_v36 }
 0x3e5   : > { %v5413_v9 = vpop.eup %5412  ;;  %5424 = vpow2.f32 %v4005_v14  ;;  %v4007_v17 = vmul.f32 1.442695, %v3767_v39  ;;  %v3768_v27 = vsub.f32 0.0, %v3640_v8  ;;  %v3480_v52 = vpop.xlane.xlu0 %3479 }
 0x3e6   : > { %5426 = vrcp.f32 %v4146_v32  ;;  %v4147_v24 = vadd.f32 1.0, %v5413_v9  ;;  %v3641_v48 = vadd.f32 %v7163_v13, %v3480_v52  ;;  %v3483_v1 = vpop.xlane.xlu1 %3482 }
 0x3e7   : > { %v5415_v53 = vpop.eup %5414  ;;  %5428 = vpow2.f32 %v4007_v17  ;;  %v4009_v62 = vmul.f32 1.442695, %v3768_v27  ;;  %v3642_v41 = vadd.f32 %v7163_v13, %v3483_v1 }
 0x3e8   : > { %4400 = vst.msk [vmem:[%s6456_s17 + $0x340] sm:$0xff] %vm4295_vm2, %v5415_v53  ;;  %5430 = vrcp.f32 %v4147_v24  ;;  %v3769_v15 = vsub.f32 0.0, %v3641_v48 }
 0x3e9   : > { %5432 = vpow2.f32 %v4009_v62  ;;  %v3770_v59 = vsub.f32 0.0, %v3642_v41 }
 0x3ea   : > { %v5417_v28 = vpop.eup %5416  ;;  %v4011_v7 = vmul.f32 1.442695, %v3769_v15 }
 0x3eb   : > { %v5419_v10 = vpop.eup %5418  ;;  %4401 = vst.msk [vmem:[%s6456_s17 + $0x348] sm:$0xff] %vm4295_vm2, %v5417_v28  ;;  %v4013_v21 = vmul.f32 1.442695, %v3770_v59 }
 0x3ec   : > { %v5421_v60 = vpop.eup %5420  ;;  %v4148_v63 = vadd.f32 1.0, %v5419_v10  ;;  %5434 = vpow2.f32 %v4011_v7 }
 0x3ed   : > { %v4149_v51 = vadd.f32 1.0, %v5421_v60  ;;  %v3486_v43 = vpop.xlane.xlu0 %3485 }
 0x3ee   : > { %v5423_v55 = vpop.eup %5422  ;;  %5436 = vrcp.f32 %v4148_v63  ;;  %v3643_v11 = vadd.f32 %v7163_v13, %v3486_v43  ;;  %v3489_v61 = vpop.xlane.xlu1 %3488 }
 0x3ef   : > { %v5425_v38 = vpop.eup %5424  ;;  %4402 = vst.msk [vmem:[%s6456_s17 + $0x350] sm:$0xff] %vm4295_vm2, %v5423_v55  ;;  %5438 = vrcp.f32 %v4149_v51  ;;  %v3644_v35 = vadd.f32 %v7163_v13, %v3489_v61 }
 0x3f0   : > { %v5427_v46 = vpop.eup %5426  ;;  %v4150_v29 = vadd.f32 1.0, %v5425_v38  ;;  %5440 = vpow2.f32 %v4013_v21  ;;  %v3771_v30 = vsub.f32 0.0, %v3643_v11 }
 0x3f1   : > { %v5429_v47 = vpop.eup %5428  ;;  %4403 = vst.msk [vmem:[%s6456_s17 + $0x358] sm:$0xff] %vm4295_vm2, %v5427_v46  ;;  %v3772_v16 = vsub.f32 0.0, %v3644_v35 }
 0x3f2   : > { %v5431_v18 = vpop.eup %5430  ;;  %5442 = vrcp.f32 %v4150_v29  ;;  %v4151_v23 = vadd.f32 1.0, %v5429_v47  ;;  %v4015_v31 = vmul.f32 1.442695, %v3771_v30 }
 0x3f3   : > { %v5433_v34 = vpop.eup %5432  ;;  %4404 = vst.msk [vmem:[%s6456_s17 + $0x360] sm:$0xff] %vm4295_vm2, %v5431_v18  ;;  %v4017_v54 = vmul.f32 1.442695, %v3772_v16  ;;  %v3492_v6 = vpop.xlane.xlu0 %3491 }
 0x3f4   : > { %5444 = vrcp.f32 %v4151_v23  ;;  %v4152_v3 = vadd.f32 1.0, %v5433_v34  ;;  %v3645_v56 = vadd.f32 %v7163_v13, %v3492_v6 }
 0x3f5   : > { %5446 = vpow2.f32 %v4015_v31 }
 0x3f6   : > { %v5435_v25 = vpop.eup %5434  ;;  %5448 = vrcp.f32 %v4152_v3  ;;  %v3495_v40 = vpop.xlane.xlu1 %3494  ;;  %v3773_v45 = vsub.f32 0.0, %v3645_v56 }
 0x3f7   : > { %v4153_v49 = vadd.f32 1.0, %v5435_v25  ;;  %5450 = vpow2.f32 %v4017_v54  ;;  %v3646_v20 = vadd.f32 %v7163_v13, %v3495_v40 }
 0x3f8   : > { %v5437_v19 = vpop.eup %5436  ;;  %v4019_v5 = vmul.f32 1.442695, %v3773_v45 }
 0x3f9   : > { %v5439_v44 = vpop.eup %5438  ;;  %4405 = vst.msk [vmem:[%s6456_s17 + $0x368] sm:$0xff] %vm4295_vm2, %v5437_v19  ;;  %5452 = vrcp.f32 %v4153_v49  ;;  %v3774_v12 = vsub.f32 0.0, %v3646_v20 }
 0x3fa   : > { %v5441_v2 = vpop.eup %5440  ;;  %4406 = vst.msk [vmem:[%s6456_s17 + $0x370] sm:$0xff] %vm4295_vm2, %v5439_v44  ;;  %5454 = vpow2.f32 %v4019_v5 }
 0x3fb   : > { %v4154_v50 = vadd.f32 1.0, %v5441_v2  ;;  %v4021_v42 = vmul.f32 1.442695, %v3774_v12  ;;  %v3498_v58 = vpop.xlane.xlu0 %3497 }
 0x3fc   : > { %v5443_v4 = vpop.eup %5442  ;;  %v3647_v26 = vadd.f32 %v7163_v13, %v3498_v58 }
 0x3fd   : > { %4407 = vst.msk [vmem:[%s6456_s17 + $0x378] sm:$0xff] %vm4295_vm2, %v5443_v4  ;;  %5456 = vrcp.f32 %v4154_v50  ;;  %v3501_v57 = vpop.xlane.xlu1 %3500 }
 0x3fe   : > { %v5445_v33 = vpop.eup %5444  ;;  %5458 = vpow2.f32 %v4021_v42  ;;  %v3775_v37 = vsub.f32 0.0, %v3647_v26  ;;  %v3648_v36 = vadd.f32 %v7163_v13, %v3501_v57 }
 0x3ff   : > { %v5447_v0 = vpop.eup %5446  ;;  %4408 = vst.msk [vmem:[%s6456_s17 + $0x380] sm:$0xff] %vm4295_vm2, %v5445_v33 }
 0x400   : > { %v5449_v14 = vpop.eup %5448  ;;  %v4155_v22 = vadd.f32 1.0, %v5447_v0  ;;  %v4023_v8 = vmul.f32 1.442695, %v3775_v37  ;;  %v3776_v9 = vsub.f32 0.0, %v3648_v36 }
 0x401   : > { %v5451_v39 = vpop.eup %5450  ;;  %4409 = vst.msk [vmem:[%s6456_s17 + $0x388] sm:$0xff] %vm4295_vm2, %v5449_v14 }
 0x402   : > { %5460 = vrcp.f32 %v4155_v22  ;;  %v4156_v32 = vadd.f32 1.0, %v5451_v39  ;;  %v4025_v27 = vmul.f32 1.442695, %v3776_v9 }
 0x403   : > { %v5453_v17 = vpop.eup %5452  ;;  %5462 = vpow2.f32 %v4023_v8  ;;  %v3504_v52 = vpop.xlane.xlu0 %3503 }
 0x404   : > { %4410 = vst.msk [vmem:[%s6456_s17 + $0x390] sm:$0xff] %vm4295_vm2, %v5453_v17  ;;  %5464 = vrcp.f32 %v4156_v32  ;;  %v5455_v24 = vpop.eup %5454  ;;  %v3649_v48 = vadd.f32 %v7163_v13, %v3504_v52 }
 0x405   : > { %v4157_v53 = vadd.f32 1.0, %v5455_v24  ;;  %5466 = vpow2.f32 %v4025_v27  ;;  %v3507_v62 = vpop.xlane.xlu1 %3506 }
 0x406   : > { %v3777_v1 = vsub.f32 0.0, %v3649_v48  ;;  %v3650_v28 = vadd.f32 %v7163_v13, %v3507_v62 }
 0x407   : > { %v5457_v15 = vpop.eup %5456  ;;  %5468 = vrcp.f32 %v4157_v53 }
 0x408   : > { %v5459_v7 = vpop.eup %5458  ;;  %4411 = vst.msk [vmem:[%s6456_s17 + $0x398] sm:$0xff] %vm4295_vm2, %v5457_v15  ;;  %v4027_v10 = vmul.f32 1.442695, %v3777_v1  ;;  %v3778_v60 = vsub.f32 0.0, %v3650_v28 }
 0x409   : > { %v4158_v41 = vadd.f32 1.0, %v5459_v7 }
 0x40a   : > { %v4029_v63 = vmul.f32 1.442695, %v3778_v60 }
 0x40b   : > { %5470 = vrcp.f32 %v4158_v41 }
 0x40c   : > { %v5461_v59 = vpop.eup %5460  ;;  %5472 = vpow2.f32 %v4027_v10  ;;  %v3510_v51 = vpop.xlane.xlu0 %3509 }
 0x40d   : > { %v5463_v43 = vpop.eup %5462  ;;  %4412 = vst.msk [vmem:[%s6456_s17 + $0x3a0] sm:$0xff] %vm4295_vm2, %v5461_v59  ;;  %5474 = vpow2.f32 %v4029_v63  ;;  %v3651_v55 = vadd.f32 %v7163_v13, %v3510_v51 }
 0x40e   : > { %v5465_v21 = vpop.eup %5464  ;;  %v4159_v11 = vadd.f32 1.0, %v5463_v43  ;;  %v3513_v61 = vpop.xlane.xlu1 %3512 }
 0x40f   : > { %4413 = vst.msk [vmem:[%s6456_s17 + $0x3a8] sm:$0xff] %vm4295_vm2, %v5465_v21  ;;  %v3779_v38 = vsub.f32 0.0, %v3651_v55  ;;  %v3652_v35 = vadd.f32 %v7163_v13, %v3513_v61  ;;  %v5467_v46 = vpop.eup %5466 }
 0x410   : > { %5476 = vrcp.f32 %v4159_v11  ;;  %v4160_v29 = vadd.f32 1.0, %v5467_v46 }
 0x411   : > { %v4031_v30 = vmul.f32 1.442695, %v3779_v38  ;;  %v3780_v47 = vsub.f32 0.0, %v3652_v35  ;;  %v5469_v16 = vpop.eup %5468 }
 0x412   : > { %4414 = vst.msk [vmem:[%s6456_s17 + $0x3b0] sm:$0xff] %vm4295_vm2, %v5469_v16  ;;  %5478 = vrcp.f32 %v4160_v29 }
 0x413   : > { %v4033_v18 = vmul.f32 1.442695, %v3780_v47  ;;  %5480 = vpow2.f32 %v4031_v30 }
 0x414   : > { %v3516_v23 = vpop.xlane.xlu0 %3515 }
 0x415   : > { %v5471_v31 = vpop.eup %5470  ;;  %5482 = vpow2.f32 %v4033_v18  ;;  %v3653_v34 = vadd.f32 %v7163_v13, %v3516_v23 }
 0x416   : > { %v5473_v54 = vpop.eup %5472  ;;  %4415 = vst.msk [vmem:[%s6456_s17 + $0x3b8] sm:$0xff] %vm4295_vm2, %v5471_v31  ;;  %v3519_v3 = vpop.xlane.xlu1 %3518 }
 0x417   : > { %v5475_v6 = vpop.eup %5474  ;;  %v4161_v56 = vadd.f32 1.0, %v5473_v54  ;;  %v3781_v25 = vsub.f32 0.0, %v3653_v34  ;;  %v3654_v40 = vadd.f32 %v7163_v13, %v3519_v3 }
 0x418   : > { %v4162_v49 = vadd.f32 1.0, %v5475_v6 }
 0x419   : > { %5484 = vrcp.f32 %v4161_v56  ;;  %v4035_v45 = vmul.f32 1.442695, %v3781_v25  ;;  %v3782_v20 = vsub.f32 0.0, %v3654_v40 }
 0x41a   : > { %v5477_v19 = vpop.eup %5476  ;;  %5486 = vrcp.f32 %v4162_v49 }
 0x41b   : > { %4416 = vst.msk [vmem:[%s6456_s17 + $0x3c0] sm:$0xff] %vm4295_vm2, %v5477_v19  ;;  %5488 = vpow2.f32 %v4035_v45  ;;  %v4037_v44 = vmul.f32 1.442695, %v3782_v20 }
 0x41c   : > { %v5479_v5 = vpop.eup %5478 }
 0x41d   : > { %5490 = vpow2.f32 %v4037_v44  ;;  %v5481_v12 = vpop.eup %5480  ;;  %4417 = vst.msk [vmem:[%s6456_s17 + $0x3c8] sm:$0xff] %vm4295_vm2, %v5479_v5 }
 0x41e   : > { %v4163_v50 = vadd.f32 1.0, %v5481_v12 }
 0x41f   : > { %v5483_v2 = vpop.eup %5482 }
 0x420   : > { %v4164_v13 = vadd.f32 1.0, %v5483_v2  ;;  %5492 = vrcp.f32 %v4163_v50 }
 0x422   : > { %5494 = vrcp.f32 %v4164_v13 }
 0x423   : > { %v5485_v42 = vpop.eup %5484 }
 0x424   : > { %v5487_v4 = vpop.eup %5486  ;;  %4418 = vst.msk [vmem:[%s6456_s17 + $0x3d0] sm:$0xff] %vm4295_vm2, %v5485_v42 }
 0x425   : > { %v5489_v58 = vpop.eup %5488  ;;  %4419 = vst.msk [vmem:[%s6456_s17 + $0x3d8] sm:$0xff] %vm4295_vm2, %v5487_v4 }
 0x426   : > { %v4165_v26 = vadd.f32 1.0, %v5489_v58 }
 0x427   : > { %v5491_v33 = vpop.eup %5490 }
 0x428   : > { %5496 = vrcp.f32 %v4165_v26  ;;  %v4166_v0 = vadd.f32 1.0, %v5491_v33 }
 0x42a   : > { %5498 = vrcp.f32 %v4166_v0  ;;  %v5493_v37 = vpop.eup %5492 }
 0x42b   : > { %4420 = vst.msk [vmem:[%s6456_s17 + $0x3e0] sm:$0xff] %vm4295_vm2, %v5493_v37 }
 0x42c   : > { %v5495_v57 = vpop.eup %5494 }
 0x42d   : > { %4421 = vst.msk [vmem:[%s6456_s17 + $0x3e8] sm:$0xff] %vm4295_vm2, %v5495_v57 }
 0x432   : > { %v5497_v14 = vpop.eup %5496 }
 0x433   : > { %4422 = vst.msk [vmem:[%s6456_s17 + $0x3f0] sm:$0xff] %vm4295_vm2, %v5497_v14 }
 0x434   : > { %v5499_v22 = vpop.eup %5498 }
 0x435   : > { %4423 = vst.msk [vmem:[%s6456_s17 + $0x3f8] sm:$0xff] %vm4295_vm2, %v5499_v22 }
 0x436 PF: > { %s19_s26 = sadd.s32 1, %s5510_s26  }
 0x437   : > { %p16_p4 = scmp.ge.s32.totalorder %s19_s26, 6  }
 0x439   :  { %18 = sbr.rel (!%p16_p4) target bundleno = 3 (0x3), region = 78 }

</bundles_post_ra>
